<compile_context>
chip_gen: v7x
topology: tpu7x:2x2x1
jax: 0.10.0
libtpu: 0.0.40
codegen_flags: <defaults>
</compile_context>

<pallas_src>
import numpy as np
import jax
import jax.numpy as jnp
from jax.experimental import pallas as pl
from jax.experimental.pallas import tpu as pltpu

# ------------------------- model configuration (small) -------------------------
BATCH = 2
OBS_LEN = 8            # sequence length L
INPUT_SIZE = 16        # feature size F (attention feature_size)
OUTPUT_HORIZON = 4     # also the number of attention heads
HIDDEN_SIZE = 32
N_LAYERS = 2
HEADS = OUTPUT_HORIZON
HEAD_DIM = INPUT_SIZE // HEADS
assert HEAD_DIM * HEADS == INPUT_SIZE


# =============================================================================
# Fused forward kernel (no grid: everything fits in VMEM many times over)
# =============================================================================
def tpalstm_fused_kernel(xh_ref, wvT_ref, wkT_ref, wqT_ref, wfcT_ref, bfc_ref,
                         whT_ref, bh_ref,
                         wih0T_ref, whh0T_ref, b0_ref,
                         wihT_r_ref, whhT_r_ref, b_r_ref,
                         wlT_ref, bl_ref,
                         y_ref, h_scr):
    f32 = jnp.float32
    BH, L, D = xh_ref.shape              # BH = batch * heads
    B, F, HID = whT_ref.shape            # F = heads * head_dim
    NH = BH // B
    NL_REST = wihT_r_ref.shape[0]        # LSTM layers beyond layer 0
    scale = 1.0 / float(np.sqrt(F))

    # ---------------- multi-head self-attention, batched over (batch, head) --------
    xh = xh_ref[...]                                                     # (BH, L, D)
    v = jnp.einsum('bld,bde->ble', xh, wvT_ref[...], preferred_element_type=f32)
    k = jnp.einsum('bld,bde->ble', xh, wkT_ref[...], preferred_element_type=f32)
    q = jnp.einsum('bld,bde->ble', xh, wqT_ref[...], preferred_element_type=f32)
    e = jnp.einsum('bqd,bkd->bqk', q, k, preferred_element_type=f32) * scale
    e = e - jnp.max(e, axis=-1, keepdims=True)
    p = jnp.exp(e)
    p = p * pl.reciprocal(jnp.sum(p, axis=-1, keepdims=True), approx=True)
    av = jnp.einsum('bqk,bkd->bqd', p, v, preferred_element_type=f32)    # (BH, L, D)

    # fc_out: Wfc.T pre-split per head on the host into (BH, D, F); contract per
    # (batch, head) and reduce over heads with a few vector adds (outer-dim slices).
    fc = jnp.einsum('bqd,bdf->bqf', av, wfcT_ref[...], preferred_element_type=f32)
    fc4 = fc.reshape(B, NH, L, F)
    attn = fc4[:, 0]
    for hh in range(1, NH):
        attn = attn + fc4[:, hh]
    attn = attn + bfc_ref[...]                                           # (B, L, F)

    # ---------------- hidden Linear (fused, stays in VMEM) -------------------------
    xc = jnp.einsum('btf,bfh->bth', attn, whT_ref[...],
                    preferred_element_type=f32) + bh_ref[...]            # (B, L, HID)

    # ---------------- LSTM: layer-0 input projection + biases hoisted --------------
    gx0 = jnp.einsum('bth,bhe->bte', xc, wih0T_ref[...],
                     preferred_element_type=f32) + b0_ref[...]           # (B, L, 4*HID)
    whh0T = whh0T_ref[...]

    def cell(gates, c_prev):
        # PyTorch gate order i, f, g, o.  Lane slices of one (B, 4*HID) vreg; at these
        # sizes a sublane re-layout of the gates would cost as much as the slices.
        i_g = jax.nn.sigmoid(gates[:, 0 * HID:1 * HID])
        f_g = jax.nn.sigmoid(gates[:, 1 * HID:2 * HID])
        g_g = jnp.tanh(gates[:, 2 * HID:3 * HID])
        o_g = jax.nn.sigmoid(gates[:, 3 * HID:4 * HID])
        c_new = f_g * c_prev + i_g * g_g
        return o_g * jnp.tanh(c_new), c_new

    zeros = jnp.zeros((B, HID), f32)
    h = [zeros for _ in range(1 + NL_REST)]
    c = [zeros for _ in range(1 + NL_REST)]

    for t in range(L):                           # fully unrolled; all indices static
        g0 = gx0[:, t, :] + jnp.dot(h[0], whh0T, preferred_element_type=f32)
        h[0], c[0] = cell(g0, c[0])
        inp = h[0]
        for l in range(NL_REST):                 # layers >= 1: input depends on t
            gl = (jnp.dot(inp, wihT_r_ref[l], preferred_element_type=f32)
                  + jnp.dot(h[l + 1], whhT_r_ref[l], preferred_element_type=f32)
                  + b_r_ref[l])
            h[l + 1], c[l + 1] = cell(gl, c[l + 1])
            inp = h[l + 1]
        if t < L - 1:                            # H[:, t, :] = ht[-1]
            h_scr[t * B:(t + 1) * B, :] = h[-1]

    # ---------------- ReLU + final Linear; only this tiny result leaves VMEM -------
    hmat = jnp.maximum(h_scr[...], 0.0)                                  # ((L-1)*B, HID)
    y_ref[...] = jnp.dot(hmat, wlT_ref[...],
                         preferred_element_type=f32) + bl_ref[...]


# =============================================================================
# Wrapper: host-side weight re-layouts (tiny, fused under jit) + one pallas_call
# =============================================================================
@jax.jit
def tpalstm_forward(x, p):
    B, L, F = x.shape
    H, D, HID, OUT, NL = HEADS, HEAD_DIM, HIDDEN_SIZE, OUTPUT_HORIZON, N_LAYERS
    BH = B * H

    # per-(batch, head) layout for the attention input
    xh = x.reshape(B, L, H, D).transpose(0, 2, 1, 3).reshape(BH, L, D)

    bc = lambda w, n: jnp.broadcast_to(w, (n,) + w.shape)
    wvT = bc(p['Wv'].T, BH)                                   # (BH, D, D)
    wkT = bc(p['Wk'].T, BH)
    wqT = bc(p['Wq'].T, BH)
    wfcT = jnp.tile(p['Wfc'].T.reshape(H, D, F), (B, 1, 1))   # (BH, D, F), head-major
    whT = bc(p['Wh'].T, B)                                    # (B, F, HID)
    wih0T = bc(p['W_ih'][0].T, B)                             # (B, HID, 4*HID)
    whh0T = p['W_hh'][0].T                                    # (HID, 4*HID)
    wihT_r = jnp.transpose(p['W_ih'][1:], (0, 2, 1))          # (NL-1, HID, 4*HID)
    whhT_r = jnp.transpose(p['W_hh'][1:], (0, 2, 1))
    b_all = p['b_ih'] + p['b_hh']                             # (NL, 4*HID)

    y_flat = pl.pallas_call(
        tpalstm_fused_kernel,
        out_shape=jax.ShapeDtypeStruct(((L - 1) * B, OUT), jnp.float32),
        scratch_shapes=[pltpu.VMEM(((L - 1) * B, HID), jnp.float32)],
    )(xh, wvT, wkT, wqT, wfcT, p['bfc'].reshape(1, 1, F),
      whT, p['bh'].reshape(1, 1, HID),
      wih0T, whh0T, b_all[0].reshape(1, 1, 4 * HID),
      wihT_r, whhT_r, b_all[1:].reshape(NL - 1, 1, 4 * HID),
      p['Wl'].T, p['bl'].reshape(1, OUT))

    # kernel rows are (t, b)-major; restore the PyTorch (B, L-1, OUT) layout
    return y_flat.reshape(L - 1, B, OUT).transpose(1, 0, 2)


# ------------------------------ pure-JAX reference ------------------------------
def reference_forward(x, p):
    B, L, F = x.shape
    xr = x.reshape(B, L, HEADS, HEAD_DIM)
    v = jnp.einsum('nlhd,ed->nlhe', xr, p['Wv'])
    k = jnp.einsum('nlhd,ed->nlhe', xr, p['Wk'])
    q = jnp.einsum('nlhd,ed->nlhe', xr, p['Wq'])
    energy = jnp.einsum('nqhd,nkhd->nhqk', q, k)
    attn = jax.nn.softmax(energy / (F ** 0.5), axis=3)
    out = jnp.einsum('nhql,nlhd->nqhd', attn, v).reshape(B, L, F)
    out = out @ p['Wfc'].T + p['bfc']
    xc = out @ p['Wh'].T + p['bh']
    h = jnp.zeros((N_LAYERS, B, HIDDEN_SIZE), jnp.float32)
    c = jnp.zeros((N_LAYERS, B, HIDDEN_SIZE), jnp.float32)
    Hs = []
    for t in range(L):
        inp = xc[:, t, :]
        for layer in range(N_LAYERS):
            gates = (inp @ p['W_ih'][layer].T + p['b_ih'][layer]
                     + h[layer] @ p['W_hh'][layer].T + p['b_hh'][layer])
            i_g = jax.nn.sigmoid(gates[:, :HIDDEN_SIZE])
            f_g = jax.nn.sigmoid(gates[:, HIDDEN_SIZE:2 * HIDDEN_SIZE])
            g_g = jnp.tanh(gates[:, 2 * HIDDEN_SIZE:3 * HIDDEN_SIZE])
            o_g = jax.nn.sigmoid(gates[:, 3 * HIDDEN_SIZE:])
            c_new = f_g * c[layer] + i_g * g_g
            h_new = o_g * jnp.tanh(c_new)
            h = h.at[layer].set(h_new)
            c = c.at[layer].set(c_new)
            inp = h_new
        if t != L - 1:
            Hs.append(h[-1])
    Hmat = jax.nn.relu(jnp.stack(Hs, axis=1))
    y = Hmat @ p['Wl'].T + p['bl']
    return y[:, -OBS_LEN:, :]


if __name__ == "__main__":
    key = jax.random.PRNGKey(0)
    ks = jax.random.split(key, 16)

    def init(k, shape, scale=0.1):
        return (scale * jax.random.normal(k, shape)).astype(jnp.float32)

    params = {
        'Wv':   init(ks[0], (HEAD_DIM, HEAD_DIM)),
        'Wk':   init(ks[1], (HEAD_DIM, HEAD_DIM)),
        'Wq':   init(ks[2], (HEAD_DIM, HEAD_DIM)),
        'Wfc':  init(ks[3], (INPUT_SIZE, INPUT_SIZE)),
        'bfc':  init(ks[4], (INPUT_SIZE,)),
        'Wh':   init(ks[5], (HIDDEN_SIZE, INPUT_SIZE)),
        'bh':   init(ks[6], (HIDDEN_SIZE,)),
        'W_ih': init(ks[7], (N_LAYERS, 4 * HIDDEN_SIZE, HIDDEN_SIZE)),
        'W_hh': init(ks[8], (N_LAYERS, 4 * HIDDEN_SIZE, HIDDEN_SIZE)),
        'b_ih': init(ks[9], (N_LAYERS, 4 * HIDDEN_SIZE)),
        'b_hh': init(ks[10], (N_LAYERS, 4 * HIDDEN_SIZE)),
        'Wl':   init(ks[11], (OUTPUT_HORIZON, HIDDEN_SIZE)),
        'bl':   init(ks[12], (OUTPUT_HORIZON,)),
    }
    x = jax.random.normal(ks[13], (BATCH, OBS_LEN, INPUT_SIZE), dtype=jnp.float32)

    y = jax.block_until_ready(tpalstm_forward(x, params))
    # reference at full f32 accuracy; kernel runs at default (fast) MXU precision
    with jax.default_matmul_precision("highest"):
        y_ref = jax.block_until_ready(reference_forward(x, params))

    assert y.shape == (BATCH, OBS_LEN - 1, OUTPUT_HORIZON), y.shape
    np.testing.assert_allclose(np.asarray(y), np.asarray(y_ref), rtol=5e-3, atol=5e-3)
    print("KERNEL_OK")
</pallas_src>

<mosaic_0001>
module attributes {stable_mosaic.version = 11 : i64} {
  func.func @tpalstm_fused_kernel(%arg0: memref<8x8x4xf32, #tpu.memory_space<vmem>>, %arg1: memref<8x4x4xf32, #tpu.memory_space<vmem>>, %arg2: memref<8x4x4xf32, #tpu.memory_space<vmem>>, %arg3: memref<8x4x4xf32, #tpu.memory_space<vmem>>, %arg4: memref<8x4x16xf32, #tpu.memory_space<vmem>>, %arg5: memref<1x1x16xf32, #tpu.memory_space<vmem>>, %arg6: memref<2x16x32xf32, #tpu.memory_space<vmem>>, %arg7: memref<1x1x32xf32, #tpu.memory_space<vmem>>, %arg8: memref<2x32x128xf32, #tpu.memory_space<vmem>>, %arg9: memref<32x128xf32, #tpu.memory_space<vmem>>, %arg10: memref<1x1x128xf32, #tpu.memory_space<vmem>>, %arg11: memref<1x32x128xf32, #tpu.memory_space<vmem>>, %arg12: memref<1x32x128xf32, #tpu.memory_space<vmem>>, %arg13: memref<1x1x128xf32, #tpu.memory_space<vmem>>, %arg14: memref<32x4xf32, #tpu.memory_space<vmem>>, %arg15: memref<1x4xf32, #tpu.memory_space<vmem>>, %arg16: memref<14x4xf32, #tpu.memory_space<vmem>>, %arg17: memref<14x32xf32, #tpu.memory_space<vmem>>) attributes {dimension_semantics = [], scalar_prefetch = 0 : i64, scratch_operands = 1 : i64, tpu.core_type = #tpu.core_type<tc>} {
    %c0 = arith.constant 0 : index
    %c0_0 = arith.constant 0 : index
    %c0_1 = arith.constant 0 : index
    %0 = vector.load %arg0[%c0, %c0_0, %c0_1] : memref<8x8x4xf32, #tpu.memory_space<vmem>>, vector<8x8x4xf32>
    %c0_2 = arith.constant 0 : index
    %c0_3 = arith.constant 0 : index
    %c0_4 = arith.constant 0 : index
    %1 = vector.load %arg1[%c0_2, %c0_3, %c0_4] : memref<8x4x4xf32, #tpu.memory_space<vmem>>, vector<8x4x4xf32>
    "tpu.trace_start"() <{level = 10 : i32, message = "bld,bde->ble"}> : () -> ()
    %cst = arith.constant dense<0.000000e+00> : vector<8x8x4xf32>
    %2 = tpu.matmul %0, %1, %cst {dimension_numbers = #tpu.dot_dimension_numbers<[2], [1], [1], [2], [0, 0, 0, 1, 1, 2], [0], [0]>} : vector<8x8x4xf32>, vector<8x4x4xf32>, vector<8x8x4xf32> -> vector<8x8x4xf32>
    "tpu.trace_stop"() : () -> ()
    %c0_5 = arith.constant 0 : index
    %c0_6 = arith.constant 0 : index
    %c0_7 = arith.constant 0 : index
    %3 = vector.load %arg2[%c0_5, %c0_6, %c0_7] : memref<8x4x4xf32, #tpu.memory_space<vmem>>, vector<8x4x4xf32>
    "tpu.trace_start"() <{level = 10 : i32, message = "bld,bde->ble"}> : () -> ()
    %cst_8 = arith.constant dense<0.000000e+00> : vector<8x8x4xf32>
    %4 = tpu.matmul %0, %3, %cst_8 {dimension_numbers = #tpu.dot_dimension_numbers<[2], [1], [1], [2], [0, 0, 0, 1, 1, 2], [0], [0]>} : vector<8x8x4xf32>, vector<8x4x4xf32>, vector<8x8x4xf32> -> vector<8x8x4xf32>
    "tpu.trace_stop"() : () -> ()
    %c0_9 = arith.constant 0 : index
    %c0_10 = arith.constant 0 : index
    %c0_11 = arith.constant 0 : index
    %5 = vector.load %arg3[%c0_9, %c0_10, %c0_11] : memref<8x4x4xf32, #tpu.memory_space<vmem>>, vector<8x4x4xf32>
    "tpu.trace_start"() <{level = 10 : i32, message = "bld,bde->ble"}> : () -> ()
    %cst_12 = arith.constant dense<0.000000e+00> : vector<8x8x4xf32>
    %6 = tpu.matmul %0, %5, %cst_12 {dimension_numbers = #tpu.dot_dimension_numbers<[2], [1], [1], [2], [0, 0, 0, 1, 1, 2], [0], [0]>} : vector<8x8x4xf32>, vector<8x4x4xf32>, vector<8x8x4xf32> -> vector<8x8x4xf32>
    "tpu.trace_stop"() : () -> ()
    "tpu.trace_start"() <{level = 10 : i32, message = "bqd,bkd->bqk"}> : () -> ()
    %cst_13 = arith.constant dense<0.000000e+00> : vector<8x8x8xf32>
    %7 = tpu.matmul %6, %4, %cst_13 {dimension_numbers = #tpu.dot_dimension_numbers<[2], [2], [1], [1], [0, 0, 0, 1, 1, 1], [0], [0]>} : vector<8x8x4xf32>, vector<8x8x4xf32>, vector<8x8x8xf32> -> vector<8x8x8xf32>
    "tpu.trace_stop"() : () -> ()
    %cst_14 = arith.constant 2.500000e-01 : f32
    %8 = vector.broadcast %cst_14 : f32 to vector<8x8x8xf32>
    %9 = arith.mulf %7, %8 : vector<8x8x8xf32>
    %cst_15 = arith.constant dense<0xFF800000> : vector<8x8xf32>
    %10 = vector.multi_reduction <maximumf>, %9, %cst_15 [2] : vector<8x8x8xf32> to vector<8x8xf32>
    %11 = vector.shape_cast %10 : vector<8x8xf32> to vector<8x8x1xf32>
    %12 = vector.broadcast %11 : vector<8x8x1xf32> to vector<8x8x8xf32>
    %13 = arith.subf %9, %12 : vector<8x8x8xf32>
    %14 = math.exp %13 : vector<8x8x8xf32>
    %cst_16 = arith.constant dense<0.000000e+00> : vector<8x8xf32>
    %15 = vector.multi_reduction <add>, %14, %cst_16 [2] : vector<8x8x8xf32> to vector<8x8xf32>
    %16 = vector.shape_cast %15 : vector<8x8xf32> to vector<8x8x1xf32>
    %17 = tpu.reciprocal %16 {approx = true} : vector<8x8x1xf32> -> vector<8x8x1xf32>
    %18 = vector.broadcast %17 : vector<8x8x1xf32> to vector<8x8x8xf32>
    %19 = arith.mulf %14, %18 : vector<8x8x8xf32>
    "tpu.trace_start"() <{level = 10 : i32, message = "bqk,bkd->bqd"}> : () -> ()
    %cst_17 = arith.constant dense<0.000000e+00> : vector<8x8x4xf32>
    %20 = tpu.matmul %19, %2, %cst_17 {dimension_numbers = #tpu.dot_dimension_numbers<[2], [1], [1], [2], [0, 0, 0, 1, 1, 2], [0], [0]>} : vector<8x8x8xf32>, vector<8x8x4xf32>, vector<8x8x4xf32> -> vector<8x8x4xf32>
    "tpu.trace_stop"() : () -> ()
    %c0_18 = arith.constant 0 : index
    %c0_19 = arith.constant 0 : index
    %c0_20 = arith.constant 0 : index
    %21 = vector.load %arg4[%c0_18, %c0_19, %c0_20] : memref<8x4x16xf32, #tpu.memory_space<vmem>>, vector<8x4x16xf32>
    "tpu.trace_start"() <{level = 10 : i32, message = "bqd,bdf->bqf"}> : () -> ()
    %cst_21 = arith.constant dense<0.000000e+00> : vector<8x8x16xf32>
    %22 = tpu.matmul %20, %21, %cst_21 {dimension_numbers = #tpu.dot_dimension_numbers<[2], [1], [1], [2], [0, 0, 0, 1, 1, 2], [0], [0]>} : vector<8x8x4xf32>, vector<8x4x16xf32>, vector<8x8x16xf32> -> vector<8x8x16xf32>
    "tpu.trace_stop"() : () -> ()
    %23 = vector.shape_cast %22 : vector<8x8x16xf32> to vector<2x4x8x16xf32>
    %24 = vector.extract_strided_slice %23 {offsets = [0, 0, 0, 0], sizes = [2, 1, 8, 16], strides = [1, 1, 1, 1]} : vector<2x4x8x16xf32> to vector<2x1x8x16xf32>
    %25 = vector.shape_cast %24 : vector<2x1x8x16xf32> to vector<2x8x16xf32>
    %26 = vector.extract_strided_slice %23 {offsets = [0, 1, 0, 0], sizes = [2, 1, 8, 16], strides = [1, 1, 1, 1]} : vector<2x4x8x16xf32> to vector<2x1x8x16xf32>
    %27 = vector.shape_cast %26 : vector<2x1x8x16xf32> to vector<2x8x16xf32>
    %28 = arith.addf %25, %27 : vector<2x8x16xf32>
    %29 = vector.extract_strided_slice %23 {offsets = [0, 2, 0, 0], sizes = [2, 1, 8, 16], strides = [1, 1, 1, 1]} : vector<2x4x8x16xf32> to vector<2x1x8x16xf32>
    %30 = vector.shape_cast %29 : vector<2x1x8x16xf32> to vector<2x8x16xf32>
    %31 = arith.addf %28, %30 : vector<2x8x16xf32>
    %32 = vector.extract_strided_slice %23 {offsets = [0, 3, 0, 0], sizes = [2, 1, 8, 16], strides = [1, 1, 1, 1]} : vector<2x4x8x16xf32> to vector<2x1x8x16xf32>
    %33 = vector.shape_cast %32 : vector<2x1x8x16xf32> to vector<2x8x16xf32>
    %34 = arith.addf %31, %33 : vector<2x8x16xf32>
    %c0_22 = arith.constant 0 : index
    %c0_23 = arith.constant 0 : index
    %c0_24 = arith.constant 0 : index
    %35 = vector.load %arg5[%c0_22, %c0_23, %c0_24] : memref<1x1x16xf32, #tpu.memory_space<vmem>>, vector<1x1x16xf32>
    %36 = vector.broadcast %35 : vector<1x1x16xf32> to vector<2x8x16xf32>
    %37 = arith.addf %34, %36 : vector<2x8x16xf32>
    %c0_25 = arith.constant 0 : index
    %c0_26 = arith.constant 0 : index
    %c0_27 = arith.constant 0 : index
    %38 = vector.load %arg6[%c0_25, %c0_26, %c0_27] : memref<2x16x32xf32, #tpu.memory_space<vmem>>, vector<2x16x32xf32>
    "tpu.trace_start"() <{level = 10 : i32, message = "btf,bfh->bth"}> : () -> ()
    %cst_28 = arith.constant dense<0.000000e+00> : vector<2x8x32xf32>
    %39 = tpu.matmul %37, %38, %cst_28 {dimension_numbers = #tpu.dot_dimension_numbers<[2], [1], [1], [2], [0, 0, 0, 1, 1, 2], [0], [0]>} : vector<2x8x16xf32>, vector<2x16x32xf32>, vector<2x8x32xf32> -> vector<2x8x32xf32>
    "tpu.trace_stop"() : () -> ()
    %c0_29 = arith.constant 0 : index
    %c0_30 = arith.constant 0 : index
    %c0_31 = arith.constant 0 : index
    %40 = vector.load %arg7[%c0_29, %c0_30, %c0_31] : memref<1x1x32xf32, #tpu.memory_space<vmem>>, vector<1x1x32xf32>
    %41 = vector.broadcast %40 : vector<1x1x32xf32> to vector<2x8x32xf32>
    %42 = arith.addf %39, %41 : vector<2x8x32xf32>
    %c0_32 = arith.constant 0 : index
    %c0_33 = arith.constant 0 : index
    %c0_34 = arith.constant 0 : index
    %43 = vector.load %arg8[%c0_32, %c0_33, %c0_34] : memref<2x32x128xf32, #tpu.memory_space<vmem>>, vector<2x32x128xf32>
    "tpu.trace_start"() <{level = 10 : i32, message = "bth,bhe->bte"}> : () -> ()
    %cst_35 = arith.constant dense<0.000000e+00> : vector<2x8x128xf32>
    %44 = tpu.matmul %42, %43, %cst_35 {dimension_numbers = #tpu.dot_dimension_numbers<[2], [1], [1], [2], [0, 0, 0, 1, 1, 2], [0], [0]>} : vector<2x8x32xf32>, vector<2x32x128xf32>, vector<2x8x128xf32> -> vector<2x8x128xf32>
    "tpu.trace_stop"() : () -> ()
    %c0_36 = arith.constant 0 : index
    %c0_37 = arith.constant 0 : index
    %c0_38 = arith.constant 0 : index
    %45 = vector.load %arg10[%c0_36, %c0_37, %c0_38] : memref<1x1x128xf32, #tpu.memory_space<vmem>>, vector<1x1x128xf32>
    %46 = vector.broadcast %45 : vector<1x1x128xf32> to vector<2x8x128xf32>
    %47 = arith.addf %44, %46 : vector<2x8x128xf32>
    %c0_39 = arith.constant 0 : index
    %c0_40 = arith.constant 0 : index
    %48 = vector.load %arg9[%c0_39, %c0_40] : memref<32x128xf32, #tpu.memory_space<vmem>>, vector<32x128xf32>
    %cst_41 = arith.constant 0.000000e+00 : f32
    %49 = vector.broadcast %cst_41 : f32 to vector<2x32xf32>
    %50 = vector.extract_strided_slice %47 {offsets = [0, 0, 0], sizes = [2, 1, 128], strides = [1, 1, 1]} : vector<2x8x128xf32> to vector<2x1x128xf32>
    %51 = vector.shape_cast %50 : vector<2x1x128xf32> to vector<2x128xf32>
    %cst_42 = arith.constant dense<0.000000e+00> : vector<2x128xf32>
    %52 = tpu.matmul %49, %48, %cst_42 {dimension_numbers = #tpu.dot_dimension_numbers<[1], [0], [0], [1], [0, 0, 1, 1], [], []>} : vector<2x32xf32>, vector<32x128xf32>, vector<2x128xf32> -> vector<2x128xf32>
    %53 = arith.addf %51, %52 : vector<2x128xf32>
    %54 = vector.extract_strided_slice %53 {offsets = [0, 0], sizes = [2, 32], strides = [1, 1]} : vector<2x128xf32> to vector<2x32xf32>
    %55 = arith.negf %54 : vector<2x32xf32>
    %56 = math.exp %55 : vector<2x32xf32>
    %cst_43 = arith.constant 1.000000e+00 : f32
    %57 = vector.broadcast %cst_43 : f32 to vector<2x32xf32>
    %58 = arith.addf %57, %56 : vector<2x32xf32>
    %59 = arith.divf %57, %58 : vector<2x32xf32>
    %60 = vector.extract_strided_slice %53 {offsets = [0, 32], sizes = [2, 32], strides = [1, 1]} : vector<2x128xf32> to vector<2x32xf32>
    %61 = arith.negf %60 : vector<2x32xf32>
    %62 = math.exp %61 : vector<2x32xf32>
    %cst_44 = arith.constant 1.000000e+00 : f32
    %63 = vector.broadcast %cst_44 : f32 to vector<2x32xf32>
    %64 = arith.addf %63, %62 : vector<2x32xf32>
    %65 = arith.divf %63, %64 : vector<2x32xf32>
    %66 = vector.extract_strided_slice %53 {offsets = [0, 64], sizes = [2, 32], strides = [1, 1]} : vector<2x128xf32> to vector<2x32xf32>
    %67 = math.tanh %66 : vector<2x32xf32>
    %68 = vector.extract_strided_slice %53 {offsets = [0, 96], sizes = [2, 32], strides = [1, 1]} : vector<2x128xf32> to vector<2x32xf32>
    %69 = arith.negf %68 : vector<2x32xf32>
    %70 = math.exp %69 : vector<2x32xf32>
    %cst_45 = arith.constant 1.000000e+00 : f32
    %71 = vector.broadcast %cst_45 : f32 to vector<2x32xf32>
    %72 = arith.addf %71, %70 : vector<2x32xf32>
    %73 = arith.divf %71, %72 : vector<2x32xf32>
    %74 = arith.mulf %65, %49 : vector<2x32xf32>
    %75 = arith.mulf %59, %67 : vector<2x32xf32>
    %76 = arith.addf %74, %75 : vector<2x32xf32>
    %77 = math.tanh %76 : vector<2x32xf32>
    %78 = arith.mulf %73, %77 : vector<2x32xf32>
    %c0_46 = arith.constant 0 : index
    %c0_47 = arith.constant 0 : index
    %c0_48 = arith.constant 0 : index
    %79 = vector.load %arg11[%c0_46, %c0_47, %c0_48] : memref<1x32x128xf32, #tpu.memory_space<vmem>>, vector<1x32x128xf32>
    %80 = vector.shape_cast %79 : vector<1x32x128xf32> to vector<32x128xf32>
    %cst_49 = arith.constant dense<0.000000e+00> : vector<2x128xf32>
    %81 = tpu.matmul %78, %80, %cst_49 {dimension_numbers = #tpu.dot_dimension_numbers<[1], [0], [0], [1], [0, 0, 1, 1], [], []>} : vector<2x32xf32>, vector<32x128xf32>, vector<2x128xf32> -> vector<2x128xf32>
    %c0_50 = arith.constant 0 : index
    %c0_51 = arith.constant 0 : index
    %c0_52 = arith.constant 0 : index
    %82 = vector.load %arg12[%c0_50, %c0_51, %c0_52] : memref<1x32x128xf32, #tpu.memory_space<vmem>>, vector<1x32x128xf32>
    %83 = vector.shape_cast %82 : vector<1x32x128xf32> to vector<32x128xf32>
    %cst_53 = arith.constant dense<0.000000e+00> : vector<2x128xf32>
    %84 = tpu.matmul %49, %83, %cst_53 {dimension_numbers = #tpu.dot_dimension_numbers<[1], [0], [0], [1], [0, 0, 1, 1], [], []>} : vector<2x32xf32>, vector<32x128xf32>, vector<2x128xf32> -> vector<2x128xf32>
    %85 = arith.addf %81, %84 : vector<2x128xf32>
    %c0_54 = arith.constant 0 : index
    %c0_55 = arith.constant 0 : index
    %c0_56 = arith.constant 0 : index
    %86 = vector.load %arg13[%c0_54, %c0_55, %c0_56] : memref<1x1x128xf32, #tpu.memory_space<vmem>>, vector<1x1x128xf32>
    %87 = vector.shape_cast %86 : vector<1x1x128xf32> to vector<1x128xf32>
    %88 = vector.broadcast %87 : vector<1x128xf32> to vector<2x128xf32>
    %89 = arith.addf %85, %88 : vector<2x128xf32>
    %90 = vector.extract_strided_slice %89 {offsets = [0, 0], sizes = [2, 32], strides = [1, 1]} : vector<2x128xf32> to vector<2x32xf32>
    %91 = arith.negf %90 : vector<2x32xf32>
    %92 = math.exp %91 : vector<2x32xf32>
    %cst_57 = arith.constant 1.000000e+00 : f32
    %93 = vector.broadcast %cst_57 : f32 to vector<2x32xf32>
    %94 = arith.addf %93, %92 : vector<2x32xf32>
    %95 = arith.divf %93, %94 : vector<2x32xf32>
    %96 = vector.extract_strided_slice %89 {offsets = [0, 32], sizes = [2, 32], strides = [1, 1]} : vector<2x128xf32> to vector<2x32xf32>
    %97 = arith.negf %96 : vector<2x32xf32>
    %98 = math.exp %97 : vector<2x32xf32>
    %cst_58 = arith.constant 1.000000e+00 : f32
    %99 = vector.broadcast %cst_58 : f32 to vector<2x32xf32>
    %100 = arith.addf %99, %98 : vector<2x32xf32>
    %101 = arith.divf %99, %100 : vector<2x32xf32>
    %102 = vector.extract_strided_slice %89 {offsets = [0, 64], sizes = [2, 32], strides = [1, 1]} : vector<2x128xf32> to vector<2x32xf32>
    %103 = math.tanh %102 : vector<2x32xf32>
    %104 = vector.extract_strided_slice %89 {offsets = [0, 96], sizes = [2, 32], strides = [1, 1]} : vector<2x128xf32> to vector<2x32xf32>
    %105 = arith.negf %104 : vector<2x32xf32>
    %106 = math.exp %105 : vector<2x32xf32>
    %cst_59 = arith.constant 1.000000e+00 : f32
    %107 = vector.broadcast %cst_59 : f32 to vector<2x32xf32>
    %108 = arith.addf %107, %106 : vector<2x32xf32>
    %109 = arith.divf %107, %108 : vector<2x32xf32>
    %110 = arith.mulf %101, %49 : vector<2x32xf32>
    %111 = arith.mulf %95, %103 : vector<2x32xf32>
    %112 = arith.addf %110, %111 : vector<2x32xf32>
    %113 = math.tanh %112 : vector<2x32xf32>
    %114 = arith.mulf %109, %113 : vector<2x32xf32>
    %c0_60 = arith.constant 0 : index
    %c0_61 = arith.constant 0 : index
    %115 = vector.load %arg17[%c0_60, %c0_61] : memref<14x32xf32, #tpu.memory_space<vmem>>, vector<2x32xf32>
    tpu.vector_store %arg17[%c0_60, %c0_61], %114 {strides = array<i32>} : memref<14x32xf32, #tpu.memory_space<vmem>>, vector<2x32xf32>,
    %116 = vector.extract_strided_slice %47 {offsets = [0, 1, 0], sizes = [2, 1, 128], strides = [1, 1, 1]} : vector<2x8x128xf32> to vector<2x1x128xf32>
    %117 = vector.shape_cast %116 : vector<2x1x128xf32> to vector<2x128xf32>
    %cst_62 = arith.constant dense<0.000000e+00> : vector<2x128xf32>
    %118 = tpu.matmul %78, %48, %cst_62 {dimension_numbers = #tpu.dot_dimension_numbers<[1], [0], [0], [1], [0, 0, 1, 1], [], []>} : vector<2x32xf32>, vector<32x128xf32>, vector<2x128xf32> -> vector<2x128xf32>
    %119 = arith.addf %117, %118 : vector<2x128xf32>
    %120 = vector.extract_strided_slice %119 {offsets = [0, 0], sizes = [2, 32], strides = [1, 1]} : vector<2x128xf32> to vector<2x32xf32>
    %121 = arith.negf %120 : vector<2x32xf32>
    %122 = math.exp %121 : vector<2x32xf32>
    %cst_63 = arith.constant 1.000000e+00 : f32
    %123 = vector.broadcast %cst_63 : f32 to vector<2x32xf32>
    %124 = arith.addf %123, %122 : vector<2x32xf32>
    %125 = arith.divf %123, %124 : vector<2x32xf32>
    %126 = vector.extract_strided_slice %119 {offsets = [0, 32], sizes = [2, 32], strides = [1, 1]} : vector<2x128xf32> to vector<2x32xf32>
    %127 = arith.negf %126 : vector<2x32xf32>
    %128 = math.exp %127 : vector<2x32xf32>
    %cst_64 = arith.constant 1.000000e+00 : f32
    %129 = vector.broadcast %cst_64 : f32 to vector<2x32xf32>
    %130 = arith.addf %129, %128 : vector<2x32xf32>
    %131 = arith.divf %129, %130 : vector<2x32xf32>
    %132 = vector.extract_strided_slice %119 {offsets = [0, 64], sizes = [2, 32], strides = [1, 1]} : vector<2x128xf32> to vector<2x32xf32>
    %133 = math.tanh %132 : vector<2x32xf32>
    %134 = vector.extract_strided_slice %119 {offsets = [0, 96], sizes = [2, 32], strides = [1, 1]} : vector<2x128xf32> to vector<2x32xf32>
    %135 = arith.negf %134 : vector<2x32xf32>
    %136 = math.exp %135 : vector<2x32xf32>
    %cst_65 = arith.constant 1.000000e+00 : f32
    %137 = vector.broadcast %cst_65 : f32 to vector<2x32xf32>
    %138 = arith.addf %137, %136 : vector<2x32xf32>
    %139 = arith.divf %137, %138 : vector<2x32xf32>
    %140 = arith.mulf %131, %76 : vector<2x32xf32>
    %141 = arith.mulf %125, %133 : vector<2x32xf32>
    %142 = arith.addf %140, %141 : vector<2x32xf32>
    %143 = math.tanh %142 : vector<2x32xf32>
    %144 = arith.mulf %139, %143 : vector<2x32xf32>
    %c0_66 = arith.constant 0 : index
    %c0_67 = arith.constant 0 : index
    %c0_68 = arith.constant 0 : index
    %145 = vector.load %arg11[%c0_66, %c0_67, %c0_68] : memref<1x32x128xf32, #tpu.memory_space<vmem>>, vector<1x32x128xf32>
    %146 = vector.shape_cast %145 : vector<1x32x128xf32> to vector<32x128xf32>
    %cst_69 = arith.constant dense<0.000000e+00> : vector<2x128xf32>
    %147 = tpu.matmul %144, %146, %cst_69 {dimension_numbers = #tpu.dot_dimension_numbers<[1], [0], [0], [1], [0, 0, 1, 1], [], []>} : vector<2x32xf32>, vector<32x128xf32>, vector<2x128xf32> -> vector<2x128xf32>
    %c0_70 = arith.constant 0 : index
    %c0_71 = arith.constant 0 : index
    %c0_72 = arith.constant 0 : index
    %148 = vector.load %arg12[%c0_70, %c0_71, %c0_72] : memref<1x32x128xf32, #tpu.memory_space<vmem>>, vector<1x32x128xf32>
    %149 = vector.shape_cast %148 : vector<1x32x128xf32> to vector<32x128xf32>
    %cst_73 = arith.constant dense<0.000000e+00> : vector<2x128xf32>
    %150 = tpu.matmul %114, %149, %cst_73 {dimension_numbers = #tpu.dot_dimension_numbers<[1], [0], [0], [1], [0, 0, 1, 1], [], []>} : vector<2x32xf32>, vector<32x128xf32>, vector<2x128xf32> -> vector<2x128xf32>
    %151 = arith.addf %147, %150 : vector<2x128xf32>
    %c0_74 = arith.constant 0 : index
    %c0_75 = arith.constant 0 : index
    %c0_76 = arith.constant 0 : index
    %152 = vector.load %arg13[%c0_74, %c0_75, %c0_76] : memref<1x1x128xf32, #tpu.memory_space<vmem>>, vector<1x1x128xf32>
    %153 = vector.shape_cast %152 : vector<1x1x128xf32> to vector<1x128xf32>
    %154 = vector.broadcast %153 : vector<1x128xf32> to vector<2x128xf32>
    %155 = arith.addf %151, %154 : vector<2x128xf32>
    %156 = vector.extract_strided_slice %155 {offsets = [0, 0], sizes = [2, 32], strides = [1, 1]} : vector<2x128xf32> to vector<2x32xf32>
    %157 = arith.negf %156 : vector<2x32xf32>
    %158 = math.exp %157 : vector<2x32xf32>
    %cst_77 = arith.constant 1.000000e+00 : f32
    %159 = vector.broadcast %cst_77 : f32 to vector<2x32xf32>
    %160 = arith.addf %159, %158 : vector<2x32xf32>
    %161 = arith.divf %159, %160 : vector<2x32xf32>
    %162 = vector.extract_strided_slice %155 {offsets = [0, 32], sizes = [2, 32], strides = [1, 1]} : vector<2x128xf32> to vector<2x32xf32>
    %163 = arith.negf %162 : vector<2x32xf32>
    %164 = math.exp %163 : vector<2x32xf32>
    %cst_78 = arith.constant 1.000000e+00 : f32
    %165 = vector.broadcast %cst_78 : f32 to vector<2x32xf32>
    %166 = arith.addf %165, %164 : vector<2x32xf32>
    %167 = arith.divf %165, %166 : vector<2x32xf32>
    %168 = vector.extract_strided_slice %155 {offsets = [0, 64], sizes = [2, 32], strides = [1, 1]} : vector<2x128xf32> to vector<2x32xf32>
    %169 = math.tanh %168 : vector<2x32xf32>
    %170 = vector.extract_strided_slice %155 {offsets = [0, 96], sizes = [2, 32], strides = [1, 1]} : vector<2x128xf32> to vector<2x32xf32>
    %171 = arith.negf %170 : vector<2x32xf32>
    %172 = math.exp %171 : vector<2x32xf32>
    %cst_79 = arith.constant 1.000000e+00 : f32
    %173 = vector.broadcast %cst_79 : f32 to vector<2x32xf32>
    %174 = arith.addf %173, %172 : vector<2x32xf32>
    %175 = arith.divf %173, %174 : vector<2x32xf32>
    %176 = arith.mulf %167, %112 : vector<2x32xf32>
    %177 = arith.mulf %161, %169 : vector<2x32xf32>
    %178 = arith.addf %176, %177 : vector<2x32xf32>
    %179 = math.tanh %178 : vector<2x32xf32>
    %180 = arith.mulf %175, %179 : vector<2x32xf32>
    %c2 = arith.constant 2 : index
    %c0_80 = arith.constant 0 : index
    %181 = vector.load %arg17[%c2, %c0_80] : memref<14x32xf32, #tpu.memory_space<vmem>>, vector<2x32xf32>
    tpu.vector_store %arg17[%c2, %c0_80], %180 {strides = array<i32>} : memref<14x32xf32, #tpu.memory_space<vmem>>, vector<2x32xf32>,
    %182 = vector.extract_strided_slice %47 {offsets = [0, 2, 0], sizes = [2, 1, 128], strides = [1, 1, 1]} : vector<2x8x128xf32> to vector<2x1x128xf32>
    %183 = vector.shape_cast %182 : vector<2x1x128xf32> to vector<2x128xf32>
    %cst_81 = arith.constant dense<0.000000e+00> : vector<2x128xf32>
    %184 = tpu.matmul %144, %48, %cst_81 {dimension_numbers = #tpu.dot_dimension_numbers<[1], [0], [0], [1], [0, 0, 1, 1], [], []>} : vector<2x32xf32>, vector<32x128xf32>, vector<2x128xf32> -> vector<2x128xf32>
    %185 = arith.addf %183, %184 : vector<2x128xf32>
    %186 = vector.extract_strided_slice %185 {offsets = [0, 0], sizes = [2, 32], strides = [1, 1]} : vector<2x128xf32> to vector<2x32xf32>
    %187 = arith.negf %186 : vector<2x32xf32>
    %188 = math.exp %187 : vector<2x32xf32>
    %cst_82 = arith.constant 1.000000e+00 : f32
    %189 = vector.broadcast %cst_82 : f32 to vector<2x32xf32>
    %190 = arith.addf %189, %188 : vector<2x32xf32>
    %191 = arith.divf %189, %190 : vector<2x32xf32>
    %192 = vector.extract_strided_slice %185 {offsets = [0, 32], sizes = [2, 32], strides = [1, 1]} : vector<2x128xf32> to vector<2x32xf32>
    %193 = arith.negf %192 : vector<2x32xf32>
    %194 = math.exp %193 : vector<2x32xf32>
    %cst_83 = arith.constant 1.000000e+00 : f32
    %195 = vector.broadcast %cst_83 : f32 to vector<2x32xf32>
    %196 = arith.addf %195, %194 : vector<2x32xf32>
    %197 = arith.divf %195, %196 : vector<2x32xf32>
    %198 = vector.extract_strided_slice %185 {offsets = [0, 64], sizes = [2, 32], strides = [1, 1]} : vector<2x128xf32> to vector<2x32xf32>
    %199 = math.tanh %198 : vector<2x32xf32>
    %200 = vector.extract_strided_slice %185 {offsets = [0, 96], sizes = [2, 32], strides = [1, 1]} : vector<2x128xf32> to vector<2x32xf32>
    %201 = arith.negf %200 : vector<2x32xf32>
    %202 = math.exp %201 : vector<2x32xf32>
    %cst_84 = arith.constant 1.000000e+00 : f32
    %203 = vector.broadcast %cst_84 : f32 to vector<2x32xf32>
    %204 = arith.addf %203, %202 : vector<2x32xf32>
    %205 = arith.divf %203, %204 : vector<2x32xf32>
    %206 = arith.mulf %197, %142 : vector<2x32xf32>
    %207 = arith.mulf %191, %199 : vector<2x32xf32>
    %208 = arith.addf %206, %207 : vector<2x32xf32>
    %209 = math.tanh %208 : vector<2x32xf32>
    %210 = arith.mulf %205, %209 : vector<2x32xf32>
    %c0_85 = arith.constant 0 : index
    %c0_86 = arith.constant 0 : index
    %c0_87 = arith.constant 0 : index
    %211 = vector.load %arg11[%c0_85, %c0_86, %c0_87] : memref<1x32x128xf32, #tpu.memory_space<vmem>>, vector<1x32x128xf32>
    %212 = vector.shape_cast %211 : vector<1x32x128xf32> to vector<32x128xf32>
    %cst_88 = arith.constant dense<0.000000e+00> : vector<2x128xf32>
    %213 = tpu.matmul %210, %212, %cst_88 {dimension_numbers = #tpu.dot_dimension_numbers<[1], [0], [0], [1], [0, 0, 1, 1], [], []>} : vector<2x32xf32>, vector<32x128xf32>, vector<2x128xf32> -> vector<2x128xf32>
    %c0_89 = arith.constant 0 : index
    %c0_90 = arith.constant 0 : index
    %c0_91 = arith.constant 0 : index
    %214 = vector.load %arg12[%c0_89, %c0_90, %c0_91] : memref<1x32x128xf32, #tpu.memory_space<vmem>>, vector<1x32x128xf32>
    %215 = vector.shape_cast %214 : vector<1x32x128xf32> to vector<32x128xf32>
    %cst_92 = arith.constant dense<0.000000e+00> : vector<2x128xf32>
    %216 = tpu.matmul %180, %215, %cst_92 {dimension_numbers = #tpu.dot_dimension_numbers<[1], [0], [0], [1], [0, 0, 1, 1], [], []>} : vector<2x32xf32>, vector<32x128xf32>, vector<2x128xf32> -> vector<2x128xf32>
    %217 = arith.addf %213, %216 : vector<2x128xf32>
    %c0_93 = arith.constant 0 : index
    %c0_94 = arith.constant 0 : index
    %c0_95 = arith.constant 0 : index
    %218 = vector.load %arg13[%c0_93, %c0_94, %c0_95] : memref<1x1x128xf32, #tpu.memory_space<vmem>>, vector<1x1x128xf32>
    %219 = vector.shape_cast %218 : vector<1x1x128xf32> to vector<1x128xf32>
    %220 = vector.broadcast %219 : vector<1x128xf32> to vector<2x128xf32>
    %221 = arith.addf %217, %220 : vector<2x128xf32>
    %222 = vector.extract_strided_slice %221 {offsets = [0, 0], sizes = [2, 32], strides = [1, 1]} : vector<2x128xf32> to vector<2x32xf32>
    %223 = arith.negf %222 : vector<2x32xf32>
    %224 = math.exp %223 : vector<2x32xf32>
    %cst_96 = arith.constant 1.000000e+00 : f32
    %225 = vector.broadcast %cst_96 : f32 to vector<2x32xf32>
    %226 = arith.addf %225, %224 : vector<2x32xf32>
    %227 = arith.divf %225, %226 : vector<2x32xf32>
    %228 = vector.extract_strided_slice %221 {offsets = [0, 32], sizes = [2, 32], strides = [1, 1]} : vector<2x128xf32> to vector<2x32xf32>
    %229 = arith.negf %228 : vector<2x32xf32>
    %230 = math.exp %229 : vector<2x32xf32>
    %cst_97 = arith.constant 1.000000e+00 : f32
    %231 = vector.broadcast %cst_97 : f32 to vector<2x32xf32>
    %232 = arith.addf %231, %230 : vector<2x32xf32>
    %233 = arith.divf %231, %232 : vector<2x32xf32>
    %234 = vector.extract_strided_slice %221 {offsets = [0, 64], sizes = [2, 32], strides = [1, 1]} : vector<2x128xf32> to vector<2x32xf32>
    %235 = math.tanh %234 : vector<2x32xf32>
    %236 = vector.extract_strided_slice %221 {offsets = [0, 96], sizes = [2, 32], strides = [1, 1]} : vector<2x128xf32> to vector<2x32xf32>
    %237 = arith.negf %236 : vector<2x32xf32>
    %238 = math.exp %237 : vector<2x32xf32>
    %cst_98 = arith.constant 1.000000e+00 : f32
    %239 = vector.broadcast %cst_98 : f32 to vector<2x32xf32>
    %240 = arith.addf %239, %238 : vector<2x32xf32>
    %241 = arith.divf %239, %240 : vector<2x32xf32>
    %242 = arith.mulf %233, %178 : vector<2x32xf32>
    %243 = arith.mulf %227, %235 : vector<2x32xf32>
    %244 = arith.addf %242, %243 : vector<2x32xf32>
    %245 = math.tanh %244 : vector<2x32xf32>
    %246 = arith.mulf %241, %245 : vector<2x32xf32>
    %c4 = arith.constant 4 : index
    %c0_99 = arith.constant 0 : index
    %247 = vector.load %arg17[%c4, %c0_99] : memref<14x32xf32, #tpu.memory_space<vmem>>, vector<2x32xf32>
    tpu.vector_store %arg17[%c4, %c0_99], %246 {strides = array<i32>} : memref<14x32xf32, #tpu.memory_space<vmem>>, vector<2x32xf32>,
    %248 = vector.extract_strided_slice %47 {offsets = [0, 3, 0], sizes = [2, 1, 128], strides = [1, 1, 1]} : vector<2x8x128xf32> to vector<2x1x128xf32>
    %249 = vector.shape_cast %248 : vector<2x1x128xf32> to vector<2x128xf32>
    %cst_100 = arith.constant dense<0.000000e+00> : vector<2x128xf32>
    %250 = tpu.matmul %210, %48, %cst_100 {dimension_numbers = #tpu.dot_dimension_numbers<[1], [0], [0], [1], [0, 0, 1, 1], [], []>} : vector<2x32xf32>, vector<32x128xf32>, vector<2x128xf32> -> vector<2x128xf32>
    %251 = arith.addf %249, %250 : vector<2x128xf32>
    %252 = vector.extract_strided_slice %251 {offsets = [0, 0], sizes = [2, 32], strides = [1, 1]} : vector<2x128xf32> to vector<2x32xf32>
    %253 = arith.negf %252 : vector<2x32xf32>
    %254 = math.exp %253 : vector<2x32xf32>
    %cst_101 = arith.constant 1.000000e+00 : f32
    %255 = vector.broadcast %cst_101 : f32 to vector<2x32xf32>
    %256 = arith.addf %255, %254 : vector<2x32xf32>
    %257 = arith.divf %255, %256 : vector<2x32xf32>
    %258 = vector.extract_strided_slice %251 {offsets = [0, 32], sizes = [2, 32], strides = [1, 1]} : vector<2x128xf32> to vector<2x32xf32>
    %259 = arith.negf %258 : vector<2x32xf32>
    %260 = math.exp %259 : vector<2x32xf32>
    %cst_102 = arith.constant 1.000000e+00 : f32
    %261 = vector.broadcast %cst_102 : f32 to vector<2x32xf32>
    %262 = arith.addf %261, %260 : vector<2x32xf32>
    %263 = arith.divf %261, %262 : vector<2x32xf32>
    %264 = vector.extract_strided_slice %251 {offsets = [0, 64], sizes = [2, 32], strides = [1, 1]} : vector<2x128xf32> to vector<2x32xf32>
    %265 = math.tanh %264 : vector<2x32xf32>
    %266 = vector.extract_strided_slice %251 {offsets = [0, 96], sizes = [2, 32], strides = [1, 1]} : vector<2x128xf32> to vector<2x32xf32>
    %267 = arith.negf %266 : vector<2x32xf32>
    %268 = math.exp %267 : vector<2x32xf32>
    %cst_103 = arith.constant 1.000000e+00 : f32
    %269 = vector.broadcast %cst_103 : f32 to vector<2x32xf32>
    %270 = arith.addf %269, %268 : vector<2x32xf32>
    %271 = arith.divf %269, %270 : vector<2x32xf32>
    %272 = arith.mulf %263, %208 : vector<2x32xf32>
    %273 = arith.mulf %257, %265 : vector<2x32xf32>
    %274 = arith.addf %272, %273 : vector<2x32xf32>
    %275 = math.tanh %274 : vector<2x32xf32>
    %276 = arith.mulf %271, %275 : vector<2x32xf32>
    %c0_104 = arith.constant 0 : index
    %c0_105 = arith.constant 0 : index
    %c0_106 = arith.constant 0 : index
    %277 = vector.load %arg11[%c0_104, %c0_105, %c0_106] : memref<1x32x128xf32, #tpu.memory_space<vmem>>, vector<1x32x128xf32>
    %278 = vector.shape_cast %277 : vector<1x32x128xf32> to vector<32x128xf32>
    %cst_107 = arith.constant dense<0.000000e+00> : vector<2x128xf32>
    %279 = tpu.matmul %276, %278, %cst_107 {dimension_numbers = #tpu.dot_dimension_numbers<[1], [0], [0], [1], [0, 0, 1, 1], [], []>} : vector<2x32xf32>, vector<32x128xf32>, vector<2x128xf32> -> vector<2x128xf32>
    %c0_108 = arith.constant 0 : index
    %c0_109 = arith.constant 0 : index
    %c0_110 = arith.constant 0 : index
    %280 = vector.load %arg12[%c0_108, %c0_109, %c0_110] : memref<1x32x128xf32, #tpu.memory_space<vmem>>, vector<1x32x128xf32>
    %281 = vector.shape_cast %280 : vector<1x32x128xf32> to vector<32x128xf32>
    %cst_111 = arith.constant dense<0.000000e+00> : vector<2x128xf32>
    %282 = tpu.matmul %246, %281, %cst_111 {dimension_numbers = #tpu.dot_dimension_numbers<[1], [0], [0], [1], [0, 0, 1, 1], [], []>} : vector<2x32xf32>, vector<32x128xf32>, vector<2x128xf32> -> vector<2x128xf32>
    %283 = arith.addf %279, %282 : vector<2x128xf32>
    %c0_112 = arith.constant 0 : index
    %c0_113 = arith.constant 0 : index
    %c0_114 = arith.constant 0 : index
    %284 = vector.load %arg13[%c0_112, %c0_113, %c0_114] : memref<1x1x128xf32, #tpu.memory_space<vmem>>, vector<1x1x128xf32>
    %285 = vector.shape_cast %284 : vector<1x1x128xf32> to vector<1x128xf32>
    %286 = vector.broadcast %285 : vector<1x128xf32> to vector<2x128xf32>
    %287 = arith.addf %283, %286 : vector<2x128xf32>
    %288 = vector.extract_strided_slice %287 {offsets = [0, 0], sizes = [2, 32], strides = [1, 1]} : vector<2x128xf32> to vector<2x32xf32>
    %289 = arith.negf %288 : vector<2x32xf32>
    %290 = math.exp %289 : vector<2x32xf32>
    %cst_115 = arith.constant 1.000000e+00 : f32
    %291 = vector.broadcast %cst_115 : f32 to vector<2x32xf32>
    %292 = arith.addf %291, %290 : vector<2x32xf32>
    %293 = arith.divf %291, %292 : vector<2x32xf32>
    %294 = vector.extract_strided_slice %287 {offsets = [0, 32], sizes = [2, 32], strides = [1, 1]} : vector<2x128xf32> to vector<2x32xf32>
    %295 = arith.negf %294 : vector<2x32xf32>
    %296 = math.exp %295 : vector<2x32xf32>
    %cst_116 = arith.constant 1.000000e+00 : f32
    %297 = vector.broadcast %cst_116 : f32 to vector<2x32xf32>
    %298 = arith.addf %297, %296 : vector<2x32xf32>
    %299 = arith.divf %297, %298 : vector<2x32xf32>
    %300 = vector.extract_strided_slice %287 {offsets = [0, 64], sizes = [2, 32], strides = [1, 1]} : vector<2x128xf32> to vector<2x32xf32>
    %301 = math.tanh %300 : vector<2x32xf32>
    %302 = vector.extract_strided_slice %287 {offsets = [0, 96], sizes = [2, 32], strides = [1, 1]} : vector<2x128xf32> to vector<2x32xf32>
    %303 = arith.negf %302 : vector<2x32xf32>
    %304 = math.exp %303 : vector<2x32xf32>
    %cst_117 = arith.constant 1.000000e+00 : f32
    %305 = vector.broadcast %cst_117 : f32 to vector<2x32xf32>
    %306 = arith.addf %305, %304 : vector<2x32xf32>
    %307 = arith.divf %305, %306 : vector<2x32xf32>
    %308 = arith.mulf %299, %244 : vector<2x32xf32>
    %309 = arith.mulf %293, %301 : vector<2x32xf32>
    %310 = arith.addf %308, %309 : vector<2x32xf32>
    %311 = math.tanh %310 : vector<2x32xf32>
    %312 = arith.mulf %307, %311 : vector<2x32xf32>
    %c6 = arith.constant 6 : index
    %c0_118 = arith.constant 0 : index
    %313 = vector.load %arg17[%c6, %c0_118] : memref<14x32xf32, #tpu.memory_space<vmem>>, vector<2x32xf32>
    tpu.vector_store %arg17[%c6, %c0_118], %312 {strides = array<i32>} : memref<14x32xf32, #tpu.memory_space<vmem>>, vector<2x32xf32>,
    %314 = vector.extract_strided_slice %47 {offsets = [0, 4, 0], sizes = [2, 1, 128], strides = [1, 1, 1]} : vector<2x8x128xf32> to vector<2x1x128xf32>
    %315 = vector.shape_cast %314 : vector<2x1x128xf32> to vector<2x128xf32>
    %cst_119 = arith.constant dense<0.000000e+00> : vector<2x128xf32>
    %316 = tpu.matmul %276, %48, %cst_119 {dimension_numbers = #tpu.dot_dimension_numbers<[1], [0], [0], [1], [0, 0, 1, 1], [], []>} : vector<2x32xf32>, vector<32x128xf32>, vector<2x128xf32> -> vector<2x128xf32>
    %317 = arith.addf %315, %316 : vector<2x128xf32>
    %318 = vector.extract_strided_slice %317 {offsets = [0, 0], sizes = [2, 32], strides = [1, 1]} : vector<2x128xf32> to vector<2x32xf32>
    %319 = arith.negf %318 : vector<2x32xf32>
    %320 = math.exp %319 : vector<2x32xf32>
    %cst_120 = arith.constant 1.000000e+00 : f32
    %321 = vector.broadcast %cst_120 : f32 to vector<2x32xf32>
    %322 = arith.addf %321, %320 : vector<2x32xf32>
    %323 = arith.divf %321, %322 : vector<2x32xf32>
    %324 = vector.extract_strided_slice %317 {offsets = [0, 32], sizes = [2, 32], strides = [1, 1]} : vector<2x128xf32> to vector<2x32xf32>
    %325 = arith.negf %324 : vector<2x32xf32>
    %326 = math.exp %325 : vector<2x32xf32>
    %cst_121 = arith.constant 1.000000e+00 : f32
    %327 = vector.broadcast %cst_121 : f32 to vector<2x32xf32>
    %328 = arith.addf %327, %326 : vector<2x32xf32>
    %329 = arith.divf %327, %328 : vector<2x32xf32>
    %330 = vector.extract_strided_slice %317 {offsets = [0, 64], sizes = [2, 32], strides = [1, 1]} : vector<2x128xf32> to vector<2x32xf32>
    %331 = math.tanh %330 : vector<2x32xf32>
    %332 = vector.extract_strided_slice %317 {offsets = [0, 96], sizes = [2, 32], strides = [1, 1]} : vector<2x128xf32> to vector<2x32xf32>
    %333 = arith.negf %332 : vector<2x32xf32>
    %334 = math.exp %333 : vector<2x32xf32>
    %cst_122 = arith.constant 1.000000e+00 : f32
    %335 = vector.broadcast %cst_122 : f32 to vector<2x32xf32>
    %336 = arith.addf %335, %334 : vector<2x32xf32>
    %337 = arith.divf %335, %336 : vector<2x32xf32>
    %338 = arith.mulf %329, %274 : vector<2x32xf32>
    %339 = arith.mulf %323, %331 : vector<2x32xf32>
    %340 = arith.addf %338, %339 : vector<2x32xf32>
    %341 = math.tanh %340 : vector<2x32xf32>
    %342 = arith.mulf %337, %341 : vector<2x32xf32>
    %c0_123 = arith.constant 0 : index
    %c0_124 = arith.constant 0 : index
    %c0_125 = arith.constant 0 : index
    %343 = vector.load %arg11[%c0_123, %c0_124, %c0_125] : memref<1x32x128xf32, #tpu.memory_space<vmem>>, vector<1x32x128xf32>
    %344 = vector.shape_cast %343 : vector<1x32x128xf32> to vector<32x128xf32>
    %cst_126 = arith.constant dense<0.000000e+00> : vector<2x128xf32>
    %345 = tpu.matmul %342, %344, %cst_126 {dimension_numbers = #tpu.dot_dimension_numbers<[1], [0], [0], [1], [0, 0, 1, 1], [], []>} : vector<2x32xf32>, vector<32x128xf32>, vector<2x128xf32> -> vector<2x128xf32>
    %c0_127 = arith.constant 0 : index
    %c0_128 = arith.constant 0 : index
    %c0_129 = arith.constant 0 : index
    %346 = vector.load %arg12[%c0_127, %c0_128, %c0_129] : memref<1x32x128xf32, #tpu.memory_space<vmem>>, vector<1x32x128xf32>
    %347 = vector.shape_cast %346 : vector<1x32x128xf32> to vector<32x128xf32>
    %cst_130 = arith.constant dense<0.000000e+00> : vector<2x128xf32>
    %348 = tpu.matmul %312, %347, %cst_130 {dimension_numbers = #tpu.dot_dimension_numbers<[1], [0], [0], [1], [0, 0, 1, 1], [], []>} : vector<2x32xf32>, vector<32x128xf32>, vector<2x128xf32> -> vector<2x128xf32>
    %349 = arith.addf %345, %348 : vector<2x128xf32>
    %c0_131 = arith.constant 0 : index
    %c0_132 = arith.constant 0 : index
    %c0_133 = arith.constant 0 : index
    %350 = vector.load %arg13[%c0_131, %c0_132, %c0_133] : memref<1x1x128xf32, #tpu.memory_space<vmem>>, vector<1x1x128xf32>
    %351 = vector.shape_cast %350 : vector<1x1x128xf32> to vector<1x128xf32>
    %352 = vector.broadcast %351 : vector<1x128xf32> to vector<2x128xf32>
    %353 = arith.addf %349, %352 : vector<2x128xf32>
    %354 = vector.extract_strided_slice %353 {offsets = [0, 0], sizes = [2, 32], strides = [1, 1]} : vector<2x128xf32> to vector<2x32xf32>
    %355 = arith.negf %354 : vector<2x32xf32>
    %356 = math.exp %355 : vector<2x32xf32>
    %cst_134 = arith.constant 1.000000e+00 : f32
    %357 = vector.broadcast %cst_134 : f32 to vector<2x32xf32>
    %358 = arith.addf %357, %356 : vector<2x32xf32>
    %359 = arith.divf %357, %358 : vector<2x32xf32>
    %360 = vector.extract_strided_slice %353 {offsets = [0, 32], sizes = [2, 32], strides = [1, 1]} : vector<2x128xf32> to vector<2x32xf32>
    %361 = arith.negf %360 : vector<2x32xf32>
    %362 = math.exp %361 : vector<2x32xf32>
    %cst_135 = arith.constant 1.000000e+00 : f32
    %363 = vector.broadcast %cst_135 : f32 to vector<2x32xf32>
    %364 = arith.addf %363, %362 : vector<2x32xf32>
    %365 = arith.divf %363, %364 : vector<2x32xf32>
    %366 = vector.extract_strided_slice %353 {offsets = [0, 64], sizes = [2, 32], strides = [1, 1]} : vector<2x128xf32> to vector<2x32xf32>
    %367 = math.tanh %366 : vector<2x32xf32>
    %368 = vector.extract_strided_slice %353 {offsets = [0, 96], sizes = [2, 32], strides = [1, 1]} : vector<2x128xf32> to vector<2x32xf32>
    %369 = arith.negf %368 : vector<2x32xf32>
    %370 = math.exp %369 : vector<2x32xf32>
    %cst_136 = arith.constant 1.000000e+00 : f32
    %371 = vector.broadcast %cst_136 : f32 to vector<2x32xf32>
    %372 = arith.addf %371, %370 : vector<2x32xf32>
    %373 = arith.divf %371, %372 : vector<2x32xf32>
    %374 = arith.mulf %365, %310 : vector<2x32xf32>
    %375 = arith.mulf %359, %367 : vector<2x32xf32>
    %376 = arith.addf %374, %375 : vector<2x32xf32>
    %377 = math.tanh %376 : vector<2x32xf32>
    %378 = arith.mulf %373, %377 : vector<2x32xf32>
    %c8 = arith.constant 8 : index
    %c0_137 = arith.constant 0 : index
    %379 = vector.load %arg17[%c8, %c0_137] : memref<14x32xf32, #tpu.memory_space<vmem>>, vector<2x32xf32>
    tpu.vector_store %arg17[%c8, %c0_137], %378 {strides = array<i32>} : memref<14x32xf32, #tpu.memory_space<vmem>>, vector<2x32xf32>,
    %380 = vector.extract_strided_slice %47 {offsets = [0, 5, 0], sizes = [2, 1, 128], strides = [1, 1, 1]} : vector<2x8x128xf32> to vector<2x1x128xf32>
    %381 = vector.shape_cast %380 : vector<2x1x128xf32> to vector<2x128xf32>
    %cst_138 = arith.constant dense<0.000000e+00> : vector<2x128xf32>
    %382 = tpu.matmul %342, %48, %cst_138 {dimension_numbers = #tpu.dot_dimension_numbers<[1], [0], [0], [1], [0, 0, 1, 1], [], []>} : vector<2x32xf32>, vector<32x128xf32>, vector<2x128xf32> -> vector<2x128xf32>
    %383 = arith.addf %381, %382 : vector<2x128xf32>
    %384 = vector.extract_strided_slice %383 {offsets = [0, 0], sizes = [2, 32], strides = [1, 1]} : vector<2x128xf32> to vector<2x32xf32>
    %385 = arith.negf %384 : vector<2x32xf32>
    %386 = math.exp %385 : vector<2x32xf32>
    %cst_139 = arith.constant 1.000000e+00 : f32
    %387 = vector.broadcast %cst_139 : f32 to vector<2x32xf32>
    %388 = arith.addf %387, %386 : vector<2x32xf32>
    %389 = arith.divf %387, %388 : vector<2x32xf32>
    %390 = vector.extract_strided_slice %383 {offsets = [0, 32], sizes = [2, 32], strides = [1, 1]} : vector<2x128xf32> to vector<2x32xf32>
    %391 = arith.negf %390 : vector<2x32xf32>
    %392 = math.exp %391 : vector<2x32xf32>
    %cst_140 = arith.constant 1.000000e+00 : f32
    %393 = vector.broadcast %cst_140 : f32 to vector<2x32xf32>
    %394 = arith.addf %393, %392 : vector<2x32xf32>
    %395 = arith.divf %393, %394 : vector<2x32xf32>
    %396 = vector.extract_strided_slice %383 {offsets = [0, 64], sizes = [2, 32], strides = [1, 1]} : vector<2x128xf32> to vector<2x32xf32>
    %397 = math.tanh %396 : vector<2x32xf32>
    %398 = vector.extract_strided_slice %383 {offsets = [0, 96], sizes = [2, 32], strides = [1, 1]} : vector<2x128xf32> to vector<2x32xf32>
    %399 = arith.negf %398 : vector<2x32xf32>
    %400 = math.exp %399 : vector<2x32xf32>
    %cst_141 = arith.constant 1.000000e+00 : f32
    %401 = vector.broadcast %cst_141 : f32 to vector<2x32xf32>
    %402 = arith.addf %401, %400 : vector<2x32xf32>
    %403 = arith.divf %401, %402 : vector<2x32xf32>
    %404 = arith.mulf %395, %340 : vector<2x32xf32>
    %405 = arith.mulf %389, %397 : vector<2x32xf32>
    %406 = arith.addf %404, %405 : vector<2x32xf32>
    %407 = math.tanh %406 : vector<2x32xf32>
    %408 = arith.mulf %403, %407 : vector<2x32xf32>
    %c0_142 = arith.constant 0 : index
    %c0_143 = arith.constant 0 : index
    %c0_144 = arith.constant 0 : index
    %409 = vector.load %arg11[%c0_142, %c0_143, %c0_144] : memref<1x32x128xf32, #tpu.memory_space<vmem>>, vector<1x32x128xf32>
    %410 = vector.shape_cast %409 : vector<1x32x128xf32> to vector<32x128xf32>
    %cst_145 = arith.constant dense<0.000000e+00> : vector<2x128xf32>
    %411 = tpu.matmul %408, %410, %cst_145 {dimension_numbers = #tpu.dot_dimension_numbers<[1], [0], [0], [1], [0, 0, 1, 1], [], []>} : vector<2x32xf32>, vector<32x128xf32>, vector<2x128xf32> -> vector<2x128xf32>
    %c0_146 = arith.constant 0 : index
    %c0_147 = arith.constant 0 : index
    %c0_148 = arith.constant 0 : index
    %412 = vector.load %arg12[%c0_146, %c0_147, %c0_148] : memref<1x32x128xf32, #tpu.memory_space<vmem>>, vector<1x32x128xf32>
    %413 = vector.shape_cast %412 : vector<1x32x128xf32> to vector<32x128xf32>
    %cst_149 = arith.constant dense<0.000000e+00> : vector<2x128xf32>
    %414 = tpu.matmul %378, %413, %cst_149 {dimension_numbers = #tpu.dot_dimension_numbers<[1], [0], [0], [1], [0, 0, 1, 1], [], []>} : vector<2x32xf32>, vector<32x128xf32>, vector<2x128xf32> -> vector<2x128xf32>
    %415 = arith.addf %411, %414 : vector<2x128xf32>
    %c0_150 = arith.constant 0 : index
    %c0_151 = arith.constant 0 : index
    %c0_152 = arith.constant 0 : index
    %416 = vector.load %arg13[%c0_150, %c0_151, %c0_152] : memref<1x1x128xf32, #tpu.memory_space<vmem>>, vector<1x1x128xf32>
    %417 = vector.shape_cast %416 : vector<1x1x128xf32> to vector<1x128xf32>
    %418 = vector.broadcast %417 : vector<1x128xf32> to vector<2x128xf32>
    %419 = arith.addf %415, %418 : vector<2x128xf32>
    %420 = vector.extract_strided_slice %419 {offsets = [0, 0], sizes = [2, 32], strides = [1, 1]} : vector<2x128xf32> to vector<2x32xf32>
    %421 = arith.negf %420 : vector<2x32xf32>
    %422 = math.exp %421 : vector<2x32xf32>
    %cst_153 = arith.constant 1.000000e+00 : f32
    %423 = vector.broadcast %cst_153 : f32 to vector<2x32xf32>
    %424 = arith.addf %423, %422 : vector<2x32xf32>
    %425 = arith.divf %423, %424 : vector<2x32xf32>
    %426 = vector.extract_strided_slice %419 {offsets = [0, 32], sizes = [2, 32], strides = [1, 1]} : vector<2x128xf32> to vector<2x32xf32>
    %427 = arith.negf %426 : vector<2x32xf32>
    %428 = math.exp %427 : vector<2x32xf32>
    %cst_154 = arith.constant 1.000000e+00 : f32
    %429 = vector.broadcast %cst_154 : f32 to vector<2x32xf32>
    %430 = arith.addf %429, %428 : vector<2x32xf32>
    %431 = arith.divf %429, %430 : vector<2x32xf32>
    %432 = vector.extract_strided_slice %419 {offsets = [0, 64], sizes = [2, 32], strides = [1, 1]} : vector<2x128xf32> to vector<2x32xf32>
    %433 = math.tanh %432 : vector<2x32xf32>
    %434 = vector.extract_strided_slice %419 {offsets = [0, 96], sizes = [2, 32], strides = [1, 1]} : vector<2x128xf32> to vector<2x32xf32>
    %435 = arith.negf %434 : vector<2x32xf32>
    %436 = math.exp %435 : vector<2x32xf32>
    %cst_155 = arith.constant 1.000000e+00 : f32
    %437 = vector.broadcast %cst_155 : f32 to vector<2x32xf32>
    %438 = arith.addf %437, %436 : vector<2x32xf32>
    %439 = arith.divf %437, %438 : vector<2x32xf32>
    %440 = arith.mulf %431, %376 : vector<2x32xf32>
    %441 = arith.mulf %425, %433 : vector<2x32xf32>
    %442 = arith.addf %440, %441 : vector<2x32xf32>
    %443 = math.tanh %442 : vector<2x32xf32>
    %444 = arith.mulf %439, %443 : vector<2x32xf32>
    %c10 = arith.constant 10 : index
    %c0_156 = arith.constant 0 : index
    %445 = vector.load %arg17[%c10, %c0_156] : memref<14x32xf32, #tpu.memory_space<vmem>>, vector<2x32xf32>
    tpu.vector_store %arg17[%c10, %c0_156], %444 {strides = array<i32>} : memref<14x32xf32, #tpu.memory_space<vmem>>, vector<2x32xf32>,
    %446 = vector.extract_strided_slice %47 {offsets = [0, 6, 0], sizes = [2, 1, 128], strides = [1, 1, 1]} : vector<2x8x128xf32> to vector<2x1x128xf32>
    %447 = vector.shape_cast %446 : vector<2x1x128xf32> to vector<2x128xf32>
    %cst_157 = arith.constant dense<0.000000e+00> : vector<2x128xf32>
    %448 = tpu.matmul %408, %48, %cst_157 {dimension_numbers = #tpu.dot_dimension_numbers<[1], [0], [0], [1], [0, 0, 1, 1], [], []>} : vector<2x32xf32>, vector<32x128xf32>, vector<2x128xf32> -> vector<2x128xf32>
    %449 = arith.addf %447, %448 : vector<2x128xf32>
    %450 = vector.extract_strided_slice %449 {offsets = [0, 0], sizes = [2, 32], strides = [1, 1]} : vector<2x128xf32> to vector<2x32xf32>
    %451 = arith.negf %450 : vector<2x32xf32>
    %452 = math.exp %451 : vector<2x32xf32>
    %cst_158 = arith.constant 1.000000e+00 : f32
    %453 = vector.broadcast %cst_158 : f32 to vector<2x32xf32>
    %454 = arith.addf %453, %452 : vector<2x32xf32>
    %455 = arith.divf %453, %454 : vector<2x32xf32>
    %456 = vector.extract_strided_slice %449 {offsets = [0, 32], sizes = [2, 32], strides = [1, 1]} : vector<2x128xf32> to vector<2x32xf32>
    %457 = arith.negf %456 : vector<2x32xf32>
    %458 = math.exp %457 : vector<2x32xf32>
    %cst_159 = arith.constant 1.000000e+00 : f32
    %459 = vector.broadcast %cst_159 : f32 to vector<2x32xf32>
    %460 = arith.addf %459, %458 : vector<2x32xf32>
    %461 = arith.divf %459, %460 : vector<2x32xf32>
    %462 = vector.extract_strided_slice %449 {offsets = [0, 64], sizes = [2, 32], strides = [1, 1]} : vector<2x128xf32> to vector<2x32xf32>
    %463 = math.tanh %462 : vector<2x32xf32>
    %464 = vector.extract_strided_slice %449 {offsets = [0, 96], sizes = [2, 32], strides = [1, 1]} : vector<2x128xf32> to vector<2x32xf32>
    %465 = arith.negf %464 : vector<2x32xf32>
    %466 = math.exp %465 : vector<2x32xf32>
    %cst_160 = arith.constant 1.000000e+00 : f32
    %467 = vector.broadcast %cst_160 : f32 to vector<2x32xf32>
    %468 = arith.addf %467, %466 : vector<2x32xf32>
    %469 = arith.divf %467, %468 : vector<2x32xf32>
    %470 = arith.mulf %461, %406 : vector<2x32xf32>
    %471 = arith.mulf %455, %463 : vector<2x32xf32>
    %472 = arith.addf %470, %471 : vector<2x32xf32>
    %473 = math.tanh %472 : vector<2x32xf32>
    %474 = arith.mulf %469, %473 : vector<2x32xf32>
    %c0_161 = arith.constant 0 : index
    %c0_162 = arith.constant 0 : index
    %c0_163 = arith.constant 0 : index
    %475 = vector.load %arg11[%c0_161, %c0_162, %c0_163] : memref<1x32x128xf32, #tpu.memory_space<vmem>>, vector<1x32x128xf32>
    %476 = vector.shape_cast %475 : vector<1x32x128xf32> to vector<32x128xf32>
    %cst_164 = arith.constant dense<0.000000e+00> : vector<2x128xf32>
    %477 = tpu.matmul %474, %476, %cst_164 {dimension_numbers = #tpu.dot_dimension_numbers<[1], [0], [0], [1], [0, 0, 1, 1], [], []>} : vector<2x32xf32>, vector<32x128xf32>, vector<2x128xf32> -> vector<2x128xf32>
    %c0_165 = arith.constant 0 : index
    %c0_166 = arith.constant 0 : index
    %c0_167 = arith.constant 0 : index
    %478 = vector.load %arg12[%c0_165, %c0_166, %c0_167] : memref<1x32x128xf32, #tpu.memory_space<vmem>>, vector<1x32x128xf32>
    %479 = vector.shape_cast %478 : vector<1x32x128xf32> to vector<32x128xf32>
    %cst_168 = arith.constant dense<0.000000e+00> : vector<2x128xf32>
    %480 = tpu.matmul %444, %479, %cst_168 {dimension_numbers = #tpu.dot_dimension_numbers<[1], [0], [0], [1], [0, 0, 1, 1], [], []>} : vector<2x32xf32>, vector<32x128xf32>, vector<2x128xf32> -> vector<2x128xf32>
    %481 = arith.addf %477, %480 : vector<2x128xf32>
    %c0_169 = arith.constant 0 : index
    %c0_170 = arith.constant 0 : index
    %c0_171 = arith.constant 0 : index
    %482 = vector.load %arg13[%c0_169, %c0_170, %c0_171] : memref<1x1x128xf32, #tpu.memory_space<vmem>>, vector<1x1x128xf32>
    %483 = vector.shape_cast %482 : vector<1x1x128xf32> to vector<1x128xf32>
    %484 = vector.broadcast %483 : vector<1x128xf32> to vector<2x128xf32>
    %485 = arith.addf %481, %484 : vector<2x128xf32>
    %486 = vector.extract_strided_slice %485 {offsets = [0, 0], sizes = [2, 32], strides = [1, 1]} : vector<2x128xf32> to vector<2x32xf32>
    %487 = arith.negf %486 : vector<2x32xf32>
    %488 = math.exp %487 : vector<2x32xf32>
    %cst_172 = arith.constant 1.000000e+00 : f32
    %489 = vector.broadcast %cst_172 : f32 to vector<2x32xf32>
    %490 = arith.addf %489, %488 : vector<2x32xf32>
    %491 = arith.divf %489, %490 : vector<2x32xf32>
    %492 = vector.extract_strided_slice %485 {offsets = [0, 32], sizes = [2, 32], strides = [1, 1]} : vector<2x128xf32> to vector<2x32xf32>
    %493 = arith.negf %492 : vector<2x32xf32>
    %494 = math.exp %493 : vector<2x32xf32>
    %cst_173 = arith.constant 1.000000e+00 : f32
    %495 = vector.broadcast %cst_173 : f32 to vector<2x32xf32>
    %496 = arith.addf %495, %494 : vector<2x32xf32>
    %497 = arith.divf %495, %496 : vector<2x32xf32>
    %498 = vector.extract_strided_slice %485 {offsets = [0, 64], sizes = [2, 32], strides = [1, 1]} : vector<2x128xf32> to vector<2x32xf32>
    %499 = math.tanh %498 : vector<2x32xf32>
    %500 = vector.extract_strided_slice %485 {offsets = [0, 96], sizes = [2, 32], strides = [1, 1]} : vector<2x128xf32> to vector<2x32xf32>
    %501 = arith.negf %500 : vector<2x32xf32>
    %502 = math.exp %501 : vector<2x32xf32>
    %cst_174 = arith.constant 1.000000e+00 : f32
    %503 = vector.broadcast %cst_174 : f32 to vector<2x32xf32>
    %504 = arith.addf %503, %502 : vector<2x32xf32>
    %505 = arith.divf %503, %504 : vector<2x32xf32>
    %506 = arith.mulf %497, %442 : vector<2x32xf32>
    %507 = arith.mulf %491, %499 : vector<2x32xf32>
    %508 = arith.addf %506, %507 : vector<2x32xf32>
    %509 = math.tanh %508 : vector<2x32xf32>
    %510 = arith.mulf %505, %509 : vector<2x32xf32>
    %c12 = arith.constant 12 : index
    %c0_175 = arith.constant 0 : index
    %511 = vector.load %arg17[%c12, %c0_175] : memref<14x32xf32, #tpu.memory_space<vmem>>, vector<2x32xf32>
    tpu.vector_store %arg17[%c12, %c0_175], %510 {strides = array<i32>} : memref<14x32xf32, #tpu.memory_space<vmem>>, vector<2x32xf32>,
    %c0_176 = arith.constant 0 : index
    %c0_177 = arith.constant 0 : index
    %512 = vector.load %arg17[%c0_176, %c0_177] : memref<14x32xf32, #tpu.memory_space<vmem>>, vector<14x32xf32>
    %cst_178 = arith.constant 0.000000e+00 : f32
    %513 = vector.broadcast %cst_178 : f32 to vector<14x32xf32>
    %514 = arith.maximumf %512, %513 : vector<14x32xf32>
    %c0_179 = arith.constant 0 : index
    %c0_180 = arith.constant 0 : index
    %515 = vector.load %arg14[%c0_179, %c0_180] : memref<32x4xf32, #tpu.memory_space<vmem>>, vector<32x4xf32>
    %cst_181 = arith.constant dense<0.000000e+00> : vector<14x4xf32>
    %516 = tpu.matmul %514, %515, %cst_181 {dimension_numbers = #tpu.dot_dimension_numbers<[1], [0], [0], [1], [0, 0, 1, 1], [], []>} : vector<14x32xf32>, vector<32x4xf32>, vector<14x4xf32> -> vector<14x4xf32>
    %c0_182 = arith.constant 0 : index
    %c0_183 = arith.constant 0 : index
    %517 = vector.load %arg15[%c0_182, %c0_183] : memref<1x4xf32, #tpu.memory_space<vmem>>, vector<1x4xf32>
    %518 = vector.broadcast %517 : vector<1x4xf32> to vector<14x4xf32>
    %519 = arith.addf %516, %518 : vector<14x4xf32>
    %c0_184 = arith.constant 0 : index
    %c0_185 = arith.constant 0 : index
    %520 = vector.load %arg16[%c0_184, %c0_185] : memref<14x4xf32, #tpu.memory_space<vmem>>, vector<14x4xf32>
    tpu.vector_store %arg16[%c0_184, %c0_185], %519 {strides = array<i32>} : memref<14x4xf32, #tpu.memory_space<vmem>>, vector<14x4xf32>,
    return
  }
}

</mosaic_0001>

<bundles_post_ra>
// kernel: tpalstm_forward.1
= control target key start
LH: loop header
LB: loop body
LE: loop exit
PB: predicated region body
PF: predicated region fallthrough
CT: control target
= control target key end

     0   :  { %vm73_vm0 = vcmask 1043456   ;;  %v7735_v0 = vmov 0.0   ;;  %vm69_vm1 = vcmask 31744   ;;  %vm7736_vm2 = vmmov 0   ;;  %s8754_s1 = inlined_call_operand.vmem [shape: f32[8,4,4], index: 1, kind: input, shape index: {}]   ;;  %s8755_s0 = inlined_call_operand.vmem [shape: f32[8,8,4], index: 0, kind: input, shape index: {}]   ;;  %s8756_s2 = inlined_call_operand.vmem [shape: f32[8,4,4], index: 2, kind: input, shape index: {}]   ;;  %s8757_s3 = inlined_call_operand.vmem [shape: f32[8,4,4], index: 3, kind: input, shape index: {}]   ;;  %s8758_s4 = inlined_call_operand.vmem [shape: f32[8,4,16], index: 4, kind: input, shape index: {}]   ;;  %s8759_s6 = inlined_call_operand.vmem [shape: f32[2,16,32], index: 6, kind: input, shape index: {}]   ;;  %s8760_s8 = inlined_call_operand.vmem [shape: f32[2,32,128], index: 8, kind: input, shape index: {}]   ;;  %s8761_s5 = inlined_call_operand.vmem [shape: f32[1,1,16], index: 5, kind: input, shape index: {}]   ;;  %s8762_s9 = inlined_call_operand.vmem [shape: f32[32,128], index: 9, kind: input, shape index: {}]   ;;  %s8763_s7 = inlined_call_operand.vmem [shape: f32[1,1,32], index: 7, kind: input, shape index: {}]   ;;  %s8764_s10 = inlined_call_operand.vmem [shape: f32[1,1,128], index: 10, kind: input, shape index: {}]   ;;  %s8765_s12 = inlined_call_operand.vmem [shape: f32[1,32,128], index: 12, kind: input, shape index: {}]   ;;  %s8766_s11 = inlined_call_operand.vmem [shape: f32[1,32,128], index: 11, kind: input, shape index: {}]   ;;  %s8767_s13 = inlined_call_operand.vmem [shape: f32[1,1,128], index: 13, kind: input, shape index: {}]   ;;  %s8768_s14 = inlined_call_operand.vmem [shape: f32[32,4], index: 14, kind: input, shape index: {}]   ;;  %s8769_s15 = inlined_call_operand.vmem [shape: f32[1,4], index: 15, kind: input, shape index: {}]   ;;  %s8770_s16 = inlined_call_operand.vmem [shape: f32[14,4], index: 16, kind: output, shape index: {}]  }
   0x1   :  { %8772 = sst [smem:[#allocation3_spill]] %s8754_s1  ;;  %6860 = vmatprep.subr.mxu0 %v7735_v0  ;;  %6865 = vmatprep.subr.mxu1 %v7735_v0  ;;  %v7836_v3 = vld [vmem:[%s8755_s0] sm:$0xff]  ;;  %v7844_v4 = vld [vmem:[%s8755_s0 + $0x8] sm:$0xff]  ;;  %v7864_v7 = vld [vmem:[%s8755_s0 + $0x10] sm:$0xff]  ;;  %vm2479_vm3 = vcmask 64512   ;;  %vm3794_vm4 = vcmask 130048  }
   0x2   :  { %s8773_s23 = sld [smem:[#allocation3_spill]]  ;;  %6862 = vmatprep.mubr.msk.f32.mxu0 %vm7736_vm2, %v7735_v0  ;;  %6867 = vmatprep.mubr.msk.f32.mxu1 %vm7736_vm2, %v7735_v0  ;;  %v7869_v8 = vld [vmem:[%s8755_s0 + $0x18] sm:$0xff]  ;;  %v7892_v11 = vld [vmem:[%s8755_s0 + $0x20] sm:$0xff]  ;;  %v7897_v12 = vld [vmem:[%s8755_s0 + $0x28] sm:$0xff]  ;;  %vm3956_vm5 = vcmask 261120   ;;  %s7738_s1 = smov 64  }
   0x3   :  { %v7920_v15 = vld [vmem:[%s8755_s0 + $0x30] sm:$0xff]  ;;  %v7925_v16 = vld [vmem:[%s8755_s0 + $0x38] sm:$0xff]  ;;  %v679_v17 = vld [vmem:[%s8756_s2] sm:$0xf]  ;;  %vm4315_vm6 = vcmask 1041409   ;;  %vm4427_vm7 = vcmask 254976  }
   0x4   :  { %v680_v18 = vld [vmem:[%s8756_s2 + $0x4] sm:$0xf]  ;;  %v681_v19 = vld [vmem:[%s8756_s2 + $0x8] sm:$0xf]  ;;  %v682_v20 = vld [vmem:[%s8756_s2 + $0xc] sm:$0xf] }
   0x5   :  { %v683_v21 = vld [vmem:[%s8756_s2 + $0x10] sm:$0xf]  ;;  %v684_v22 = vld [vmem:[%s8756_s2 + $0x14] sm:$0xf]  ;;  %v685_v23 = vld [vmem:[%s8756_s2 + $0x18] sm:$0xf] }
   0x6   :  { %v686_v24 = vld [vmem:[%s8756_s2 + $0x1c] sm:$0xf]  ;;  %v1271_v25 = vld [vmem:[%s8757_s3] sm:$0xf]  ;;  %v1272_v26 = vld [vmem:[%s8757_s3 + $0x4] sm:$0xf] }
   0x7   :  { %v1273_v27 = vld [vmem:[%s8757_s3 + $0x8] sm:$0xf]  ;;  %v1274_v28 = vld [vmem:[%s8757_s3 + $0xc] sm:$0xf]  ;;  %v1275_v29 = vld [vmem:[%s8757_s3 + $0x10] sm:$0xf] }
   0x8   :  { %v61_v1 = vld [vmem:[%s8773_s23] sm:$0xf]  ;;  %v62_v2 = vld [vmem:[%s8773_s23 + $0x4] sm:$0xf]  ;;  %v63_v5 = vld [vmem:[%s8773_s23 + $0x8] sm:$0xf] }
   0x9   :  { %6861 = vmatpush3.msk.msra.mxu0 %vm73_vm0, %v61_v1  ;;  %6866 = vmatpush3.msk.msra.mxu1 %vm73_vm0, %v62_v2  ;;  %v64_v6 = vld [vmem:[%s8773_s23 + $0xc] sm:$0xf]  ;;  %v65_v9 = vld [vmem:[%s8773_s23 + $0x10] sm:$0xf]  ;;  %v66_v10 = vld [vmem:[%s8773_s23 + $0x14] sm:$0xf] }
   0xa   :  { %6863 = vmatmul.mubr.msk.f32.vlgmr.msra.gmra.mrb[0].mxu0 %vm69_vm1, %v7836_v3  ;;  %6868 = vmatmul.mubr.msk.f32.vlgmr.msra.gmra.mrb[0].mxu1 %vm69_vm1, %v7844_v4  ;;  %v67_v13 = vld [vmem:[%s8773_s23 + $0x18] sm:$0xf]  ;;  %v68_v14 = vld [vmem:[%s8773_s23 + $0x1c] sm:$0xf]  ;;  %v1276_v30 = vld [vmem:[%s8757_s3 + $0x14] sm:$0xf] }
   0xb   :  { %6870 = vmatprep.subr.mxu0 %v7735_v0  ;;  %6875 = vmatprep.subr.mxu1 %v7735_v0  ;;  %v1277_v31 = vld [vmem:[%s8757_s3 + $0x18] sm:$0xf]  ;;  %v1278_v32 = vld [vmem:[%s8757_s3 + $0x1c] sm:$0xf]  ;;  %vm6486_vm8 = vcmask 29696  }
   0xc   :  { %6871 = vmatpush3.msk.msra.mxu0 %vm73_vm0, %v63_v5  ;;  %6872 = vmatprep.mubr.msk.f32.mxu0 %vm7736_vm2, %v7735_v0 }
   0xd   :  { %6876 = vmatpush3.msk.msra.mxu1 %vm73_vm0, %v64_v6  ;;  %6877 = vmatprep.mubr.msk.f32.mxu1 %vm7736_vm2, %v7735_v0 }
   0xe   :  { %6873 = vmatmul.mubr.msk.f32.vlgmr.msra.gmra.mrb[2].mxu0 %vm69_vm1, %v7864_v7  ;;  %6878 = vmatmul.mubr.msk.f32.vlgmr.msra.gmra.mrb[2].mxu1 %vm69_vm1, %v7869_v8 }
   0xf   :  { %6880 = vmatprep.subr.mxu0 %v7735_v0  ;;  %6885 = vmatprep.subr.mxu1 %v7735_v0 }
  0x10   :  { %6881 = vmatpush3.msk.msra.mxu0 %vm73_vm0, %v65_v9  ;;  %6882 = vmatprep.mubr.msk.f32.mxu0 %vm7736_vm2, %v7735_v0 }
  0x11   :  { %6886 = vmatpush3.msk.msra.mxu1 %vm73_vm0, %v66_v10  ;;  %6887 = vmatprep.mubr.msk.f32.mxu1 %vm7736_vm2, %v7735_v0 }
  0x12   :  { %6883 = vmatmul.mubr.msk.f32.vlgmr.msra.gmra.mrb[4].mxu0 %vm69_vm1, %v7892_v11  ;;  %6888 = vmatmul.mubr.msk.f32.vlgmr.msra.gmra.mrb[4].mxu1 %vm69_vm1, %v7897_v12 }
  0x13   :  { %6890 = vmatprep.subr.mxu0 %v7735_v0  ;;  %6895 = vmatprep.subr.mxu1 %v7735_v0 }
  0x14   :  { %6891 = vmatpush3.msk.msra.mxu0 %vm73_vm0, %v67_v13  ;;  %6892 = vmatprep.mubr.msk.f32.mxu0 %vm7736_vm2, %v7735_v0 }
  0x15   :  { %6896 = vmatpush3.msk.msra.mxu1 %vm73_vm0, %v68_v14  ;;  %6897 = vmatprep.mubr.msk.f32.mxu1 %vm7736_vm2, %v7735_v0 }
  0x16   :  { %6893 = vmatmul.mubr.msk.f32.vlgmr.msra.gmra.mrb[6].mxu0 %vm69_vm1, %v7920_v15  ;;  %6898 = vmatmul.mubr.msk.f32.vlgmr.msra.gmra.mrb[6].mxu1 %vm69_vm1, %v7925_v16 }
  0x17   :  { %6900 = vmatprep.subr.mxu0 %v7735_v0  ;;  %6905 = vmatprep.subr.mxu1 %v7735_v0 }
  0x18   :  { %6901 = vmatpush3.msk.msra.mxu0 %vm73_vm0, %v679_v17  ;;  %6902 = vmatprep.mubr.msk.f32.mxu0 %vm7736_vm2, %v7735_v0 }
  0x19   :  { %6906 = vmatpush3.msk.msra.mxu1 %vm73_vm0, %v680_v18  ;;  %6907 = vmatprep.mubr.msk.f32.mxu1 %vm7736_vm2, %v7735_v0 }
  0x1a   :  { %6903 = vmatmul.mubr.msk.f32.vlgmr.msra.gmra.mrb[8].mxu0 %vm69_vm1, %v7836_v3  ;;  %6908 = vmatmul.mubr.msk.f32.vlgmr.msra.gmra.mrb[8].mxu1 %vm69_vm1, %v7844_v4 }
  0x1b   :  { %6910 = vmatprep.subr.mxu0 %v7735_v0  ;;  %6915 = vmatprep.subr.mxu1 %v7735_v0 }
  0x1c   :  { %6911 = vmatpush3.msk.msra.mxu0 %vm73_vm0, %v681_v19  ;;  %6912 = vmatprep.mubr.msk.f32.mxu0 %vm7736_vm2, %v7735_v0 }
  0x1d   :  { %6916 = vmatpush3.msk.msra.mxu1 %vm73_vm0, %v682_v20  ;;  %6917 = vmatprep.mubr.msk.f32.mxu1 %vm7736_vm2, %v7735_v0 }
  0x1e   :  { %6913 = vmatmul.mubr.msk.f32.vlgmr.msra.gmra.mrb[10].mxu0 %vm69_vm1, %v7864_v7  ;;  %6918 = vmatmul.mubr.msk.f32.vlgmr.msra.gmra.mrb[10].mxu1 %vm69_vm1, %v7869_v8 }
  0x1f   :  { %6920 = vmatprep.subr.mxu0 %v7735_v0  ;;  %6925 = vmatprep.subr.mxu1 %v7735_v0 }
  0x20   :  { %6921 = vmatpush3.msk.msra.mxu0 %vm73_vm0, %v683_v21  ;;  %6922 = vmatprep.mubr.msk.f32.mxu0 %vm7736_vm2, %v7735_v0 }
  0x21   :  { %6926 = vmatpush3.msk.msra.mxu1 %vm73_vm0, %v684_v22  ;;  %6927 = vmatprep.mubr.msk.f32.mxu1 %vm7736_vm2, %v7735_v0 }
  0x22   :  { %6923 = vmatmul.mubr.msk.f32.vlgmr.msra.gmra.mrb[12].mxu0 %vm69_vm1, %v7892_v11  ;;  %6928 = vmatmul.mubr.msk.f32.vlgmr.msra.gmra.mrb[12].mxu1 %vm69_vm1, %v7897_v12 }
  0x23   :  { %6930 = vmatprep.subr.mxu0 %v7735_v0  ;;  %6935 = vmatprep.subr.mxu1 %v7735_v0 }
  0x24   :  { %6931 = vmatpush3.msk.msra.mxu0 %vm73_vm0, %v685_v23  ;;  %6932 = vmatprep.mubr.msk.f32.mxu0 %vm7736_vm2, %v7735_v0 }
  0x25   :  { %6936 = vmatpush3.msk.msra.mxu1 %vm73_vm0, %v686_v24  ;;  %6937 = vmatprep.mubr.msk.f32.mxu1 %vm7736_vm2, %v7735_v0 }
  0x26   :  { %6933 = vmatmul.mubr.msk.f32.vlgmr.msra.gmra.mrb[14].mxu0 %vm69_vm1, %v7920_v15  ;;  %6938 = vmatmul.mubr.msk.f32.vlgmr.msra.gmra.mrb[14].mxu1 %vm69_vm1, %v7925_v16 }
  0x27   :  { %6940 = vmatprep.subr.mxu0 %v7735_v0  ;;  %6945 = vmatprep.subr.mxu1 %v7735_v0 }
  0x28   :  { %6941 = vmatpush3.msk.msra.mxu0 %vm73_vm0, %v1271_v25  ;;  %6942 = vmatprep.mubr.msk.f32.mxu0 %vm7736_vm2, %v7735_v0 }
  0x29   :  { %6946 = vmatpush3.msk.msra.mxu1 %vm73_vm0, %v1272_v26  ;;  %6947 = vmatprep.mubr.msk.f32.mxu1 %vm7736_vm2, %v7735_v0 }
  0x2a   :  { %6943 = vmatmul.mubr.msk.f32.vlgmr.msra.gmra.mrb[16].mxu0 %vm69_vm1, %v7836_v3  ;;  %6948 = vmatmul.mubr.msk.f32.vlgmr.msra.gmra.mrb[16].mxu1 %vm69_vm1, %v7844_v4 }
  0x2b   :  { %6950 = vmatprep.subr.mxu0 %v7735_v0  ;;  %6955 = vmatprep.subr.mxu1 %v7735_v0 }
  0x2c   :  { %6951 = vmatpush3.msk.msra.mxu0 %vm73_vm0, %v1273_v27  ;;  %6952 = vmatprep.mubr.msk.f32.mxu0 %vm7736_vm2, %v7735_v0 }
  0x2d   :  { %6956 = vmatpush3.msk.msra.mxu1 %vm73_vm0, %v1274_v28  ;;  %6957 = vmatprep.mubr.msk.f32.mxu1 %vm7736_vm2, %v7735_v0 }
  0x2e   :  { %6953 = vmatmul.mubr.msk.f32.vlgmr.msra.gmra.mrb[18].mxu0 %vm69_vm1, %v7864_v7  ;;  %6958 = vmatmul.mubr.msk.f32.vlgmr.msra.gmra.mrb[18].mxu1 %vm69_vm1, %v7869_v8 }
  0x2f   :  { %6960 = vmatprep.subr.mxu0 %v7735_v0  ;;  %6965 = vmatprep.subr.mxu1 %v7735_v0 }
  0x30   :  { %6961 = vmatpush3.msk.msra.mxu0 %vm73_vm0, %v1275_v29  ;;  %6962 = vmatprep.mubr.msk.f32.mxu0 %vm7736_vm2, %v7735_v0 }
  0x31   :  { %6966 = vmatpush3.msk.msra.mxu1 %vm73_vm0, %v1276_v30  ;;  %6967 = vmatprep.mubr.msk.f32.mxu1 %vm7736_vm2, %v7735_v0 }
  0x32   :  { %6963 = vmatmul.mubr.msk.f32.vlgmr.msra.gmra.mrb[20].mxu0 %vm69_vm1, %v7892_v11  ;;  %6968 = vmatmul.mubr.msk.f32.vlgmr.msra.gmra.mrb[20].mxu1 %vm69_vm1, %v7897_v12 }
  0x33   :  { %6970 = vmatprep.subr.mxu0 %v7735_v0  ;;  %6975 = vmatprep.subr.mxu1 %v7735_v0 }
  0x34   :  { %6971 = vmatpush3.msk.msra.mxu0 %vm73_vm0, %v1277_v31  ;;  %6972 = vmatprep.mubr.msk.f32.mxu0 %vm7736_vm2, %v7735_v0 }
  0x35   :  { %6976 = vmatpush3.msk.msra.mxu1 %vm73_vm0, %v1278_v32  ;;  %6977 = vmatprep.mubr.msk.f32.mxu1 %vm7736_vm2, %v7735_v0 }
  0x36   :  { %6973 = vmatmul.mubr.msk.f32.vlgmr.msra.gmra.mrb[22].mxu0 %vm69_vm1, %v7920_v15  ;;  %6978 = vmatmul.mubr.msk.f32.vlgmr.msra.gmra.mrb[22].mxu1 %vm69_vm1, %v7925_v16 }
  0x37   :  { %6980 = vmatprep.subr.mxu0 %v7735_v0  ;;  %6985 = vmatprep.subr.mxu1 %v7735_v0 }
  0x38   :  { %6982 = vmatprep.mubr.msk.f32.mxu0 %vm7736_vm2, %v7735_v0  ;;  %6987 = vmatprep.mubr.msk.f32.mxu1 %vm7736_vm2, %v7735_v0 }
  0xdd   :  { %v8087_v33 = vpop.f32.mrb[0].mxu0  ;;  %v8089_v34 = vpop.f32.mrb[0].mxu1 }
  0xde   :  { %v6864_v35 = vpop.f32.mrb[1].mxu0  ;;  %v6869_v36 = vpop.f32.mrb[1].mxu1 }
  0xe1   :  { %v8091_v37 = vpop.f32.mrb[2].mxu0  ;;  %v8093_v38 = vpop.f32.mrb[2].mxu1 }
  0xe2   :  { %v6874_v39 = vpop.f32.mrb[3].mxu0  ;;  %v6879_v40 = vpop.f32.mrb[3].mxu1 }
  0xe5   :  { %v8095_v41 = vpop.f32.mrb[4].mxu0  ;;  %v8097_v42 = vpop.f32.mrb[4].mxu1 }
  0xe6   :  { %v6884_v43 = vpop.f32.mrb[5].mxu0  ;;  %v6889_v44 = vpop.f32.mrb[5].mxu1 }
  0xe9   :  { %v8099_v45 = vpop.f32.mrb[6].mxu0  ;;  %v8101_v46 = vpop.f32.mrb[6].mxu1 }
  0xea   :  { %v6894_v47 = vpop.f32.mrb[7].mxu0  ;;  %v6899_v48 = vpop.f32.mrb[7].mxu1 }
  0xed   :  { %v756_v49 = vpop.f32.mrb[8].mxu0  ;;  %v829_v50 = vpop.f32.mrb[8].mxu1 }
  0xee   :  { %v6904_v51 = vpop.f32.mrb[9].mxu0  ;;  %6981 = vmatpush3.xpose.msk.msra.mxu0 %vm69_vm1, %v756_v49  ;;  %v6909_v52 = vpop.f32.mrb[9].mxu1  ;;  %6986 = vmatpush3.xpose.msk.msra.mxu1 %vm69_vm1, %v829_v50 }
  0xef   :  { %6990 = vmatprep.subr.mxu0 %v7735_v0  ;;  %6995 = vmatprep.subr.mxu1 %v7735_v0 }
  0xf1   :  { %v902_v53 = vpop.f32.mrb[10].mxu0  ;;  %v975_v54 = vpop.f32.mrb[10].mxu1 }
  0xf2   :  { %v6914_v55 = vpop.f32.mrb[11].mxu0  ;;  %v6919_v56 = vpop.f32.mrb[11].mxu1 }
  0xf5   :  { %v1048_v57 = vpop.f32.mrb[12].mxu0  ;;  %v1121_v58 = vpop.f32.mrb[12].mxu1 }
  0xf6   :  { %v6924_v59 = vpop.f32.mrb[13].mxu0  ;;  %v6929_v60 = vpop.f32.mrb[13].mxu1 }
  0xf9   :  { %v1194_v61 = vpop.f32.mrb[14].mxu0  ;;  %v1267_v62 = vpop.f32.mrb[14].mxu1 }
  0xfa   :  { %v6934_v63 = vpop.f32.mrb[15].mxu0  ;;  %v6939_v1 = vpop.f32.mrb[15].mxu1 }
  0xfd   :  { %v1348_v2 = vpop.f32.mrb[16].mxu0  ;;  %v1421_v3 = vpop.f32.mrb[16].mxu1 }
  0xfe   :  { %v6944_v4 = vpop.f32.mrb[17].mxu0  ;;  %6983 = vmatmul.mubr.msk.f32.vlgmr.msra.gmra.mrb[24].mxu0 %vm69_vm1, %v1348_v2  ;;  %6988 = vmatmul.mubr.msk.f32.vlgmr.msra.gmra.mrb[24].mxu1 %vm69_vm1, %v1421_v3  ;;  %v6949_v5 = vpop.f32.mrb[17].mxu1 }
  0xff   :  { %6991 = vmatpush3.xpose.msk.msra.mxu0 %vm69_vm1, %v902_v53  ;;  %6996 = vmatpush3.xpose.msk.msra.mxu1 %vm69_vm1, %v975_v54 }
 0x100   :  { %6992 = vmatprep.mubr.msk.f32.mxu0 %vm7736_vm2, %v7735_v0  ;;  %6997 = vmatprep.mubr.msk.f32.mxu1 %vm7736_vm2, %v7735_v0 }
 0x101   :  { %v1494_v6 = vpop.f32.mrb[18].mxu0  ;;  %v1567_v7 = vpop.f32.mrb[18].mxu1  ;;  %7000 = vmatprep.subr.mxu0 %v7735_v0  ;;  %7005 = vmatprep.subr.mxu1 %v7735_v0 }
 0x102   :  { %v6954_v8 = vpop.f32.mrb[19].mxu0  ;;  %6993 = vmatmul.mubr.msk.f32.vlgmr.msra.gmra.mrb[26].mxu0 %vm69_vm1, %v1494_v6  ;;  %6998 = vmatmul.mubr.msk.f32.vlgmr.msra.gmra.mrb[26].mxu1 %vm69_vm1, %v1567_v7  ;;  %v6959_v9 = vpop.f32.mrb[19].mxu1 }
 0x103   :  { %7001 = vmatpush3.xpose.msk.msra.mxu0 %vm69_vm1, %v1048_v57  ;;  %7006 = vmatpush3.xpose.msk.msra.mxu1 %vm69_vm1, %v1121_v58 }
 0x104   :  { %7002 = vmatprep.mubr.msk.f32.mxu0 %vm7736_vm2, %v7735_v0  ;;  %7007 = vmatprep.mubr.msk.f32.mxu1 %vm7736_vm2, %v7735_v0 }
 0x105   :  { %v1640_v10 = vpop.f32.mrb[20].mxu0  ;;  %v1713_v11 = vpop.f32.mrb[20].mxu1  ;;  %7010 = vmatprep.subr.mxu0 %v7735_v0  ;;  %7015 = vmatprep.subr.mxu1 %v7735_v0 }
 0x106   :  { %7003 = vmatmul.mubr.msk.f32.vlgmr.msra.gmra.mrb[28].mxu0 %vm69_vm1, %v1640_v10  ;;  %7008 = vmatmul.mubr.msk.f32.vlgmr.msra.gmra.mrb[28].mxu1 %vm69_vm1, %v1713_v11  ;;  %v6964_v12 = vpop.f32.mrb[21].mxu0  ;;  %v6969_v13 = vpop.f32.mrb[21].mxu1 }
 0x107   :  { %7011 = vmatpush3.xpose.msk.msra.mxu0 %vm69_vm1, %v1194_v61  ;;  %7016 = vmatpush3.xpose.msk.msra.mxu1 %vm69_vm1, %v1267_v62 }
 0x108   :  { %7012 = vmatprep.mubr.msk.f32.mxu0 %vm7736_vm2, %v7735_v0  ;;  %7017 = vmatprep.mubr.msk.f32.mxu1 %vm7736_vm2, %v7735_v0 }
 0x109   :  { %v1786_v14 = vpop.f32.mrb[22].mxu0  ;;  %v1859_v15 = vpop.f32.mrb[22].mxu1  ;;  %7020 = vmatprep.subr.mxu0 %v7735_v0  ;;  %7025 = vmatprep.subr.mxu1 %v7735_v0 }
 0x10a   :  { %7013 = vmatmul.mubr.msk.f32.vlgmr.msra.gmra.mrb[30].mxu0 %vm69_vm1, %v1786_v14  ;;  %7018 = vmatmul.mubr.msk.f32.vlgmr.msra.gmra.mrb[30].mxu1 %vm69_vm1, %v1859_v15  ;;  %v6974_v16 = vpop.f32.mrb[23].mxu0  ;;  %v6979_v17 = vpop.f32.mrb[23].mxu1 }
 0x10b   :  { %7021 = vmatpush3.msra.mxu0 %v8087_v33  ;;  %7026 = vmatpush3.msra.mxu1 %v8089_v34 }
 0x10c   :  { %7022 = vmatprep.mubr.msk.f32.mxu0 %vm7736_vm2, %v7735_v0  ;;  %7030 = vmatprep.subr.mxu0 %v7735_v0 }
 0x10d   :  { %7027 = vmatprep.mubr.msk.f32.mxu1 %vm7736_vm2, %v7735_v0  ;;  %7035 = vmatprep.subr.mxu1 %v7735_v0 }
 0x1d1   :  { %v1935_v18 = vpop.f32.mrb[24].mxu0  ;;  %v2011_v19 = vpop.f32.mrb[24].mxu1 }
 0x1d2   :  { %v2471_v20 = vmul.f32 0.25, %v1935_v18  ;;  %v6984_v21 = vpop.f32.mrb[25].mxu0  ;;  %v2472_v22 = vmul.f32 0.25, %v2011_v19  ;;  %v6989_v23 = vpop.f32.mrb[25].mxu1 }
 0x1d4   :  { %v2480_v24 = vsel %vm2479_vm3, %v2471_v20, -inf  ;;  %v2483_v30 = vsel %vm2479_vm3, %v2472_v22, -inf }
 0x1d5   :  { %2481 = vmax.xlane.f32.xlu0 %v2480_v24  ;;  %v2087_v25 = vpop.f32.mrb[26].mxu0  ;;  %v2163_v26 = vpop.f32.mrb[26].mxu1 }
 0x1d6   :  { %v2473_v27 = vmul.f32 0.25, %v2087_v25  ;;  %v6994_v28 = vpop.f32.mrb[27].mxu0  ;;  %v2474_v29 = vmul.f32 0.25, %v2163_v26  ;;  %v6999_v31 = vpop.f32.mrb[27].mxu1 }
 0x1d8   :  { %v2486_v32 = vsel %vm2479_vm3, %v2473_v27, -inf  ;;  %v2489_v40 = vsel %vm2479_vm3, %v2474_v29, -inf }
 0x1d9   :  { %2484 = vmax.xlane.f32.xlu0 %v2483_v30  ;;  %2487 = vmax.xlane.f32.xlu1 %v2486_v32  ;;  %v2239_v33 = vpop.f32.mrb[28].mxu0  ;;  %v2315_v34 = vpop.f32.mrb[28].mxu1 }
 0x1da   :  { %v2475_v35 = vmul.f32 0.25, %v2239_v33  ;;  %v7004_v36 = vpop.f32.mrb[29].mxu0  ;;  %v2476_v39 = vmul.f32 0.25, %v2315_v34  ;;  %v7009_v43 = vpop.f32.mrb[29].mxu1 }
 0x1dc   :  { %v2492_v44 = vsel %vm2479_vm3, %v2475_v35, -inf  ;;  %v2495_v52 = vsel %vm2479_vm3, %v2476_v39, -inf }
 0x1dd   :  { %2490 = vmax.xlane.f32.xlu1 %v2489_v40  ;;  %2493 = vmax.xlane.f32.xlu0 %v2492_v44  ;;  %v2391_v47 = vpop.f32.mrb[30].mxu0  ;;  %v2467_v48 = vpop.f32.mrb[30].mxu1 }
 0x1de   :  { %v2477_v49 = vmul.f32 0.25, %v2391_v47  ;;  %v7014_v50 = vpop.f32.mrb[31].mxu0  ;;  %v2478_v51 = vmul.f32 0.25, %v2467_v48  ;;  %v7019_v53 = vpop.f32.mrb[31].mxu1 }
 0x1e0   :  { %v2498_v54 = vsel %vm2479_vm3, %v2477_v49, -inf  ;;  %v2501_v55 = vsel %vm2479_vm3, %v2478_v51, -inf }
 0x1e1   :  { %2496 = vmax.xlane.f32.xlu1 %v2495_v52  ;;  %2499 = vmax.xlane.f32.xlu0 %v2498_v54 }
 0x1e5   :  { %2502 = vmax.xlane.f32.xlu1 %v2501_v55 }
 0x262   :  { %v2482_v56 = vpop.xlane.xlu0 %2481 }
 0x263   :  { %v2504_v57 = vsub.f32 %v2471_v20, %v2482_v56 }
 0x265   :  { %v2512_v58 = vmul.f32 1.442695, %v2504_v57 }
 0x266   :  { %v2485_v59 = vpop.xlane.xlu0 %2484  ;;  %v2488_v60 = vpop.xlane.xlu1 %2487 }
 0x267   :  { %7535 = vpow2.f32 %v2512_v58  ;;  %v2505_v61 = vsub.f32 %v2472_v22, %v2485_v59  ;;  %v2506_v62 = vsub.f32 %v2473_v27, %v2488_v60  ;;  %v3154_v59 = vld [vmem:[%s8758_s4 + $0x8] sm:$0xf] }
 0x269   :  { %v2514_v63 = vmul.f32 1.442695, %v2505_v61  ;;  %v2516_v1 = vmul.f32 1.442695, %v2506_v62  ;;  %v3155_v62 = vld [vmem:[%s8758_s4 + $0xc] sm:$0xf] }
 0x26a   :  { %v2491_v2 = vpop.xlane.xlu1 %2490  ;;  %v2494_v3 = vpop.xlane.xlu0 %2493 }
 0x26b   :  { %7537 = vpow2.f32 %v2514_v63  ;;  %v2507_v4 = vsub.f32 %v2474_v29, %v2491_v2  ;;  %v2508_v5 = vsub.f32 %v2475_v35, %v2494_v3 }
 0x26c   :  { %7539 = vpow2.f32 %v2516_v1  ;;  %v3156_v1 = vld [vmem:[%s8758_s4 + $0x10] sm:$0xf] }
 0x26d   :  { %v2518_v6 = vmul.f32 1.442695, %v2507_v4  ;;  %v2520_v7 = vmul.f32 1.442695, %v2508_v5  ;;  %v3157_v5 = vld [vmem:[%s8758_s4 + $0x14] sm:$0xf] }
 0x26e   :  { %v2497_v8 = vpop.xlane.xlu1 %2496  ;;  %v2500_v9 = vpop.xlane.xlu0 %2499 }
 0x26f   :  { %7541 = vpow2.f32 %v2518_v6  ;;  %v2509_v10 = vsub.f32 %v2476_v39, %v2497_v8  ;;  %v2510_v11 = vsub.f32 %v2477_v49, %v2500_v9 }
 0x270   :  { %7543 = vpow2.f32 %v2520_v7  ;;  %v3158_v7 = vld [vmem:[%s8758_s4 + $0x18] sm:$0xf] }
 0x271   :  { %v7536_v12 = vpop.eup %7535  ;;  %v2522_v13 = vmul.f32 1.442695, %v2509_v10  ;;  %v2524_v14 = vmul.f32 1.442695, %v2510_v11  ;;  %v3159_v11 = vld [vmem:[%s8758_s4 + $0x1c] sm:$0xf] }
 0x272   :  { %v2503_v15 = vpop.xlane.xlu1 %2502  ;;  %v2528_v16 = vsel %vm2479_vm3, %v7536_v12, 0.0 }
 0x273   :  { %7545 = vpow2.f32 %v2522_v13  ;;  %v2511_v17 = vsub.f32 %v2478_v51, %v2503_v15  ;;  %2529 = vadd.xlane.f32.xlu0 %v2528_v16 }
 0x274   :  { %7547 = vpow2.f32 %v2524_v14 }
 0x275   :  { %v7538_v18 = vpop.eup %7537  ;;  %v2526_v19 = vmul.f32 1.442695, %v2511_v17 }
 0x276   :  { %v7540_v20 = vpop.eup %7539  ;;  %v2531_v21 = vsel %vm2479_vm3, %v7538_v18, 0.0 }
 0x277   :  { %7549 = vpow2.f32 %v2526_v19  ;;  %2532 = vadd.xlane.f32.xlu1 %v2531_v21  ;;  %v2534_v22 = vsel %vm2479_vm3, %v7540_v20, 0.0  ;;  %v3784_v19 = vld [vmem:[%s8759_s6 + $0x8] sm:$0xff]  ;;  %v7737_v21 = vmov 0.0|0.0  }
 0x278   :  { %2535 = vadd.xlane.f32.xlu0 %v2534_v22  ;;  %v3785_v22 = vld [vmem:[%s8759_s6 + $0x10] sm:$0xff] }
 0x279   :  { %v7542_v23 = vpop.eup %7541 }
 0x27a   :  { %v7544_v24 = vpop.eup %7543  ;;  %v2537_v25 = vsel %vm2479_vm3, %v7542_v23, 0.0 }
 0x27b   :  { %2538 = vadd.xlane.f32.xlu1 %v2537_v25  ;;  %v2540_v26 = vsel %vm2479_vm3, %v7544_v24, 0.0 }
 0x27c   :  { %2541 = vadd.xlane.f32.xlu0 %v2540_v26 }
 0x27d   :  { %v7546_v27 = vpop.eup %7545 }
 0x27e   :  { %v7548_v28 = vpop.eup %7547  ;;  %v2543_v29 = vsel %vm2479_vm3, %v7546_v27, 0.0 }
 0x27f   :  { %2544 = vadd.xlane.f32.xlu1 %v2543_v29  ;;  %v2546_v30 = vsel %vm2479_vm3, %v7548_v28, 0.0 }
 0x280   :  { %2547 = vadd.xlane.f32.xlu0 %v2546_v30 }
 0x281   :  { %v7550_v31 = vpop.eup %7549 }
 0x282   :  { %v2549_v32 = vsel %vm2479_vm3, %v7550_v31, 0.0 }
 0x283   :  { %2550 = vadd.xlane.f32.xlu1 %v2549_v32 }
 0x300   :  { %v2530_v33 = vpop.xlane.xlu0 %2529 }
 0x301   :  { %7551 = vrcp.f32 %v2530_v33  ;;  %v3941_v33 = vld [vmem:[%s8760_s8] sm:$0xff] }
 0x304   :  { %v2533_v34 = vpop.xlane.xlu1 %2532 }
 0x305   :  { %7553 = vrcp.f32 %v2533_v34  ;;  %v2536_v35 = vpop.xlane.xlu0 %2535  ;;  %v3942_v34 = vld [vmem:[%s8760_s8 + $0x8] sm:$0xff] }
 0x306   :  { %7555 = vrcp.f32 %v2536_v35 }
 0x308   :  { %v2539_v36 = vpop.xlane.xlu1 %2538 }
 0x309   :  { %7557 = vrcp.f32 %v2539_v36  ;;  %v2542_v39 = vpop.xlane.xlu0 %2541  ;;  %v6580_v36 = vld [vmem:[%s8761_s5] ss:$0 sm:$0xff] }
 0x30a   :  { %7559 = vrcp.f32 %v2542_v39 }
 0x30b   :  { %v7552_v40 = vpop.eup %7551 }
 0x30c   :  { %v2560_v43 = vmul.f32 %v7552_v40, %v7536_v12  ;;  %v2545_v44 = vpop.xlane.xlu1 %2544 }
 0x30d   :  { %7561 = vrcp.f32 %v2545_v44  ;;  %v2548_v47 = vpop.xlane.xlu0 %2547 }
 0x30e   :  { %7563 = vrcp.f32 %v2548_v47  ;;  %7023 = vmatmul.mubr.msk.f32.vlgmr.msra.gmra.mrb[32].mxu0 %vm2479_vm3, %v2560_v43  ;;  %v7385_v47 = vpack.c.bf16 %v3942_v34, %v3941_v33 }
 0x30f   :  { %v7554_v48 = vpop.eup %7553  ;;  %7031 = vmatpush3.msra.mxu0 %v8091_v37  ;;  %7032 = vmatprep.mubr.msk.f32.mxu0 %vm7736_vm2, %v7735_v0 }
 0x310   :  { %v7556_v49 = vpop.eup %7555  ;;  %v2561_v50 = vmul.f32 %v7554_v48, %v7538_v18  ;;  %v2551_v51 = vpop.xlane.xlu1 %2550  ;;  %7040 = vmatprep.subr.mxu0 %v7735_v0  ;;  %v3783_v18 = vld [vmem:[%s8759_s6] sm:$0xff] }
 0x311   :  { %v2562_v52 = vmul.f32 %v7556_v49, %v7540_v20  ;;  %7565 = vrcp.f32 %v2551_v51  ;;  %v7379_v20 = vpack.c.bf16 %v3784_v19, %v3783_v18  ;;  %v3943_v49 = vld [vmem:[%s8760_s8 + $0x10] sm:$0xff] }
 0x312   :  { %7028 = vmatmul.mubr.msk.f32.vlgmr.msra.gmra.mrb[32].mxu1 %vm2479_vm3, %v2561_v50  ;;  %v3944_v50 = vld [vmem:[%s8760_s8 + $0x18] sm:$0xff] }
 0x313   :  { %v7558_v53 = vpop.eup %7557  ;;  %7033 = vmatmul.mubr.msk.f32.vlgmr.msra.gmra.mrb[34].mxu0 %vm2479_vm3, %v2562_v52  ;;  %7036 = vmatpush3.msra.mxu1 %v8093_v38 }
 0x314   :  { %v7560_v54 = vpop.eup %7559  ;;  %v2563_v55 = vmul.f32 %v7558_v53, %v7542_v23  ;;  %7041 = vmatpush3.msra.mxu0 %v8095_v41  ;;  %7037 = vmatprep.mubr.msk.f32.mxu1 %vm7736_vm2, %v7735_v0  ;;  %v3786_v23 = vld [vmem:[%s8759_s6 + $0x18] sm:$0xff] }
 0x315   :  { %v2564_v37 = vmul.f32 %v7560_v54, %v7544_v24  ;;  %7042 = vmatprep.mubr.msk.f32.mxu0 %vm7736_vm2, %v7735_v0  ;;  %7045 = vmatprep.subr.mxu1 %v7735_v0  ;;  %v7382_v24 = vpack.c.bf16 %v3786_v23, %v3785_v22 }
 0x316   :  { %7050 = vmatprep.subr.mxu0 %v7735_v0  ;;  %7038 = vmatmul.mubr.msk.f32.vlgmr.msra.gmra.mrb[34].mxu1 %vm2479_vm3, %v2563_v55 }
 0x317   :  { %v7562_v56 = vpop.eup %7561  ;;  %7043 = vmatmul.mubr.msk.f32.vlgmr.msra.gmra.mrb[36].mxu0 %vm2479_vm3, %v2564_v37  ;;  %7046 = vmatpush3.msra.mxu1 %v8097_v42  ;;  %v7388_v37 = vpack.c.bf16 %v3944_v50, %v3943_v49 }
 0x318   :  { %v7564_v38 = vpop.eup %7563  ;;  %v2565_v41 = vmul.f32 %v7562_v56, %v7546_v27  ;;  %7051 = vmatpush3.msra.mxu0 %v8099_v45  ;;  %7047 = vmatprep.mubr.msk.f32.mxu1 %vm7736_vm2, %v7735_v0  ;;  %v3152_v45 = vld [vmem:[%s8758_s4] sm:$0xf] }
 0x319   :  { %v2566_v57 = vmul.f32 %v7564_v38, %v7548_v28  ;;  %7052 = vmatprep.mubr.msk.f32.mxu0 %vm7736_vm2, %v7735_v0  ;;  %7055 = vmatprep.subr.mxu1 %v7735_v0 }
 0x31a   :  { %7048 = vmatmul.mubr.msk.f32.vlgmr.msra.gmra.mrb[36].mxu1 %vm2479_vm3, %v2565_v41  ;;  %7060 = vmatprep.subr.mxu0 %v7735_v0 }
 0x31b   :  { %v7566_v58 = vpop.eup %7565  ;;  %7053 = vmatmul.mubr.msk.f32.vlgmr.msra.gmra.mrb[38].mxu0 %vm2479_vm3, %v2566_v57  ;;  %7056 = vmatpush3.msra.mxu1 %v8101_v46  ;;  %v3153_v46 = vld [vmem:[%s8758_s4 + $0x4] sm:$0xf] }
 0x31c   :  { %v2567_v42 = vmul.f32 %v7566_v58, %v7550_v31  ;;  %7057 = vmatprep.mubr.msk.f32.mxu1 %vm7736_vm2, %v7735_v0  ;;  %7062 = vmatprep.mubr.msk.f32.mxu0 %vm7736_vm2, %v7735_v0 }
 0x31d   :  { %7065 = vmatprep.subr.mxu1 %v7735_v0  ;;  %7061 = vmatpush3.msk.msra.mxu0 %vm73_vm0, %v3152_v45  ;;  %v3946_v45 = vld [vmem:[%s8760_s8 + $0x28] sm:$0xff] }
 0x31e   :  { %7058 = vmatmul.mubr.msk.f32.vlgmr.msra.gmra.mrb[38].mxu1 %vm2479_vm3, %v2567_v42  ;;  %7070 = vmatprep.subr.mxu0 %v7735_v0  ;;  %v3945_v42 = vld [vmem:[%s8760_s8 + $0x20] sm:$0xff] }
 0x31f   :  { %7067 = vmatprep.mubr.msk.f32.mxu1 %vm7736_vm2, %v7735_v0  ;;  %7066 = vmatpush3.msk.msra.mxu1 %vm73_vm0, %v3153_v46  ;;  %v7391_v46 = vpack.c.bf16 %v3946_v45, %v3945_v42 }
 0x320   :  { %7075 = vmatprep.subr.mxu1 %v7735_v0 }
 0x3e1   :  { %v2637_v60 = vpop.f32.mrb[32].mxu0 }
 0x3e2   :  { %v7024_v61 = vpop.f32.mrb[33].mxu0  ;;  %7063 = vmatmul.mubr.msk.f32.vlgmr.msra.gmra.mrb[40].mxu0 %vm69_vm1, %v2637_v60  ;;  %v3948_v60 = vld [vmem:[%s8760_s8 + $0x38] sm:$0xff] }
 0x3e3   :  { %7071 = vmatpush3.msk.msra.mxu0 %vm73_vm0, %v3154_v59  ;;  %7072 = vmatprep.mubr.msk.f32.mxu0 %vm7736_vm2, %v7735_v0  ;;  %v3947_v59 = vld [vmem:[%s8760_s8 + $0x30] sm:$0xff] }
 0x3e4   :  { %7080 = vmatprep.subr.mxu0 %v7735_v0  ;;  %v7394_v61 = vpack.c.bf16 %v3948_v60, %v3947_v59 }
 0x3e5   :  { %v2710_v63 = vpop.f32.mrb[32].mxu1 }
 0x3e6   :  { %v2783_v2 = vpop.f32.mrb[34].mxu0  ;;  %v7029_v3 = vpop.f32.mrb[33].mxu1  ;;  %7068 = vmatmul.mubr.msk.f32.vlgmr.msra.gmra.mrb[40].mxu1 %vm69_vm1, %v2710_v63  ;;  %v4104_v63 = vld [vmem:[%s8762_s9 + $0x8] sm:$0xff] }
 0x3e7   :  { %v7034_v4 = vpop.f32.mrb[35].mxu0  ;;  %7073 = vmatmul.mubr.msk.f32.vlgmr.msra.gmra.mrb[42].mxu0 %vm69_vm1, %v2783_v2  ;;  %7076 = vmatpush3.msk.msra.mxu1 %vm73_vm0, %v3155_v62  ;;  %v4103_v62 = vld [vmem:[%s8762_s9] sm:$0xff] }
 0x3e8   :  { %7077 = vmatprep.mubr.msk.f32.mxu1 %vm7736_vm2, %v7735_v0  ;;  %7081 = vmatpush3.msk.msra.mxu0 %vm73_vm0, %v3156_v1  ;;  %v6581_v1 = vld [vmem:[%s8763_s7] ss:$0 sm:$0xff]  ;;  %v8323_v3 = vpack.c.bf16 %v4104_v63, %v4103_v62 }
 0x3e9   :  { %v2856_v6 = vpop.f32.mrb[34].mxu1  ;;  %7082 = vmatprep.mubr.msk.f32.mxu0 %vm7736_vm2, %v7735_v0  ;;  %7085 = vmatprep.subr.mxu1 %v7735_v0 }
 0x3ea   :  { %v2929_v8 = vpop.f32.mrb[36].mxu0  ;;  %v7039_v9 = vpop.f32.mrb[35].mxu1  ;;  %7078 = vmatmul.mubr.msk.f32.vlgmr.msra.gmra.mrb[42].mxu1 %vm69_vm1, %v2856_v6  ;;  %7090 = vmatprep.subr.mxu0 %v7735_v0  ;;  %v4105_v6 = vld [vmem:[%s8762_s9 + $0x10] sm:$0xff] }
 0x3eb   :  { %v7044_v10 = vpop.f32.mrb[37].mxu0  ;;  %7083 = vmatmul.mubr.msk.f32.vlgmr.msra.gmra.mrb[44].mxu0 %vm69_vm1, %v2929_v8  ;;  %7086 = vmatpush3.msk.msra.mxu1 %vm73_vm0, %v3157_v5 }
 0x3ec   :  { %7087 = vmatprep.mubr.msk.f32.mxu1 %vm7736_vm2, %v7735_v0  ;;  %7091 = vmatpush3.msk.msra.mxu0 %vm73_vm0, %v3158_v7  ;;  %v4106_v7 = vld [vmem:[%s8762_s9 + $0x18] sm:$0xff] }
 0x3ed   :  { %v3002_v12 = vpop.f32.mrb[36].mxu1  ;;  %7092 = vmatprep.mubr.msk.f32.mxu0 %vm7736_vm2, %v7735_v0  ;;  %7095 = vmatprep.subr.mxu1 %v7735_v0  ;;  %v8333_v8 = vpack.c.bf16 %v4106_v7, %v4105_v6  ;;  %v8433_v7 = vld [vmem:[%s8767_s13] ss:$0 sm:$0xff] }
 0x3ee   :  { %v3075_v13 = vpop.f32.mrb[38].mxu0  ;;  %v7049_v14 = vpop.f32.mrb[37].mxu1  ;;  %7088 = vmatmul.mubr.msk.f32.vlgmr.msra.gmra.mrb[44].mxu1 %vm69_vm1, %v3002_v12  ;;  %7378 = vmatprep.subr.bf16.mxu0 %v7737_v21 }
 0x3ef   :  { %v7054_v15 = vpop.f32.mrb[39].mxu0  ;;  %7093 = vmatmul.mubr.msk.f32.vlgmr.msra.gmra.mrb[46].mxu0 %vm69_vm1, %v3075_v13  ;;  %7096 = vmatpush3.msk.msra.mxu1 %vm73_vm0, %v3159_v11  ;;  %v6584_v14 = vld [vmem:[%s8764_s10] ss:$0 sm:$0xff]  ;;  %s7739_s10 = smov 32  }
 0x3f0   :  { %7097 = vmatprep.mubr.msk.f32.mxu1 %vm7736_vm2, %v7735_v0  ;;  %7104 = vmatprep.mubr.msk.f32.mxu0 %vm7736_vm2, %v7735_v0 }
 0x3f1   :  { %v3148_v16 = vpop.f32.mrb[38].mxu1  ;;  %7381 = vmatprep.subr.bf16.mxu1 %v7737_v21  ;;  %7380 = vmatpush3.bf16.msra.mxu0 %v7379_v20 }
 0x3f2   :  { %v7059_v17 = vpop.f32.mrb[39].mxu1  ;;  %7098 = vmatmul.mubr.msk.f32.vlgmr.msra.gmra.mrb[46].mxu1 %vm69_vm1, %v3148_v16  ;;  %7384 = vmatprep.subr.bf16.mxu0 %v7737_v21 }
 0x3f3   :  { %7111 = vmatprep.mubr.msk.f32.mxu1 %vm7736_vm2, %v7735_v0  ;;  %7383 = vmatpush3.bf16.msra.mxu1 %v7382_v24 }
 0x3f4   :  { %7390 = vmatprep.subr.bf16.mxu1 %v7737_v21 }
 0x4b5   :  { %v3232_v25 = vpop.f32.mrb[40].mxu0 }
 0x4b6   :  { %v7064_v26 = vpop.f32.mrb[41].mxu0 }
 0x4b9   :  { %v3308_v27 = vpop.f32.mrb[40].mxu1 }
 0x4ba   :  { %v3768_v28 = vadd.f32 %v3308_v27, %v3232_v25  ;;  %v3384_v29 = vpop.f32.mrb[42].mxu0  ;;  %v7069_v30 = vpop.f32.mrb[41].mxu1 }
 0x4bb   :  { %v7074_v31 = vpop.f32.mrb[43].mxu0 }
 0x4bc   :  { %v3770_v32 = vadd.f32 %v3768_v28, %v3384_v29 }
 0x4bd   :  { %v3460_v35 = vpop.f32.mrb[42].mxu1 }
 0x4be   :  { %v3772_v39 = vadd.f32 %v3770_v32, %v3460_v35  ;;  %v3536_v40 = vpop.f32.mrb[44].mxu0  ;;  %v7079_v43 = vpop.f32.mrb[43].mxu1 }
 0x4bf   :  { %v7084_v44 = vpop.f32.mrb[45].mxu0 }
 0x4c0   :  { %v3781_v48 = vadd.f32 %v6580_v36, %v3772_v39 }
 0x4c1   :  { %v3612_v51 = vpop.f32.mrb[44].mxu1 }
 0x4c2   :  { %v3769_v52 = vadd.f32 %v3612_v51, %v3536_v40  ;;  %v3688_v53 = vpop.f32.mrb[46].mxu0  ;;  %v7089_v54 = vpop.f32.mrb[45].mxu1  ;;  %7105 = vmatmul.mubr.msk.f32.vlgmr.msra.gmra.mrb[48].mxu0 %vm3794_vm4, %v3781_v48  ;;  %v4238_v51 = vld [vmem:[%s8765_s12] sm:$0xff] }
 0x4c3   :  { %v7094_v55 = vpop.f32.mrb[47].mxu0  ;;  %7386 = vmatpush3.bf16.msra.mxu0 %v7385_v47  ;;  %7122 = vmatprep.mubr.msk.f32.mxu0 %vm7736_vm2, %v7735_v0 }
 0x4c4   :  { %v3771_v56 = vadd.f32 %v3769_v52, %v3688_v53  ;;  %7387 = vmatprep.subr.bf16.mxu0 %v7737_v21  ;;  %v4239_v52 = vld [vmem:[%s8765_s12 + $0x8] sm:$0xff]  ;;  %v4240_v53 = vld [vmem:[%s8765_s12 + $0x10] sm:$0xff]  ;;  %v4241_v55 = vld [vmem:[%s8765_s12 + $0x18] sm:$0xff] }
 0x4c5   :  { %v3764_v38 = vpop.f32.mrb[46].mxu1  ;;  %v8374_v54 = vpack.c.bf16 %v4239_v52, %v4238_v51 }
 0x4c6   :  { %v3773_v41 = vadd.f32 %v3771_v56, %v3764_v38  ;;  %v7099_v57 = vpop.f32.mrb[47].mxu1  ;;  %v4235_v56 = vld [vmem:[%s8766_s11 + $0x8] sm:$0xff] }
 0x4c7   :  { %7389 = vmatpush3.bf16.msra.mxu0 %v7388_v37  ;;  %v4234_v37 = vld [vmem:[%s8766_s11] sm:$0xff]  ;;  %v4237_v57 = vld [vmem:[%s8766_s11 + $0x18] sm:$0xff] }
 0x4c8   :  { %v3782_v58 = vadd.f32 %v6580_v36, %v3773_v41  ;;  %7396 = vmatprep.subr.bf16.mxu0 %v7737_v21  ;;  %v8385_v38 = vpack.c.bf16 %v4235_v56, %v4234_v37  ;;  %v4236_v41 = vld [vmem:[%s8766_s11 + $0x10] sm:$0xff] }
 0x4c9   :  { %v8398_v45 = vpack.c.bf16 %v4237_v57, %v4236_v41 }
 0x4ca   :  { %7112 = vmatmul.mubr.msk.f32.vlgmr.msra.gmra.mrb[48].mxu1 %vm3794_vm4, %v3782_v58  ;;  %v8394_v58 = vpack.c.bf16 %v4241_v55, %v4240_v53 }
 0x4cb   :  { %7133 = vmatprep.mubr.msk.f32.mxu1 %vm7736_vm2, %v7735_v0  ;;  %7392 = vmatpush3.bf16.msra.mxu1 %v7391_v46 }
 0x4cc   :  { %7393 = vmatprep.subr.bf16.mxu1 %v7737_v21 }
 0x4cf   :  { %7395 = vmatpush3.bf16.msra.mxu1 %v7394_v61 }
 0x4d0   :  { %7402 = vmatprep.subr.bf16.mxu1 %v7737_v21 }
 0x595   :  { %v3864_v2 = vpop.f32.mrb[48].mxu0 }
 0x596   :  { %v3865_v4 = vadd.f32 %v6581_v1, %v3864_v2  ;;  %v7106_v5 = vpop.f32.mrb[49].mxu0 }
 0x598   :  { %7123 = vmatmul.mubr.msk.f32.vlgmr.msra.gmra.mrb[50].mxu0 %vm3956_vm5, %v3865_v4 }
 0x599   :  { %7398 = vmatpush3.bf16.msra.mxu0 %v8323_v3  ;;  %7144 = vmatprep.mubr.msk.f32.mxu0 %vm7736_vm2, %v7735_v0 }
 0x59a   :  { %7399 = vmatprep.subr.bf16.mxu0 %v7737_v21 }
 0x59d   :  { %7401 = vmatpush3.bf16.msra.mxu0 %v8333_v8  ;;  %v3937_v9 = vpop.f32.mrb[48].mxu1 }
 0x59e   :  { %v3938_v10 = vadd.f32 %v6581_v1, %v3937_v9  ;;  %v7113_v11 = vpop.f32.mrb[49].mxu1  ;;  %7408 = vmatprep.subr.bf16.mxu0 %v7737_v21 }
 0x5a0   :  { %7145 = vmatmul.mubr.f32.vlgmr.msra.gmra.mrb[52].mxu0 %v7735_v0  ;;  %7134 = vmatmul.mubr.msk.f32.vlgmr.msra.gmra.mrb[50].mxu1 %vm3956_vm5, %v3938_v10 }
 0x5a1   :  { %7155 = vmatprep.mubr.msk.f32.mxu1 %vm7736_vm2, %v7735_v0  ;;  %7166 = vmatprep.mubr.msk.f32.mxu0 %vm7736_vm2, %v7735_v0 }
 0x5a2   :  { %7404 = vmatpush3.bf16.msra.mxu1 %v8374_v54  ;;  %7410 = vmatpush3.bf16.msra.mxu0 %v8385_v38 }
 0x5a3   :  { %7405 = vmatprep.subr.bf16.mxu1 %v7737_v21  ;;  %7411 = vmatprep.subr.bf16.mxu0 %v7737_v21 }
 0x5a6   :  { %7407 = vmatpush3.bf16.msra.mxu1 %v8394_v58  ;;  %7413 = vmatpush3.bf16.msra.mxu0 %v8398_v45 }
 0x5a7   :  { %7414 = vmatprep.subr.bf16.mxu1 %v7737_v21  ;;  %7420 = vmatprep.subr.bf16.mxu0 %v7737_v21 }
 0x5a9   :  { %7156 = vmatmul.mubr.f32.vlgmr.msra.gmra.mrb[52].mxu1 %v7735_v0 }
 0x5aa   :  { %7416 = vmatpush3.bf16.msra.mxu1 %v8323_v3  ;;  %7177 = vmatprep.mubr.msk.f32.mxu1 %vm7736_vm2, %v7735_v0 }
 0x5ab   :  { %7417 = vmatprep.subr.bf16.mxu1 %v7737_v21 }
 0x5ae   :  { %7419 = vmatpush3.bf16.msra.mxu1 %v8333_v8 }
 0x5af   :  { %7426 = vmatprep.subr.bf16.mxu1 %v7737_v21 }
 0x66b   :  { %v4026_v12 = vpop.f32.mrb[50].mxu0 }
 0x66c   :  { %v7124_v13 = vpop.f32.mrb[51].mxu0  ;;  %v8349_v15 = vadd.f32 %v6584_v14, %v4026_v12 }
 0x673   :  { %v4176_v16 = vpop.f32.mrb[52].mxu0  ;;  %v4099_v17 = vpop.f32.mrb[50].mxu1 }
 0x674   :  { %v4181_v18 = vrot.slane %v4176_v16, 1  ;;  %v4184_v19 = vadd.f32 %v4176_v16, %v8349_v15  ;;  %v8352_v20 = vadd.f32 %v6584_v14, %v4099_v17  ;;  %v7135_v22 = vpop.f32.mrb[51].mxu1  ;;  %v7146_v23 = vpop.f32.mrb[53].mxu0 }
 0x676   :  { %7567 = vtanh.f32 %v4184_v19  ;;  %v4185_v24 = vadd.f32 %v4181_v18, %v8352_v20  ;;  %v6587_v28 = vmul.f32 -1.442695, %v4184_v19 }
 0x678   :  { %7569 = vtanh.f32 %v4185_v24  ;;  %v6588_v27 = vmul.f32 -1.442695, %v4185_v24 }
 0x67a   :  { %7571 = vpow2.f32 %v6588_v27 }
 0x67b   :  { %7573 = vpow2.f32 %v6587_v28 }
 0x67c   :  { %v4308_v2 = vpop.f32.mrb[52].mxu1 }
 0x67d   :  { %v7157_v4 = vpop.f32.mrb[53].mxu1 }
 0x680   :  { %v7568_v25 = vpop.eup %7567 }
 0x681   :  { %4204 = vrot.lane.b32.xlu1 %v7568_v25, %s7738_s1 }
 0x682   :  { %v7570_v26 = vpop.eup %7569 }
 0x683   :  { %4206 = vrot.lane.b32.xlu0 %v7570_v26, %s7738_s1 }
 0x684   :  { %v7572_v29 = vpop.eup %7571 }
 0x685   :  { %v4193_v30 = vadd.f32 1.0, %v7572_v29  ;;  %v7574_v31 = vpop.eup %7573 }
 0x686   :  { %v4192_v32 = vadd.f32 1.0, %v7574_v31 }
 0x687   :  { %7575 = vrcp.f32 %v4193_v30 }
 0x688   :  { %7577 = vrcp.f32 %v4192_v32 }
 0x691   :  { %v7576_v33 = vpop.eup %7575 }
 0x692   :  { %v7578_v39 = vpop.eup %7577  ;;  %v4201_v43 = vmul.f32 0.0, %v7576_v33 }
 0x693   :  { %v4200_v48 = vmul.f32 0.0, %v7578_v39 }
 0x6f3   :  { %v4205_v36 = vpop.permute.xlu1 %4204 }
 0x6f4   :  { %v4210_v40 = vmul.f32 %v7578_v39, %v4205_v36 }
 0x6f5   :  { %v4207_v34 = vpop.permute.xlu0 %4206 }
 0x6f6   :  { %v4211_v35 = vmul.f32 %v7576_v33, %v4207_v34 }
 0x6f8   :  { %4216 = vrot.lane.b32.xlu1 %v4211_v35, %s7739_s10 }
 0x6fc   :  { %4214 = vrot.lane.b32.xlu1 %v4210_v40, %s7739_s10 }
 0x76a   :  { %v4217_v44 = vpop.permute.xlu1 %4216 }
 0x76b   :  { %v8359_v47 = vadd.f32 %v4217_v44, %v4201_v43 }
 0x76d   :  { %7579 = vtanh.f32 %v8359_v47  ;;  %v4522_v51 = vrot.slane %v8359_v47, 7 }
 0x76e   :  { %v4215_v49 = vpop.permute.xlu1 %4214 }
 0x76f   :  { %v8362_v50 = vadd.f32 %v4215_v49, %v4200_v48 }
 0x771   :  { %7581 = vtanh.f32 %v8362_v50  ;;  %v4521_v52 = vrot.slane %v8362_v50, 7 }
 0x777   :  { %v7580_v42 = vpop.eup %7579 }
 0x778   :  { %4228 = vrot.lane.b32.xlu0 %v7580_v42, %s7738_s1 }
 0x77b   :  { %v7582_v46 = vpop.eup %7581 }
 0x77c   :  { %4226 = vrot.lane.b32.xlu1 %v7582_v46, %s7738_s1 }
 0x7ea   :  { %v4229_v59 = vpop.permute.xlu0 %4228 }
 0x7eb   :  { %v4233_v60 = vmul.f32 %v7576_v33, %v4229_v59 }
 0x7ed   :  { %v4314_v62 = vrot.slane %v4233_v60, 7 }
 0x7ee   :  { %v4227_v61 = vpop.permute.xlu1 %4226 }
 0x7ef   :  { %v4232_v63 = vmul.f32 %v7578_v39, %v4227_v61 }
 0x7f1   :  { %v4316_v1 = vsel %vm4315_vm6, %v4314_v62, %v4232_v63 }
 0x7f2   :  { %4317 = vrot.lane.b32.xlu0 %v4316_v1, %s7739_s10 }
 0x864   :  { %v4318_v5 = vpop.permute.xlu0 %4317 }
 0x865   :  { %7167 = vmatmul.mubr.msk.f32.vlgmr.msra.gmra.mrb[54].mxu0 %vm3956_vm5, %v4318_v5  ;;  %7178 = vmatmul.mubr.msk.f32.vlgmr.msra.gmra.mrb[54].mxu1 %vm3956_vm5, %v4318_v5 }
 0x866   :  { %7422 = vmatpush3.bf16.msra.mxu0 %v8374_v54  ;;  %7428 = vmatpush3.bf16.msra.mxu1 %v8385_v38 }
 0x867   :  { %7423 = vmatprep.subr.bf16.mxu0 %v7737_v21  ;;  %7188 = vmatprep.mubr.msk.f32.mxu0 %vm7736_vm2, %v7735_v0 }
 0x868   :  { %7429 = vmatprep.subr.bf16.mxu1 %v7737_v21  ;;  %7199 = vmatprep.mubr.msk.f32.mxu1 %vm7736_vm2, %v7735_v0 }
 0x86a   :  { %7425 = vmatpush3.bf16.msra.mxu0 %v8394_v58  ;;  %7431 = vmatpush3.bf16.msra.mxu1 %v8398_v45 }
 0x86b   :  { %7432 = vmatprep.subr.bf16.mxu0 %v7737_v21  ;;  %7438 = vmatprep.subr.bf16.mxu1 %v7737_v21 }
 0x938   :  { %v4387_v6 = vpop.f32.mrb[54].mxu0  ;;  %v4495_v9 = vpop.f32.mrb[54].mxu1 }
 0x939   :  { %v4388_v10 = vadd.f32 %v4387_v6, %v4308_v2  ;;  %v4500_v11 = vrot.slane %v4495_v9, 7  ;;  %v7168_v12 = vpop.f32.mrb[55].mxu0  ;;  %v7179_v13 = vpop.f32.mrb[55].mxu1  ;;  %v4504_v16 = vadd.f32 %v4495_v9, %v8352_v20 }
 0x93b   :  { %v4398_v14 = vadd.f32 %v8433_v7, %v4388_v10  ;;  %v4503_v17 = vadd.f32 %v4500_v11, %v8349_v15  ;;  %v6594_v24 = vmul.f32 -1.442695, %v4504_v16 }
 0x93d   :  { %7583 = vtanh.f32 %v4398_v14  ;;  %v6591_v23 = vmul.f32 -1.442695, %v4398_v14  ;;  %v6593_v25 = vmul.f32 -1.442695, %v4503_v17 }
 0x93e   :  { %7585 = vtanh.f32 %v4504_v16 }
 0x93f   :  { %7587 = vtanh.f32 %v4503_v17 }
 0x940   :  { %7589 = vpow2.f32 %v6591_v23 }
 0x941   :  { %7591 = vpow2.f32 %v6594_v24 }
 0x942   :  { %7593 = vpow2.f32 %v6593_v25 }
 0x947   :  { %v7584_v18 = vpop.eup %7583 }
 0x948   :  { %4408 = vrot.lane.b32.xlu1 %v7584_v18, %s7738_s1  ;;  %v7586_v19 = vpop.eup %7585 }
 0x949   :  { %v7588_v22 = vpop.eup %7587 }
 0x94a   :  { %4529 = vrot.lane.b32.xlu0 %v7588_v22, %s7738_s1  ;;  %v7590_v26 = vpop.eup %7589 }
 0x94b   :  { %v7592_v27 = vpop.eup %7591  ;;  %v4402_v28 = vadd.f32 1.0, %v7590_v26 }
 0x94c   :  { %4531 = vrot.lane.b32.xlu1 %v7586_v19, %s7738_s1  ;;  %v7594_v29 = vpop.eup %7593  ;;  %v4512_v30 = vadd.f32 1.0, %v7592_v27 }
 0x94d   :  { %7595 = vrcp.f32 %v4402_v28  ;;  %v4511_v31 = vadd.f32 1.0, %v7594_v29 }
 0x94e   :  { %7597 = vrcp.f32 %v4512_v30 }
 0x94f   :  { %7599 = vrcp.f32 %v4511_v31 }
 0x957   :  { %v7596_v32 = vpop.eup %7595 }
 0x958   :  { %v7598_v35 = vpop.eup %7597  ;;  %v4406_v48 = vmul.f32 0.0, %v7596_v32 }
 0x959   :  { %v7600_v36 = vpop.eup %7599  ;;  %v4526_v37 = vmul.f32 %v7598_v35, %v4522_v51 }
 0x95a   :  { %v4525_v55 = vmul.f32 %v7600_v36, %v4521_v52 }
 0x9ba   :  { %v4409_v33 = vpop.permute.xlu1 %4408 }
 0x9bb   :  { %v4411_v34 = vmul.f32 %v7596_v32, %v4409_v33 }
 0x9bc   :  { %v4530_v39 = vpop.permute.xlu0 %4529 }
 0x9bd   :  { %4413 = vrot.lane.b32.xlu0 %v4411_v34, %s7739_s10  ;;  %v4535_v43 = vmul.f32 %v7600_v36, %v4530_v39 }
 0x9be   :  { %v4532_v40 = vpop.permute.xlu1 %4531 }
 0x9bf   :  { %v4536_v44 = vmul.f32 %v7598_v35, %v4532_v40  ;;  %4539 = vrot.lane.b32.xlu1 %v4535_v43, %s7739_s10 }
 0x9c1   :  { %4541 = vrot.lane.b32.xlu0 %v4536_v44, %s7739_s10 }
 0xa2f   :  { %v4414_v49 = vpop.permute.xlu0 %4413 }
 0xa30   :  { %v8446_v53 = vadd.f32 %v4414_v49, %v4406_v48 }
 0xa31   :  { %v4540_v56 = vpop.permute.xlu1 %4539 }
 0xa32   :  { %7601 = vtanh.f32 %v8446_v53  ;;  %v8449_v57 = vadd.f32 %v4540_v56, %v4525_v55 }
 0xa33   :  { %v4542_v41 = vpop.permute.xlu0 %4541 }
 0xa34   :  { %v8451_v42 = vadd.f32 %v4542_v41, %v4526_v37  ;;  %7603 = vtanh.f32 %v8449_v57  ;;  %v4847_v55 = vrot.slane %v8449_v57, 7 }
 0xa36   :  { %7605 = vtanh.f32 %v8451_v42 }
 0xa3c   :  { %v7602_v46 = vpop.eup %7601 }
 0xa3d   :  { %4419 = vrot.lane.b32.xlu1 %v7602_v46, %s7738_s1 }
 0xa3e   :  { %v7604_v47 = vpop.eup %7603 }
 0xa3f   :  { %4551 = vrot.lane.b32.xlu0 %v7604_v47, %s7738_s1 }
 0xa40   :  { %v7606_v50 = vpop.eup %7605 }
 0xa41   :  { %4553 = vrot.lane.b32.xlu1 %v7606_v50, %s7738_s1  ;;  %v4848_v50 = vrot.slane %v8451_v42, 7 }
 0xaaf   :  { %v4420_v59 = vpop.permute.xlu1 %4419 }
 0xab0   :  { %v4422_v60 = vmul.f32 %v7596_v32, %v4420_v59 }
 0xab1   :  { %v4552_v61 = vpop.permute.xlu0 %4551 }
 0xab2   :  { %4424 = vrot.lane.b32.xlu0 %v4422_v60, %s7739_s10  ;;  %v4557_v62 = vmul.f32 %v7600_v36, %v4552_v61 }
 0xab3   :  { %v4554_v63 = vpop.permute.xlu1 %4553 }
 0xab4   :  { %v4558_v1 = vmul.f32 %v7598_v35, %v4554_v63  ;;  %v4641_v2 = vrot.slane %v4557_v62, 1 }
 0xab6   :  { %v4642_v4 = vsel %vm4315_vm6, %v4558_v1, %v4641_v2 }
 0xab7   :  { %4643 = vrot.lane.b32.xlu1 %v4642_v4, %s7739_s10 }
 0xb24   :  { %v4425_v5 = vpop.permute.xlu0 %4424 }
 0xb25   :  { %4428 = vst.msk [vmem:[#allocation2] sm:$0x3] %vm4427_vm7, %v4425_v5  ;;  %7189 = vmatmul.mubr.msk.f32.vlgmr.msra.gmra.mrb[56].mxu0 %vm3956_vm5, %v4425_v5 }
 0xb26   :  { %7434 = vmatpush3.bf16.msra.mxu0 %v8323_v3  ;;  %7210 = vmatprep.mubr.msk.f32.mxu0 %vm7736_vm2, %v7735_v0 }
 0xb27   :  { %7435 = vmatprep.subr.bf16.mxu0 %v7737_v21 }
 0xb29   :  { %v4644_v6 = vpop.permute.xlu1 %4643 }
 0xb2a   :  { %7437 = vmatpush3.bf16.msra.mxu0 %v8333_v8  ;;  %7200 = vmatmul.mubr.msk.f32.vlgmr.msra.gmra.mrb[56].mxu1 %vm3956_vm5, %v4644_v6 }
 0xb2b   :  { %7444 = vmatprep.subr.bf16.mxu0 %v7737_v21  ;;  %7440 = vmatpush3.bf16.msra.mxu1 %v8374_v54 }
 0xb2c   :  { %7441 = vmatprep.subr.bf16.mxu1 %v7737_v21  ;;  %7221 = vmatprep.mubr.msk.f32.mxu1 %vm7736_vm2, %v7735_v0 }
 0xb2d   :  { %7211 = vmatmul.mubr.msk.f32.vlgmr.msra.gmra.mrb[58].mxu0 %vm3956_vm5, %v4644_v6 }
 0xb2e   :  { %7446 = vmatpush3.bf16.msra.mxu0 %v8385_v38  ;;  %7232 = vmatprep.mubr.msk.f32.mxu0 %vm7736_vm2, %v7735_v0 }
 0xb2f   :  { %7447 = vmatprep.subr.bf16.mxu0 %v7737_v21  ;;  %7443 = vmatpush3.bf16.msra.mxu1 %v8394_v58 }
 0xb30   :  { %7450 = vmatprep.subr.bf16.mxu1 %v7737_v21 }
 0xb32   :  { %7449 = vmatpush3.bf16.msra.mxu0 %v8398_v45 }
 0xb33   :  { %7456 = vmatprep.subr.bf16.mxu0 %v7737_v21 }
 0xbf8   :  { %v4635_v9 = vpop.f32.mrb[56].mxu0 }
 0xbf9   :  { %v7190_v10 = vpop.f32.mrb[57].mxu0 }
 0xbfd   :  { %v4713_v11 = vpop.f32.mrb[56].mxu1 }
 0xbfe   :  { %v4714_v12 = vadd.f32 %v4713_v11, %v4635_v9  ;;  %v7201_v13 = vpop.f32.mrb[57].mxu1 }
 0xc00   :  { %v4820_v14 = vpop.f32.mrb[58].mxu0  ;;  %v4724_v19 = vadd.f32 %v8433_v7, %v4714_v12 }
 0xc01   :  { %v4825_v16 = vrot.slane %v4820_v14, 6  ;;  %v4826_v17 = vrot.slane %v4820_v14, 7  ;;  %v7212_v18 = vpop.f32.mrb[59].mxu0 }
 0xc02   :  { %7607 = vtanh.f32 %v4724_v19  ;;  %v6598_v27 = vmul.f32 -1.442695, %v4724_v19 }
 0xc03   :  { %v4829_v22 = vadd.f32 %v4825_v16, %v8349_v15  ;;  %v4830_v23 = vadd.f32 %v4826_v17, %v8352_v20 }
 0xc05   :  { %7609 = vtanh.f32 %v4829_v22  ;;  %v6600_v28 = vmul.f32 -1.442695, %v4829_v22  ;;  %v6601_v29 = vmul.f32 -1.442695, %v4830_v23 }
 0xc06   :  { %7611 = vtanh.f32 %v4830_v23 }
 0xc07   :  { %7613 = vpow2.f32 %v6598_v27 }
 0xc08   :  { %7615 = vpow2.f32 %v6600_v28 }
 0xc09   :  { %7617 = vpow2.f32 %v6601_v29 }
 0xc0c   :  { %v7608_v24 = vpop.eup %7607 }
 0xc0d   :  { %4734 = vrot.lane.b32.xlu0 %v7608_v24, %s7738_s1 }
 0xc0f   :  { %v7610_v25 = vpop.eup %7609 }
 0xc10   :  { %4855 = vrot.lane.b32.xlu1 %v7610_v25, %s7738_s1  ;;  %v7612_v26 = vpop.eup %7611 }
 0xc11   :  { %4857 = vrot.lane.b32.xlu0 %v7612_v26, %s7738_s1  ;;  %v7614_v30 = vpop.eup %7613 }
 0xc12   :  { %v7616_v31 = vpop.eup %7615  ;;  %v4728_v32 = vadd.f32 1.0, %v7614_v30 }
 0xc13   :  { %v4837_v33 = vadd.f32 1.0, %v7616_v31  ;;  %v7618_v34 = vpop.eup %7617 }
 0xc14   :  { %7619 = vrcp.f32 %v4728_v32  ;;  %v4838_v35 = vadd.f32 1.0, %v7618_v34 }
 0xc15   :  { %7621 = vrcp.f32 %v4837_v33 }
 0xc16   :  { %7623 = vrcp.f32 %v4838_v35 }
 0xc1e   :  { %v7620_v36 = vpop.eup %7619 }
 0xc1f   :  { %v7622_v40 = vpop.eup %7621  ;;  %v4732_v37 = vmul.f32 %v7620_v36, %v8446_v53 }
 0xc20   :  { %v7624_v49 = vpop.eup %7623  ;;  %v4851_v41 = vmul.f32 %v7622_v40, %v4847_v55 }
 0xc21   :  { %v4852_v60 = vmul.f32 %v7624_v49, %v4848_v50 }
 0xc7f   :  { %v4735_v39 = vpop.permute.xlu0 %4734 }
 0xc80   :  { %v4737_v43 = vmul.f32 %v7620_v36, %v4735_v39 }
 0xc82   :  { %v4856_v44 = vpop.permute.xlu1 %4855  ;;  %4739 = vrot.lane.b32.xlu1 %v4737_v43, %s7739_s10 }
 0xc83   :  { %v4861_v48 = vmul.f32 %v7622_v40, %v4856_v44  ;;  %v4858_v51 = vpop.permute.xlu0 %4857 }
 0xc84   :  { %v4862_v52 = vmul.f32 %v7624_v49, %v4858_v51 }
 0xc85   :  { %4865 = vrot.lane.b32.xlu0 %v4861_v48, %s7739_s10 }
 0xc86   :  { %4867 = vrot.lane.b32.xlu1 %v4862_v52, %s7739_s10 }
 0xcf4   :  { %v4740_v56 = vpop.permute.xlu1 %4739 }
 0xcf5   :  { %v8494_v46 = vadd.f32 %v4740_v56, %v4732_v37 }
 0xcf7   :  { %v4866_v47 = vpop.permute.xlu0 %4865  ;;  %7625 = vtanh.f32 %v8494_v46 }
 0xcf8   :  { %v8497_v59 = vadd.f32 %v4866_v47, %v4851_v41  ;;  %v4868_v61 = vpop.permute.xlu1 %4867 }
 0xcf9   :  { %v8501_v62 = vadd.f32 %v4868_v61, %v4852_v60 }
 0xcfa   :  { %7627 = vtanh.f32 %v8497_v59  ;;  %v5174_v50 = vrot.slane %v8497_v59, 7 }
 0xcfb   :  { %7629 = vtanh.f32 %v8501_v62 }
 0xd01   :  { %v7626_v53 = vpop.eup %7625 }
 0xd02   :  { %4745 = vrot.lane.b32.xlu0 %v7626_v53, %s7738_s1 }
 0xd04   :  { %v7628_v57 = vpop.eup %7627 }
 0xd05   :  { %4877 = vrot.lane.b32.xlu1 %v7628_v57, %s7738_s1  ;;  %v7630_v63 = vpop.eup %7629 }
 0xd06   :  { %4879 = vrot.lane.b32.xlu0 %v7630_v63, %s7738_s1 }
 0xd74   :  { %v4746_v42 = vpop.permute.xlu0 %4745 }
 0xd75   :  { %v4748_v1 = vmul.f32 %v7620_v36, %v4746_v42  ;;  %v5175_v42 = vrot.slane %v8501_v62, 7 }
 0xd77   :  { %v4878_v2 = vpop.permute.xlu1 %4877  ;;  %4750 = vrot.lane.b32.xlu1 %v4748_v1, %s7739_s10 }
 0xd78   :  { %v4883_v4 = vmul.f32 %v7622_v40, %v4878_v2  ;;  %v4880_v5 = vpop.permute.xlu0 %4879 }
 0xd79   :  { %v4884_v6 = vmul.f32 %v7624_v49, %v4880_v5 }
 0xd7a   :  { %v4967_v9 = vrot.slane %v4883_v4, 2 }
 0xd7b   :  { %v4968_v10 = vrot.slane %v4884_v6, 1 }
 0xd7d   :  { %v4969_v11 = vsel %vm4315_vm6, %v4968_v10, %v4967_v9 }
 0xd7e   :  { %4970 = vrot.lane.b32.xlu0 %v4969_v11, %s7739_s10 }
 0xde9   :  { %v4751_v12 = vpop.permute.xlu1 %4750 }
 0xdea   :  { %4753 = vst.msk [vmem:[#allocation2 + $0x2] sm:$0x3] %vm4427_vm7, %v4751_v12  ;;  %7222 = vmatmul.mubr.msk.f32.vlgmr.msra.gmra.mrb[58].mxu1 %vm3956_vm5, %v4751_v12 }
 0xdeb   :  { %7452 = vmatpush3.bf16.msra.mxu1 %v8323_v3  ;;  %7243 = vmatprep.mubr.msk.f32.mxu1 %vm7736_vm2, %v7735_v0 }
 0xdec   :  { %7453 = vmatprep.subr.bf16.mxu1 %v7737_v21 }
 0xdef   :  { %7455 = vmatpush3.bf16.msra.mxu1 %v8333_v8 }
 0xdf0   :  { %7462 = vmatprep.subr.bf16.mxu1 %v7737_v21  ;;  %v4971_v13 = vpop.permute.xlu0 %4970 }
 0xdf1   :  { %7233 = vmatmul.mubr.msk.f32.vlgmr.msra.gmra.mrb[60].mxu0 %vm3956_vm5, %v4971_v13 }
 0xdf2   :  { %7244 = vmatmul.mubr.msk.f32.vlgmr.msra.gmra.mrb[60].mxu1 %vm3956_vm5, %v4971_v13  ;;  %7458 = vmatpush3.bf16.msra.mxu0 %v8374_v54 }
 0xdf3   :  { %7254 = vmatprep.mubr.msk.f32.mxu0 %vm7736_vm2, %v7735_v0  ;;  %7459 = vmatprep.subr.bf16.mxu0 %v7737_v21 }
 0xdf4   :  { %7464 = vmatpush3.bf16.msra.mxu1 %v8385_v38  ;;  %7265 = vmatprep.mubr.msk.f32.mxu1 %vm7736_vm2, %v7735_v0 }
 0xdf5   :  { %7465 = vmatprep.subr.bf16.mxu1 %v7737_v21 }
 0xdf6   :  { %7461 = vmatpush3.bf16.msra.mxu0 %v8394_v58 }
 0xdf7   :  { %7468 = vmatprep.subr.bf16.mxu0 %v7737_v21 }
 0xdf8   :  { %7467 = vmatpush3.bf16.msra.mxu1 %v8398_v45 }
 0xdf9   :  { %7474 = vmatprep.subr.bf16.mxu1 %v7737_v21 }
 0xebd   :  { %v4961_v14 = vpop.f32.mrb[58].mxu1 }
 0xebe   :  { %v7223_v16 = vpop.f32.mrb[59].mxu1 }
 0xec4   :  { %v5040_v17 = vpop.f32.mrb[60].mxu0 }
 0xec5   :  { %v5147_v18 = vpop.f32.mrb[60].mxu1  ;;  %v5041_v19 = vadd.f32 %v5040_v17, %v4961_v14  ;;  %v7234_v23 = vpop.f32.mrb[61].mxu0 }
 0xec6   :  { %v5152_v22 = vrot.slane %v5147_v18, 5  ;;  %v7245_v24 = vpop.f32.mrb[61].mxu1  ;;  %v5153_v25 = vrot.slane %v5147_v18, 6 }
 0xec7   :  { %v5051_v26 = vadd.f32 %v8433_v7, %v5041_v19 }
 0xec8   :  { %v5156_v27 = vadd.f32 %v5152_v22, %v8349_v15  ;;  %v5157_v28 = vadd.f32 %v5153_v25, %v8352_v20 }
 0xec9   :  { %7631 = vtanh.f32 %v5051_v26  ;;  %v6605_v32 = vmul.f32 -1.442695, %v5051_v26 }
 0xeca   :  { %7633 = vtanh.f32 %v5156_v27  ;;  %v6607_v33 = vmul.f32 -1.442695, %v5156_v27  ;;  %v6608_v34 = vmul.f32 -1.442695, %v5157_v28 }
 0xecb   :  { %7635 = vtanh.f32 %v5157_v28 }
 0xecc   :  { %7637 = vpow2.f32 %v6605_v32 }
 0xecd   :  { %7639 = vpow2.f32 %v6607_v33 }
 0xece   :  { %7641 = vpow2.f32 %v6608_v34 }
 0xed3   :  { %v7632_v29 = vpop.eup %7631 }
 0xed4   :  { %v7634_v30 = vpop.eup %7633  ;;  %5061 = vrot.lane.b32.xlu1 %v7632_v29, %s7738_s1 }
 0xed5   :  { %5182 = vrot.lane.b32.xlu0 %v7634_v30, %s7738_s1  ;;  %v7636_v31 = vpop.eup %7635 }
 0xed6   :  { %v7638_v35 = vpop.eup %7637 }
 0xed7   :  { %v7640_v36 = vpop.eup %7639  ;;  %v5055_v39 = vadd.f32 1.0, %v7638_v35 }
 0xed8   :  { %5184 = vrot.lane.b32.xlu1 %v7636_v31, %s7738_s1  ;;  %v5164_v40 = vadd.f32 1.0, %v7640_v36  ;;  %v7642_v43 = vpop.eup %7641 }
 0xed9   :  { %7643 = vrcp.f32 %v5055_v39  ;;  %v5165_v44 = vadd.f32 1.0, %v7642_v43 }
 0xeda   :  { %7645 = vrcp.f32 %v5164_v40 }
 0xedb   :  { %7647 = vrcp.f32 %v5165_v44 }
 0xee3   :  { %v7644_v48 = vpop.eup %7643 }
 0xee4   :  { %v7646_v51 = vpop.eup %7645  ;;  %v5059_v60 = vmul.f32 %v7644_v48, %v8494_v46 }
 0xee5   :  { %v7648_v56 = vpop.eup %7647  ;;  %v5178_v61 = vmul.f32 %v7646_v51, %v5174_v50 }
 0xee6   :  { %v5179_v2 = vmul.f32 %v7648_v56, %v5175_v42 }
 0xf46   :  { %v5062_v49 = vpop.permute.xlu1 %5061 }
 0xf47   :  { %v5183_v52 = vpop.permute.xlu0 %5182  ;;  %v5064_v55 = vmul.f32 %v7644_v48, %v5062_v49 }
 0xf48   :  { %v5188_v37 = vmul.f32 %v7646_v51, %v5183_v52 }
 0xf49   :  { %5066 = vrot.lane.b32.xlu0 %v5064_v55, %s7739_s10 }
 0xf4a   :  { %5192 = vrot.lane.b32.xlu1 %v5188_v37, %s7739_s10  ;;  %v5185_v41 = vpop.permute.xlu1 %5184 }
 0xf4b   :  { %v5189_v47 = vmul.f32 %v7648_v56, %v5185_v41 }
 0xf4d   :  { %5194 = vrot.lane.b32.xlu0 %v5189_v47, %s7739_s10 }
 0xfbb   :  { %v5067_v53 = vpop.permute.xlu0 %5066 }
 0xfbc   :  { %v5193_v57 = vpop.permute.xlu1 %5192  ;;  %v8543_v63 = vadd.f32 %v5067_v53, %v5059_v60 }
 0xfbd   :  { %v8546_v1 = vadd.f32 %v5193_v57, %v5178_v61 }
 0xfbe   :  { %7649 = vtanh.f32 %v8543_v63 }
 0xfbf   :  { %7651 = vtanh.f32 %v8546_v1  ;;  %v5195_v4 = vpop.permute.xlu0 %5194  ;;  %v5501_v42 = vrot.slane %v8546_v1, 7 }
 0xfc0   :  { %v8550_v5 = vadd.f32 %v5195_v4, %v5179_v2 }
 0xfc2   :  { %7653 = vtanh.f32 %v8550_v5 }
 0xfc8   :  { %v7650_v46 = vpop.eup %7649 }
 0xfc9   :  { %v7652_v59 = vpop.eup %7651  ;;  %5072 = vrot.lane.b32.xlu1 %v7650_v46, %s7738_s1 }
 0xfca   :  { %5204 = vrot.lane.b32.xlu0 %v7652_v59, %s7738_s1 }
 0xfcc   :  { %v7654_v6 = vpop.eup %7653 }
 0xfcd   :  { %5206 = vrot.lane.b32.xlu1 %v7654_v6, %s7738_s1 }
0x103b   :  { %v5073_v62 = vpop.permute.xlu1 %5072 }
0x103c   :  { %v5205_v9 = vpop.permute.xlu0 %5204  ;;  %v5075_v10 = vmul.f32 %v7644_v48, %v5073_v62  ;;  %v5502_v62 = vrot.slane %v8550_v5, 7 }
0x103d   :  { %v5210_v11 = vmul.f32 %v7646_v51, %v5205_v9 }
0x103e   :  { %5077 = vrot.lane.b32.xlu0 %v5075_v10, %s7739_s10 }
0x103f   :  { %v5207_v12 = vpop.permute.xlu1 %5206  ;;  %v5294_v14 = vrot.slane %v5210_v11, 3 }
0x1040   :  { %v5211_v13 = vmul.f32 %v7648_v56, %v5207_v12 }
0x1042   :  { %v5295_v16 = vrot.slane %v5211_v13, 2 }
0x1044   :  { %v5296_v17 = vsel %vm4315_vm6, %v5295_v16, %v5294_v14 }
0x1045   :  { %5297 = vrot.lane.b32.xlu1 %v5296_v17, %s7739_s10 }
0x10b0   :  { %v5078_v18 = vpop.permute.xlu0 %5077 }
0x10b1   :  { %5080 = vst.msk [vmem:[#allocation2 + $0x4] sm:$0x3] %vm4427_vm7, %v5078_v18  ;;  %7255 = vmatmul.mubr.msk.f32.vlgmr.msra.gmra.mrb[62].mxu0 %vm3956_vm5, %v5078_v18 }
0x10b2   :  { %7470 = vmatpush3.bf16.msra.mxu0 %v8323_v3  ;;  %7276 = vmatprep.mubr.msk.f32.mxu0 %vm7736_vm2, %v7735_v0 }
0x10b3   :  { %7471 = vmatprep.subr.bf16.mxu0 %v7737_v21 }
0x10b6   :  { %7473 = vmatpush3.bf16.msra.mxu0 %v8333_v8 }
0x10b7   :  { %7480 = vmatprep.subr.bf16.mxu0 %v7737_v21  ;;  %v5298_v19 = vpop.permute.xlu1 %5297 }
0x10b8   :  { %7266 = vmatmul.mubr.msk.f32.vlgmr.msra.gmra.mrb[62].mxu1 %vm3956_vm5, %v5298_v19 }
0x10b9   :  { %7277 = vmatmul.mubr.msk.f32.vlgmr.msra.gmra.mrb[64].mxu0 %vm3956_vm5, %v5298_v19  ;;  %7476 = vmatpush3.bf16.msra.mxu1 %v8374_v54 }
0x10ba   :  { %7287 = vmatprep.mubr.msk.f32.mxu1 %vm7736_vm2, %v7735_v0  ;;  %7477 = vmatprep.subr.bf16.mxu1 %v7737_v21 }
0x10bb   :  { %7482 = vmatpush3.bf16.msra.mxu0 %v8385_v38  ;;  %7298 = vmatprep.mubr.msk.f32.mxu0 %vm7736_vm2, %v7735_v0 }
0x10bc   :  { %7483 = vmatprep.subr.bf16.mxu0 %v7737_v21 }
0x10bd   :  { %7479 = vmatpush3.bf16.msra.mxu1 %v8394_v58 }
0x10be   :  { %7486 = vmatprep.subr.bf16.mxu1 %v7737_v21 }
0x10bf   :  { %7485 = vmatpush3.bf16.msra.mxu0 %v8398_v45 }
0x10c0   :  { %7492 = vmatprep.subr.bf16.mxu0 %v7737_v21 }
0x1184   :  { %v5288_v22 = vpop.f32.mrb[62].mxu0 }
0x1185   :  { %v7256_v23 = vpop.f32.mrb[63].mxu0 }
0x118b   :  { %v5367_v24 = vpop.f32.mrb[62].mxu1 }
0x118c   :  { %v5474_v25 = vpop.f32.mrb[64].mxu0  ;;  %v5368_v26 = vadd.f32 %v5367_v24, %v5288_v22  ;;  %v7267_v28 = vpop.f32.mrb[63].mxu1 }
0x118d   :  { %v5479_v27 = vrot.slane %v5474_v25, 4  ;;  %v7278_v29 = vpop.f32.mrb[65].mxu0  ;;  %v5480_v30 = vrot.slane %v5474_v25, 5 }
0x118e   :  { %v5378_v31 = vadd.f32 %v8433_v7, %v5368_v26 }
0x118f   :  { %v5483_v32 = vadd.f32 %v5479_v27, %v8349_v15  ;;  %v5484_v33 = vadd.f32 %v5480_v30, %v8352_v20 }
0x1190   :  { %7655 = vtanh.f32 %v5378_v31  ;;  %v6612_v39 = vmul.f32 -1.442695, %v5378_v31 }
0x1191   :  { %7657 = vtanh.f32 %v5483_v32  ;;  %v6614_v40 = vmul.f32 -1.442695, %v5483_v32  ;;  %v6615_v43 = vmul.f32 -1.442695, %v5484_v33 }
0x1192   :  { %7659 = vtanh.f32 %v5484_v33 }
0x1193   :  { %7661 = vpow2.f32 %v6612_v39 }
0x1194   :  { %7663 = vpow2.f32 %v6614_v40 }
0x1195   :  { %7665 = vpow2.f32 %v6615_v43 }
0x119a   :  { %v7656_v34 = vpop.eup %7655 }
0x119b   :  { %v7658_v35 = vpop.eup %7657  ;;  %5388 = vrot.lane.b32.xlu0 %v7656_v34, %s7738_s1 }
0x119c   :  { %5509 = vrot.lane.b32.xlu1 %v7658_v35, %s7738_s1  ;;  %v7660_v36 = vpop.eup %7659 }
0x119d   :  { %v7662_v44 = vpop.eup %7661 }
0x119e   :  { %v7664_v48 = vpop.eup %7663  ;;  %v5382_v49 = vadd.f32 1.0, %v7662_v44 }
0x119f   :  { %5511 = vrot.lane.b32.xlu0 %v7660_v36, %s7738_s1  ;;  %v5491_v51 = vadd.f32 1.0, %v7664_v48  ;;  %v7666_v52 = vpop.eup %7665 }
0x11a0   :  { %7667 = vrcp.f32 %v5382_v49  ;;  %v5492_v55 = vadd.f32 1.0, %v7666_v52 }
0x11a1   :  { %7669 = vrcp.f32 %v5491_v51 }
0x11a2   :  { %7671 = vrcp.f32 %v5492_v55 }
0x11aa   :  { %v7668_v37 = vpop.eup %7667 }
0x11ab   :  { %v7670_v41 = vpop.eup %7669  ;;  %v5386_v2 = vmul.f32 %v7668_v37, %v8543_v63 }
0x11ac   :  { %v7672_v61 = vpop.eup %7671  ;;  %v5505_v46 = vmul.f32 %v7670_v41, %v5501_v42 }
0x11ad   :  { %v5506_v10 = vmul.f32 %v7672_v61, %v5502_v62 }
0x120d   :  { %v5389_v56 = vpop.permute.xlu0 %5388 }
0x120e   :  { %v5391_v47 = vmul.f32 %v7668_v37, %v5389_v56  ;;  %v5510_v50 = vpop.permute.xlu1 %5509 }
0x120f   :  { %v5515_v60 = vmul.f32 %v7670_v41, %v5510_v50 }
0x1210   :  { %5393 = vrot.lane.b32.xlu1 %v5391_v47, %s7739_s10 }
0x1211   :  { %5519 = vrot.lane.b32.xlu0 %v5515_v60, %s7739_s10  ;;  %v5512_v53 = vpop.permute.xlu0 %5511 }
0x1212   :  { %v5516_v57 = vmul.f32 %v7672_v61, %v5512_v53 }
0x1214   :  { %5521 = vrot.lane.b32.xlu1 %v5516_v57, %s7739_s10 }
0x1282   :  { %v5394_v4 = vpop.permute.xlu1 %5393 }
0x1283   :  { %v8592_v59 = vadd.f32 %v5394_v4, %v5386_v2  ;;  %v5520_v6 = vpop.permute.xlu0 %5519 }
0x1284   :  { %v8595_v9 = vadd.f32 %v5520_v6, %v5505_v46 }
0x1285   :  { %7673 = vtanh.f32 %v8592_v59 }
0x1286   :  { %7675 = vtanh.f32 %v8595_v9  ;;  %v5522_v11 = vpop.permute.xlu1 %5521  ;;  %v5828_v2 = vrot.slane %v8595_v9, 7 }
0x1287   :  { %v8599_v12 = vadd.f32 %v5522_v11, %v5506_v10 }
0x1289   :  { %7677 = vtanh.f32 %v8599_v12  ;;  %v5829_v11 = vrot.slane %v8599_v12, 7 }
0x128f   :  { %v7674_v63 = vpop.eup %7673 }
0x1290   :  { %v7676_v1 = vpop.eup %7675  ;;  %5399 = vrot.lane.b32.xlu0 %v7674_v63, %s7738_s1 }
0x1291   :  { %5531 = vrot.lane.b32.xlu1 %v7676_v1, %s7738_s1 }
0x1293   :  { %v7678_v13 = vpop.eup %7677 }
0x1294   :  { %5533 = vrot.lane.b32.xlu0 %v7678_v13, %s7738_s1 }
0x1302   :  { %v5400_v5 = vpop.permute.xlu0 %5399 }
0x1303   :  { %v5402_v14 = vmul.f32 %v7668_v37, %v5400_v5  ;;  %v5532_v16 = vpop.permute.xlu1 %5531 }
0x1304   :  { %v5537_v17 = vmul.f32 %v7670_v41, %v5532_v16 }
0x1305   :  { %5404 = vrot.lane.b32.xlu1 %v5402_v14, %s7739_s10 }
0x1306   :  { %v5534_v18 = vpop.permute.xlu0 %5533  ;;  %v5621_v22 = vrot.slane %v5537_v17, 4 }
0x1307   :  { %v5538_v19 = vmul.f32 %v7672_v61, %v5534_v18 }
0x1309   :  { %v5622_v23 = vrot.slane %v5538_v19, 3 }
0x130b   :  { %v5623_v24 = vsel %vm4315_vm6, %v5622_v23, %v5621_v22 }
0x130c   :  { %5624 = vrot.lane.b32.xlu0 %v5623_v24, %s7739_s10 }
0x1377   :  { %v5405_v25 = vpop.permute.xlu1 %5404 }
0x1378   :  { %5407 = vst.msk [vmem:[#allocation2 + $0x6] sm:$0x3] %vm4427_vm7, %v5405_v25  ;;  %7288 = vmatmul.mubr.msk.f32.vlgmr.msra.gmra.mrb[64].mxu1 %vm3956_vm5, %v5405_v25 }
0x1379   :  { %7488 = vmatpush3.bf16.msra.mxu1 %v8323_v3  ;;  %7309 = vmatprep.mubr.msk.f32.mxu1 %vm7736_vm2, %v7735_v0 }
0x137a   :  { %7489 = vmatprep.subr.bf16.mxu1 %v7737_v21 }
0x137d   :  { %7491 = vmatpush3.bf16.msra.mxu1 %v8333_v8 }
0x137e   :  { %7498 = vmatprep.subr.bf16.mxu1 %v7737_v21  ;;  %v5625_v26 = vpop.permute.xlu0 %5624 }
0x137f   :  { %7299 = vmatmul.mubr.msk.f32.vlgmr.msra.gmra.mrb[66].mxu0 %vm3956_vm5, %v5625_v26 }
0x1380   :  { %7310 = vmatmul.mubr.msk.f32.vlgmr.msra.gmra.mrb[66].mxu1 %vm3956_vm5, %v5625_v26  ;;  %7494 = vmatpush3.bf16.msra.mxu0 %v8374_v54 }
0x1381   :  { %7320 = vmatprep.mubr.msk.f32.mxu0 %vm7736_vm2, %v7735_v0  ;;  %7495 = vmatprep.subr.bf16.mxu0 %v7737_v21 }
0x1382   :  { %7500 = vmatpush3.bf16.msra.mxu1 %v8385_v38  ;;  %7331 = vmatprep.mubr.msk.f32.mxu1 %vm7736_vm2, %v7735_v0 }
0x1383   :  { %7501 = vmatprep.subr.bf16.mxu1 %v7737_v21 }
0x1384   :  { %7497 = vmatpush3.bf16.msra.mxu0 %v8394_v58 }
0x1385   :  { %7504 = vmatprep.subr.bf16.mxu0 %v7737_v21 }
0x1386   :  { %7503 = vmatpush3.bf16.msra.mxu1 %v8398_v45 }
0x1387   :  { %7510 = vmatprep.subr.bf16.mxu1 %v7737_v21 }
0x144b   :  { %v5615_v54 = vpop.f32.mrb[64].mxu1 }
0x144c   :  { %v7289_v27 = vpop.f32.mrb[65].mxu1 }
0x1452   :  { %v5694_v28 = vpop.f32.mrb[66].mxu0 }
0x1453   :  { %v5801_v29 = vpop.f32.mrb[66].mxu1  ;;  %v5695_v30 = vadd.f32 %v5694_v28, %v5615_v54  ;;  %v7300_v38 = vpop.f32.mrb[67].mxu0 }
0x1454   :  { %v5806_v31 = vrot.slane %v5801_v29, 3  ;;  %v7311_v32 = vpop.f32.mrb[67].mxu1  ;;  %v5807_v33 = vrot.slane %v5801_v29, 4 }
0x1455   :  { %v5705_v34 = vadd.f32 %v8433_v7, %v5695_v30 }
0x1456   :  { %v5810_v35 = vadd.f32 %v5806_v31, %v8349_v15  ;;  %v5811_v58 = vadd.f32 %v5807_v33, %v8352_v20 }
0x1457   :  { %7679 = vtanh.f32 %v5705_v34  ;;  %v6619_v40 = vmul.f32 -1.442695, %v5705_v34 }
0x1458   :  { %7681 = vtanh.f32 %v5810_v35  ;;  %v6621_v43 = vmul.f32 -1.442695, %v5810_v35  ;;  %v6622_v44 = vmul.f32 -1.442695, %v5811_v58 }
0x1459   :  { %7683 = vtanh.f32 %v5811_v58 }
0x145a   :  { %7685 = vpow2.f32 %v6619_v40 }
0x145b   :  { %7687 = vpow2.f32 %v6621_v43 }
0x145c   :  { %7689 = vpow2.f32 %v6622_v44 }
0x1461   :  { %v7680_v45 = vpop.eup %7679 }
0x1462   :  { %v7682_v36 = vpop.eup %7681  ;;  %5715 = vrot.lane.b32.xlu1 %v7680_v45, %s7738_s1 }
0x1463   :  { %5836 = vrot.lane.b32.xlu0 %v7682_v36, %s7738_s1  ;;  %v7684_v39 = vpop.eup %7683 }
0x1464   :  { %v7686_v48 = vpop.eup %7685 }
0x1465   :  { %v7688_v49 = vpop.eup %7687  ;;  %v5709_v51 = vadd.f32 1.0, %v7686_v48 }
0x1466   :  { %5838 = vrot.lane.b32.xlu1 %v7684_v39, %s7738_s1  ;;  %v5818_v52 = vadd.f32 1.0, %v7688_v49  ;;  %v7690_v55 = vpop.eup %7689 }
0x1467   :  { %7691 = vrcp.f32 %v5709_v51  ;;  %v5819_v37 = vadd.f32 1.0, %v7690_v55 }
0x1468   :  { %7693 = vrcp.f32 %v5818_v52 }
0x1469   :  { %7695 = vrcp.f32 %v5819_v37 }
0x1471   :  { %v7692_v56 = vpop.eup %7691 }
0x1472   :  { %v7694_v47 = vpop.eup %7693  ;;  %v5713_v4 = vmul.f32 %v7692_v56, %v8592_v59 }
0x1473   :  { %v7696_v53 = vpop.eup %7695  ;;  %v5832_v46 = vmul.f32 %v7694_v47, %v5828_v2 }
0x1474   :  { %v5833_v1 = vmul.f32 %v7696_v53, %v5829_v11 }
0x14d4   :  { %v5716_v41 = vpop.permute.xlu1 %5715 }
0x14d5   :  { %v5837_v50 = vpop.permute.xlu0 %5836  ;;  %v5718_v60 = vmul.f32 %v7692_v56, %v5716_v41 }
0x14d6   :  { %v5842_v61 = vmul.f32 %v7694_v47, %v5837_v50 }
0x14d7   :  { %5720 = vrot.lane.b32.xlu0 %v5718_v60, %s7739_s10 }
0x14d8   :  { %5846 = vrot.lane.b32.xlu1 %v5842_v61, %s7739_s10  ;;  %v5839_v57 = vpop.permute.xlu1 %5838 }
0x14d9   :  { %v5843_v42 = vmul.f32 %v7696_v53, %v5839_v57 }
0x14db   :  { %5848 = vrot.lane.b32.xlu0 %v5843_v42, %s7739_s10 }
0x1549   :  { %v5721_v6 = vpop.permute.xlu0 %5720 }
0x154a   :  { %v5847_v62 = vpop.permute.xlu1 %5846  ;;  %v8641_v10 = vadd.f32 %v5721_v6, %v5713_v4 }
0x154b   :  { %v8644_v63 = vadd.f32 %v5847_v62, %v5832_v46 }
0x154c   :  { %7697 = vtanh.f32 %v8641_v10 }
0x154d   :  { %7699 = vtanh.f32 %v8644_v63  ;;  %v5849_v13 = vpop.permute.xlu0 %5848  ;;  %v6155_v60 = vrot.slane %v8644_v63, 7  ;;  %v6193_v63 = vld [vmem:[%s8766_s11] sm:$0xff] }
0x154e   :  { %v8648_v5 = vadd.f32 %v5849_v13, %v5833_v1  ;;  %v6194_v1 = vld [vmem:[%s8766_s11 + $0x8] sm:$0xff] }
0x154f   :  { %v7517_v13 = vpack.c.bf16 %v6194_v1, %v6193_v63 }
0x1550   :  { %7701 = vtanh.f32 %v8648_v5  ;;  %v6156_v57 = vrot.slane %v8648_v5, 7  ;;  %v6198_v5 = vld [vmem:[%s8765_s12 + $0x8] sm:$0xff] }
0x1556   :  { %v7698_v59 = vpop.eup %7697 }
0x1557   :  { %v7700_v9 = vpop.eup %7699  ;;  %5726 = vrot.lane.b32.xlu1 %v7698_v59, %s7738_s1  ;;  %v6195_v59 = vld [vmem:[%s8766_s11 + $0x10] sm:$0xff] }
0x1558   :  { %5858 = vrot.lane.b32.xlu0 %v7700_v9, %s7738_s1  ;;  %v6196_v9 = vld [vmem:[%s8766_s11 + $0x18] sm:$0xff] }
0x155a   :  { %v7702_v14 = vpop.eup %7701 }
0x155b   :  { %5860 = vrot.lane.b32.xlu1 %v7702_v14, %s7738_s1 }
0x15c9   :  { %v5727_v12 = vpop.permute.xlu1 %5726 }
0x15ca   :  { %v5859_v16 = vpop.permute.xlu0 %5858  ;;  %v5729_v17 = vmul.f32 %v7692_v56, %v5727_v12  ;;  %v6199_v12 = vld [vmem:[%s8765_s12 + $0x10] sm:$0xff] }
0x15cb   :  { %v5864_v18 = vmul.f32 %v7694_v47, %v5859_v16  ;;  %v6200_v16 = vld [vmem:[%s8765_s12 + $0x18] sm:$0xff] }
0x15cc   :  { %5731 = vrot.lane.b32.xlu0 %v5729_v17, %s7739_s10 }
0x15cd   :  { %v5861_v19 = vpop.permute.xlu1 %5860  ;;  %v5948_v23 = vrot.slane %v5864_v18, 5  ;;  %v7520_v18 = vpack.c.bf16 %v6196_v9, %v6195_v59 }
0x15ce   :  { %v5865_v22 = vmul.f32 %v7696_v53, %v5861_v19  ;;  %v7514_v19 = vpack.c.bf16 %v6200_v16, %v6199_v12 }
0x15d0   :  { %v5949_v24 = vrot.slane %v5865_v22, 4 }
0x15d2   :  { %v5950_v25 = vsel %vm4315_vm6, %v5949_v24, %v5948_v23 }
0x15d3   :  { %5951 = vrot.lane.b32.xlu1 %v5950_v25, %s7739_s10 }
0x163e   :  { %v5732_v26 = vpop.permute.xlu0 %5731 }
0x163f   :  { %5734 = vst.msk [vmem:[#allocation2 + $0x8] sm:$0x3] %vm4427_vm7, %v5732_v26  ;;  %7321 = vmatmul.mubr.msk.f32.vlgmr.msra.gmra.mrb[68].mxu0 %vm3956_vm5, %v5732_v26 }
0x1640   :  { %7506 = vmatpush3.bf16.msra.mxu0 %v8323_v3  ;;  %7342 = vmatprep.mubr.msk.f32.mxu0 %vm7736_vm2, %v7735_v0 }
0x1641   :  { %7507 = vmatprep.subr.bf16.mxu0 %v7737_v21 }
0x1644   :  { %7509 = vmatpush3.bf16.msra.mxu0 %v8333_v8 }
0x1645   :  { %7516 = vmatprep.subr.bf16.mxu0 %v7737_v21  ;;  %v5952_v54 = vpop.permute.xlu1 %5951 }
0x1646   :  { %7332 = vmatmul.mubr.msk.f32.vlgmr.msra.gmra.mrb[68].mxu1 %vm3956_vm5, %v5952_v54 }
0x1647   :  { %7343 = vmatmul.mubr.msk.f32.vlgmr.msra.gmra.mrb[70].mxu0 %vm3956_vm5, %v5952_v54  ;;  %7353 = vmatprep.mubr.msk.f32.mxu1 %vm7736_vm2, %v7735_v0 }
0x1648   :  { %7364 = vmatprep.mubr.msk.f32.mxu0 %vm7736_vm2, %v7735_v0  ;;  %7518 = vmatpush3.bf16.msra.mxu0 %v7517_v13 }
0x1649   :  { %7519 = vmatprep.subr.bf16.mxu0 %v7737_v21 }
0x164c   :  { %7521 = vmatpush3.bf16.msra.mxu0 %v7520_v18 }
0x1712   :  { %v5942_v3 = vpop.f32.mrb[68].mxu0 }
0x1713   :  { %v7322_v27 = vpop.f32.mrb[69].mxu0 }
0x1719   :  { %v6021_v28 = vpop.f32.mrb[68].mxu1 }
0x171a   :  { %v6128_v29 = vpop.f32.mrb[70].mxu0  ;;  %v6022_v30 = vadd.f32 %v6021_v28, %v5942_v3  ;;  %v7333_v8 = vpop.f32.mrb[69].mxu1 }
0x171b   :  { %v6133_v31 = vrot.slane %v6128_v29, 2  ;;  %v7344_v38 = vpop.f32.mrb[71].mxu0  ;;  %v6134_v32 = vrot.slane %v6128_v29, 3 }
0x171c   :  { %v6032_v34 = vadd.f32 %v8433_v7, %v6022_v30  ;;  %v6389_v30 = vld [vmem:[#allocation2] sm:$0xff] }
0x171d   :  { %v6137_v33 = vadd.f32 %v6133_v31, %v8349_v15  ;;  %v6138_v35 = vadd.f32 %v6134_v32, %v8352_v20  ;;  %v6391_v8 = vmax.f32 %v6389_v30, 0.0 }
0x171e   :  { %v6626_v39 = vmul.f32 -1.442695, %v6032_v34 }
0x171f   :  { %7703 = vtanh.f32 %v6137_v33  ;;  %v6628_v36 = vmul.f32 -1.442695, %v6137_v33  ;;  %v6629_v15 = vmul.f32 -1.442695, %v6138_v35 }
0x1720   :  { %7705 = vtanh.f32 %v6032_v34 }
0x1721   :  { %7707 = vtanh.f32 %v6138_v35  ;;  %v6632_v35 = vld [vmem:[%s8767_s13] ss:$0 sm:$0xff] }
0x1722   :  { %7709 = vpow2.f32 %v6628_v36 }
0x1723   :  { %7711 = vpow2.f32 %v6626_v39 }
0x1724   :  { %7713 = vpow2.f32 %v6629_v15 }
0x1729   :  { %v7704_v58 = vpop.eup %7703 }
0x172a   :  { %6163 = vrot.lane.b32.xlu0 %v7704_v58, %s7738_s1  ;;  %v7706_v0 = vpop.eup %7705 }
0x172b   :  { %v7708_v45 = vpop.eup %7707 }
0x172c   :  { %6165 = vrot.lane.b32.xlu1 %v7708_v45, %s7738_s1  ;;  %v7710_v7 = vpop.eup %7709 }
0x172d   :  { %v7712_v20 = vpop.eup %7711  ;;  %v6145_v40 = vadd.f32 1.0, %v7710_v7 }
0x172e   :  { %6042 = vrot.lane.b32.xlu0 %v7706_v0, %s7738_s1  ;;  %v7714_v43 = vpop.eup %7713  ;;  %v6036_v44 = vadd.f32 1.0, %v7712_v20 }
0x172f   :  { %v6146_v48 = vadd.f32 1.0, %v7714_v43  ;;  %7715 = vrcp.f32 %v6145_v40 }
0x1730   :  { %7717 = vrcp.f32 %v6036_v44 }
0x1731   :  { %7719 = vrcp.f32 %v6146_v48 }
0x1739   :  { %v7716_v49 = vpop.eup %7715 }
0x173a   :  { %v7718_v55 = vpop.eup %7717  ;;  %v6159_v61 = vmul.f32 %v7716_v49, %v6155_v60 }
0x173b   :  { %v7720_v37 = vpop.eup %7719  ;;  %v6040_v4 = vmul.f32 %v7718_v55, %v8641_v10  ;;  %v6197_v10 = vld [vmem:[%s8765_s12] sm:$0xff] }
0x173c   :  { %v6160_v2 = vmul.f32 %v7720_v37, %v6156_v57  ;;  %v7511_v14 = vpack.c.bf16 %v6198_v5, %v6197_v10 }
0x173e   :  { %7512 = vmatpush3.bf16.msra.mxu1 %v7511_v14 }
0x173f   :  { %7513 = vmatprep.subr.bf16.mxu1 %v7737_v21 }
0x1742   :  { %7515 = vmatpush3.bf16.msra.mxu1 %v7514_v19 }
0x179c   :  { %v6164_v51 = vpop.permute.xlu0 %6163 }
0x179d   :  { %v6169_v52 = vmul.f32 %v7716_v49, %v6164_v51 }
0x179e   :  { %v6166_v56 = vpop.permute.xlu1 %6165 }
0x179f   :  { %6173 = vrot.lane.b32.xlu1 %v6169_v52, %s7739_s10  ;;  %v6170_v47 = vmul.f32 %v7720_v37, %v6166_v56  ;;  %v6393_v52 = vld [vmem:[%s8768_s14] sm:$0xff] }
0x17a0   :  { %v6043_v41 = vpop.permute.xlu0 %6042 }
0x17a1   :  { %v6045_v50 = vmul.f32 %v7718_v55, %v6043_v41  ;;  %6175 = vrot.lane.b32.xlu0 %v6170_v47, %s7739_s10  ;;  %v6396_v41 = vld [vmem:[%s8768_s14 + $0x18] sm:$0xff] }
0x17a3   :  { %6047 = vrot.lane.b32.xlu1 %v6045_v50, %s7739_s10 }
0x1811   :  { %v6174_v53 = vpop.permute.xlu1 %6173 }
0x1812   :  { %v6179_v42 = vadd.f32 %v6174_v53, %v6159_v61 }
0x1813   :  { %v6176_v46 = vpop.permute.xlu0 %6175 }
0x1814   :  { %7721 = vtanh.f32 %v6179_v42  ;;  %v6180_v62 = vadd.f32 %v6176_v46, %v6160_v2  ;;  %v6634_v42 = vld [vmem:[%s8769_s15] ss:$0 sm:$0xff] }
0x1815   :  { %v6048_v6 = vpop.permute.xlu1 %6047 }
0x1816   :  { %v8683_v11 = vadd.f32 %v6048_v6, %v6040_v4  ;;  %7723 = vtanh.f32 %v6180_v62 }
0x1818   :  { %7725 = vtanh.f32 %v8683_v11 }
0x181e   :  { %v7722_v17 = vpop.eup %7721 }
0x181f   :  { %6185 = vrot.lane.b32.xlu0 %v7722_v17, %s7738_s1 }
0x1820   :  { %v7724_v22 = vpop.eup %7723 }
0x1821   :  { %6187 = vrot.lane.b32.xlu1 %v7724_v22, %s7738_s1 }
0x1822   :  { %v7726_v23 = vpop.eup %7725 }
0x1823   :  { %6053 = vrot.lane.b32.xlu0 %v7726_v23, %s7738_s1 }
0x1891   :  { %v6186_v24 = vpop.permute.xlu0 %6185 }
0x1892   :  { %v6191_v25 = vmul.f32 %v7716_v49, %v6186_v24 }
0x1893   :  { %v6188_v26 = vpop.permute.xlu1 %6187 }
0x1894   :  { %v6192_v54 = vmul.f32 %v7720_v37, %v6188_v26  ;;  %v6275_v3 = vrot.slane %v6191_v25, 6  ;;  %v6395_v37 = vld [vmem:[%s8768_s14 + $0x10] sm:$0xff] }
0x1895   :  { %v6054_v27 = vpop.permute.xlu0 %6053  ;;  %v7526_v47 = vpack.c.bf16 %v6396_v41, %v6395_v37 }
0x1896   :  { %v6056_v28 = vmul.f32 %v7718_v55, %v6054_v27  ;;  %v6276_v29 = vrot.slane %v6192_v54, 5  ;;  %v6394_v55 = vld [vmem:[%s8768_s14 + $0x8] sm:$0xff] }
0x1897   :  { %v7522_v56 = vpack.c.bf16 %v6394_v55, %v6393_v52 }
0x1898   :  { %6058 = vrot.lane.b32.xlu1 %v6056_v28, %s7739_s10  ;;  %v6277_v21 = vsel %vm4315_vm6, %v6276_v29, %v6275_v3 }
0x1899   :  { %6278 = vrot.lane.b32.xlu0 %v6277_v21, %s7739_s10  ;;  %7523 = vmatprep.subr.bf16.mxu1 %v7522_v56 }
0x190a   :  { %v6059_v31 = vpop.permute.xlu1 %6058 }
0x190b   :  { %6061 = vst.msk [vmem:[#allocation2 + $0xa] sm:$0x3] %vm4427_vm7, %v6059_v31  ;;  %7354 = vmatmul.mubr.msk.f32.vlgmr.msra.gmra.mrb[70].mxu1 %vm3956_vm5, %v6059_v31  ;;  %v6279_v38 = vpop.permute.xlu0 %6278 }
0x190c   :  { %7375 = vmatprep.mubr.msk.f32.mxu1 %vm3956_vm5, %v6391_v8  ;;  %7365 = vmatmul.mubr.msk.f32.vlgmr.msra.gmra.mrb[72].mxu0 %vm3956_vm5, %v6279_v38 }
0x190d   :  { %7525 = vmatpush3.bf16.msra.mxu1 %v7522_v56 }
0x190e   :  { %7527 = vmatprep.subr.bf16.mxu1 %v7526_v47 }
0x1911   :  { %7529 = vmatpush3.bf16.msra.mxu1 %v7526_v47 }
0x19de   :  { %v6269_v32 = vpop.f32.mrb[70].mxu1 }
0x19df   :  { %v7355_v33 = vpop.f32.mrb[71].mxu1  ;;  %v6348_v34 = vpop.f32.mrb[72].mxu0 }
0x19e0   :  { %v6349_v58 = vadd.f32 %v6348_v34, %v6269_v32  ;;  %v7366_v0 = vpop.f32.mrb[73].mxu0 }
0x19e2   :  { %v6359_v45 = vadd.f32 %v6632_v35, %v6349_v58 }
0x19e4   :  { %7727 = vtanh.f32 %v6359_v45  ;;  %v6633_v39 = vmul.f32 -1.442695, %v6359_v45 }
0x19e6   :  { %7729 = vpow2.f32 %v6633_v39 }
0x19ee   :  { %v7728_v36 = vpop.eup %7727 }
0x19ef   :  { %6369 = vrot.lane.b32.xlu1 %v7728_v36, %s7738_s1 }
0x19f0   :  { %v7730_v15 = vpop.eup %7729 }
0x19f1   :  { %v6363_v7 = vadd.f32 1.0, %v7730_v15 }
0x19f3   :  { %7731 = vrcp.f32 %v6363_v7 }
0x19fd   :  { %v7732_v20 = vpop.eup %7731 }
0x19fe   :  { %v6367_v44 = vmul.f32 %v7732_v20, %v8683_v11 }
0x1a61   :  { %v6370_v40 = vpop.permute.xlu1 %6369 }
0x1a62   :  { %v6372_v43 = vmul.f32 %v7732_v20, %v6370_v40 }
0x1a64   :  { %6374 = vrot.lane.b32.xlu0 %v6372_v43, %s7739_s10 }
0x1ad6   :  { %v6375_v48 = vpop.permute.xlu0 %6374 }
0x1ad7   :  { %v6377_v49 = vadd.f32 %v6375_v48, %v6367_v44 }
0x1ad9   :  { %7733 = vtanh.f32 %v6377_v49 }
0x1ae3   :  { %v7734_v51 = vpop.eup %7733 }
0x1ae4   :  { %6380 = vrot.lane.b32.xlu1 %v7734_v51, %s7738_s1 }
0x1b56   :  { %v6381_v50 = vpop.permute.xlu1 %6380 }
0x1b57   :  { %v6383_v60 = vmul.f32 %v7732_v20, %v6381_v50 }
0x1b59   :  { %6385 = vrot.lane.b32.xlu0 %v6383_v60, %s7739_s10 }
0x1bcb   :  { %v6386_v61 = vpop.permute.xlu0 %6385 }
0x1bcc   :  { %6388 = vst.msk [vmem:[#allocation2 + $0xc] sm:$0x3] %vm4427_vm7, %v6386_v61 }
0x1bd3   :  { %v6390_v53 = vld [vmem:[#allocation2 + $0x8] sm:$0x3f] }
0x1bd4   :  { %v6392_v57 = vmax.f32 %v6390_v53, 0.0 }
0x1bd6   :  { %7376 = vmatmul.mubr.msk.f32.vlgmr.msra.gmra.mrb[72].mxu1 %vm3956_vm5, %v6392_v57 }
0x1ca9   :  { %v7377_v2 = vpop.f32.mrb[72].mxu1 }
0x1caa   :  { %v6482_v4 = vadd.f32 %v7377_v2, %v6634_v42  ;;  %v6476_v46 = vpop.f32.mrb[73].mxu1 }
0x1cab   :  { %v6477_v6 = vadd.f32 %v6634_v42, %v6476_v46 }
0x1cac   :  { %6487 = vst.msk [vmem:[%s8770_s16 + $0x8] sm:$0x3f] %vm6486_vm8, %v6482_v4 }
0x1cad   :  { %6485 = vst.msk [vmem:[%s8770_s16] sm:$0xff] %vm69_vm1, %v6477_v6 }

</bundles_post_ra>
